<compile_context>
chip_gen: v6e
topology: v6e:2x2x1
jax: 0.10.0
libtpu: 0.0.40
codegen_flags: <defaults>
</compile_context>

<pallas_src>
import functools

import jax
import jax.numpy as jnp
from jax.experimental import pallas as pl
from jax.experimental.pallas import tpu as pltpu


# ----------------------------------------------------------------------------
# Fused HardGANet forward kernel
# ----------------------------------------------------------------------------
def _hardganet_kernel(*refs, k, negative_slope, module_dims, module_has_res):
    it = iter(refs)
    adj_ref = next(it)        # (N, N) f32  adj[src, dst]
    adjt_ref = next(it)       # (N, N) f32  adj^T[dst, src]
    x_ref = next(it)          # (N, in_dim)
    emb_w_ref = next(it)      # (in_dim, intm)
    emb_b_ref = next(it)      # (1, intm)
    net_res_w_ref = next(it)  # (intm, hid)
    out_w_ref = next(it)      # (hid, out_dim)
    out_b_ref = next(it)      # (1, out_dim)
    mods = []
    for has_res in module_has_res:
        m = {"p": next(it), "wp": next(it), "al": next(it), "gcn_w": next(it)}
        if has_res:
            m["res_w"] = next(it)
            m["res_b"] = next(it)
        mods.append(m)
    out_ref = next(it)

    f32 = jnp.float32

    adj = adj_ref[...]
    adjt = adjt_ref[...]
    n = adj.shape[0]

    # ---- hoisted degree normalisation (shared by all GraphConv layers) ----
    deg_out = jnp.sum(adj, axis=1, keepdims=True)     # (N,1) per-src, lane reduce
    deg_in = jnp.sum(adjt, axis=1, keepdims=True)     # (N,1) per-dst, lane reduce
    inv_sq_out = jax.lax.rsqrt(jnp.maximum(deg_out, 1.0))
    inv_sq_in = jax.lax.rsqrt(jnp.maximum(deg_in, 1.0))
    edge_mask = adjt > 0.0                            # (N,N) [dst, src]

    iu_row = jax.lax.broadcasted_iota(jnp.int32, (n, n), 0)   # u' (competitor src)
    iu_col = jax.lax.broadcasted_iota(jnp.int32, (n, n), 1)   # u  (edge src)

    def matmul(a, b):
        # f32 x f32 -> f32 (exact; supported on MXU and in interpret mode)
        return jnp.dot(a.astype(f32), b.astype(f32), preferred_element_type=f32)

    def graph_conv(h, w, b):
        # DGL GraphConv norm='both':  D_in^{-1/2} A^T D_out^{-1/2} h W (+ b)
        agg = matmul(adjt, h * inv_sq_out)                     # (N, Fin)
        out = matmul(agg * inv_sq_in, w)
        return out if b is None else out + b

    def hard_gao(h, p, wp, al, fo):
        # projection score y_u = |p . h_u| / max(||p||_2, eps)
        inv_pn = jax.lax.rsqrt(jnp.maximum(jnp.sum(p * p, keepdims=True), 1e-24))
        y_col = jnp.abs(jax.lax.dot_general(
            h, p, (((1,), (1,)), ((), ())),
            preferred_element_type=f32)) * inv_pn              # (N,1)  y[row]
        y_row = jnp.abs(jax.lax.dot_general(
            p, h, (((1,), (1,)), ((), ())),
            preferred_element_type=f32)) * inv_pn              # (1,N)  y[col]

        # hard top-k in-edge selection (select_topk on src score 'y'):
        # beats[u', u] = 1 iff u' (tie-broken by index) outranks u.
        beats = jnp.logical_and(
            jnp.logical_or(y_col > y_row,
                           jnp.logical_and(y_col == y_row, iu_row < iu_col)),
            iu_row != iu_col).astype(f32)
        # rank[v, u] = #{in-neighbours u' of v beating u}; 0/1 f32 matmul -> exact
        rank = matmul(adjt, beats)
        keep = jnp.logical_and(edge_mask, rank < float(k))     # (N_dst, N_src)

        # sigmoid node gate + packed projection [ft | er]
        ys = jax.nn.sigmoid(y_col)                             # (N,1)
        proj = matmul(ys * h, wp)                              # (N, fo+1)
        ft = proj[:, :fo]                                      # (N, fo)
        er = proj[:, fo:fo + 1]                                # (N, 1)  per-dst
        el = jax.lax.dot_general(al, ft, (((1,), (1,)), ((), ())),
                                 preferred_element_type=f32)   # (1, N)  per-src

        e = er + el                                            # e[v,u] = el[u]+er[v]
        e = jnp.where(e >= 0.0, e, negative_slope * e)         # leaky relu
        e = jnp.where(keep, e, jnp.float32(-1e30))
        m = jnp.max(e, axis=1, keepdims=True)                  # (N,1) per-dst
        p_un = jnp.where(keep, jnp.exp(e - m), 0.0)
        denom = jnp.sum(p_un, axis=1, keepdims=True)           # (N,1)
        inv_d = pl.reciprocal(jnp.where(denom > 0.0, denom, 1.0), approx=True)
        a = p_un * inv_d                                       # edge softmax
        # rst[v] = sum_u a[v,u] * ft[u]
        return matmul(a, ft)

    # ------------------------------ forward ------------------------------
    h = graph_conv(x_ref[...], emb_w_ref[...], emb_b_ref[...])       # (N, intm)
    for idx, (m, fo) in enumerate(zip(mods, module_dims)):
        hg = hard_gao(h, m["p"][...], m["wp"][...], m["al"][...], fo)  # (N, cur)
        ret = graph_conv(hg, m["gcn_w"][...], None)                    # (N, hid)
        if "res_w" in m:                       # HardGAM residual projection
            ret = ret + matmul(h, m["res_w"][...]) + m["res_b"][...]
        else:                                  # identity module residual
            ret = ret + h
        if idx == 0:                           # net residual res[0] = Linear(intm,hid)
            h = ret + matmul(h, net_res_w_ref[...])
        else:                                  # net residual res[1] = Identity
            h = ret + h
    out_ref[...] = graph_conv(h, out_w_ref[...], out_b_ref[...])      # (N, out_dim)


# ----------------------------------------------------------------------------
# Wrapper: packs weights and launches the single fused pallas_call
# ----------------------------------------------------------------------------
def hardganet_forward(adj, x, params, *, k=8, negative_slope=0.2):
    adj = adj.astype(jnp.float32)
    adj_t = jnp.swapaxes(adj, 0, 1)

    inputs = [adj, adj_t, x.astype(jnp.float32),
              params["emb_w"], params["emb_b"].reshape(1, -1),
              params["net_res_w"],
              params["out_w"], params["out_b"].reshape(1, -1)]

    module_dims, module_has_res = [], []
    for m in params["modules"]:
        cur = m["fc_w"].shape[0]
        # fold er into the fc projection: W' = [fc_w | fc_w @ attn_r^T]
        w_packed = jnp.concatenate([m["fc_w"], m["fc_w"] @ m["attn_r"].T], axis=1)
        inputs += [m["p"], w_packed, m["attn_l"], m["gcn_w"]]
        has_res = "res_w" in m
        if has_res:
            inputs += [m["res_w"], m["res_b"].reshape(1, -1)]
        module_dims.append(cur)
        module_has_res.append(has_res)

    n = adj.shape[0]
    out_dim = params["out_w"].shape[1]
    kern = functools.partial(
        _hardganet_kernel, k=k, negative_slope=negative_slope,
        module_dims=tuple(module_dims), module_has_res=tuple(module_has_res))

    return pl.pallas_call(
        kern,
        out_shape=jax.ShapeDtypeStruct((n, out_dim), jnp.float32),
        in_specs=[pl.BlockSpec(memory_space=pltpu.MemorySpace.VMEM)] * len(inputs),
        out_specs=pl.BlockSpec(memory_space=pltpu.MemorySpace.VMEM),
        compiler_params=pltpu.CompilerParams(vmem_limit_bytes=32 * 1024 * 1024),
    )(*inputs)


# ----------------------------------------------------------------------------
# Parameters (deterministic synthetic xavier-normal-style init)
# ----------------------------------------------------------------------------
def init_params(key, in_dim, intm_dim=48, hid_dim=16, out_dim=7, num_module=4):
    gain = 2.0 ** 0.5
    keys = iter(jax.random.split(key, 64))

    def xn(fan_in, fan_out, shape):
        std = gain * (2.0 / (fan_in + fan_out)) ** 0.5
        return std * jax.random.normal(next(keys), shape, jnp.float32)

    params = {
        "emb_w": xn(in_dim, intm_dim, (in_dim, intm_dim)),
        "emb_b": jnp.zeros((intm_dim,), jnp.float32),
        "net_res_w": xn(intm_dim, hid_dim, (intm_dim, hid_dim)),  # Linear(intm,hid,bias=False)
        "out_w": xn(hid_dim, out_dim, (hid_dim, out_dim)),
        "out_b": jnp.zeros((out_dim,), jnp.float32),
        "modules": [],
    }
    for n in range(num_module):
        cur = intm_dim if n == 0 else hid_dim
        m = {
            "p": xn(1, cur, (1, cur)),                  # HardGAO projection vector
            "fc_w": xn(cur, cur, (cur, cur)),           # HardGAO fc (heads=1)
            "attn_l": xn(1, cur, (1, cur)),
            "attn_r": xn(1, cur, (1, cur)),
            "gcn_w": xn(cur, hid_dim, (cur, hid_dim)),  # HardGAM GraphConv, bias=False
        }
        if cur != hid_dim:                              # HardGAM res_m = Linear(cur, hid)
            m["res_w"] = xn(cur, hid_dim, (cur, hid_dim))
            m["res_b"] = jnp.zeros((hid_dim,), jnp.float32)
        params["modules"].append(m)
    return params


if __name__ == "__main__":
    key = jax.random.PRNGKey(0)
    k_adj, k_x, k_p = jax.random.split(key, 3)

    N, IN_DIM, OUT_DIM = 32, 8, 7
    # random directed graph with self loops (guarantees nonzero in-degree)
    adj = (jax.random.uniform(k_adj, (N, N)) < 0.3).astype(jnp.float32)
    adj = jnp.maximum(adj, jnp.eye(N, dtype=jnp.float32))
    x = jax.random.normal(k_x, (N, IN_DIM), jnp.float32)

    params = init_params(k_p, IN_DIM, intm_dim=48, hid_dim=16,
                         out_dim=OUT_DIM, num_module=4)

    out = jax.jit(hardganet_forward)(adj, x, params)
    out = jax.block_until_ready(out)

    assert out.shape == (N, OUT_DIM), out.shape
    assert bool(jnp.all(jnp.isfinite(out)))
    print("KERNEL_OK")
</pallas_src>

<mosaic_0001>
module attributes {stable_mosaic.version = 11 : i64} {
  func.func @_hardganet_kernel(%arg0: memref<32x32xf32, #tpu.memory_space<vmem>>, %arg1: memref<32x32xf32, #tpu.memory_space<vmem>>, %arg2: memref<32x8xf32, #tpu.memory_space<vmem>>, %arg3: memref<8x48xf32, #tpu.memory_space<vmem>>, %arg4: memref<1x48xf32, #tpu.memory_space<vmem>>, %arg5: memref<48x16xf32, #tpu.memory_space<vmem>>, %arg6: memref<16x7xf32, #tpu.memory_space<vmem>>, %arg7: memref<1x7xf32, #tpu.memory_space<vmem>>, %arg8: memref<1x48xf32, #tpu.memory_space<vmem>>, %arg9: memref<48x49xf32, #tpu.memory_space<vmem>>, %arg10: memref<1x48xf32, #tpu.memory_space<vmem>>, %arg11: memref<48x16xf32, #tpu.memory_space<vmem>>, %arg12: memref<48x16xf32, #tpu.memory_space<vmem>>, %arg13: memref<1x16xf32, #tpu.memory_space<vmem>>, %arg14: memref<1x16xf32, #tpu.memory_space<vmem>>, %arg15: memref<16x17xf32, #tpu.memory_space<vmem>>, %arg16: memref<1x16xf32, #tpu.memory_space<vmem>>, %arg17: memref<16x16xf32, #tpu.memory_space<vmem>>, %arg18: memref<1x16xf32, #tpu.memory_space<vmem>>, %arg19: memref<16x17xf32, #tpu.memory_space<vmem>>, %arg20: memref<1x16xf32, #tpu.memory_space<vmem>>, %arg21: memref<16x16xf32, #tpu.memory_space<vmem>>, %arg22: memref<1x16xf32, #tpu.memory_space<vmem>>, %arg23: memref<16x17xf32, #tpu.memory_space<vmem>>, %arg24: memref<1x16xf32, #tpu.memory_space<vmem>>, %arg25: memref<16x16xf32, #tpu.memory_space<vmem>>, %arg26: memref<32x7xf32, #tpu.memory_space<vmem>>) attributes {dimension_semantics = [], scalar_prefetch = 0 : i64, scratch_operands = 0 : i64, tpu.core_type = #tpu.core_type<tc>} {
    %c0 = arith.constant 0 : index
    %c0_0 = arith.constant 0 : index
    %0 = vector.load %arg0[%c0, %c0_0] : memref<32x32xf32, #tpu.memory_space<vmem>>, vector<32x32xf32>
    %c0_1 = arith.constant 0 : index
    %c0_2 = arith.constant 0 : index
    %1 = vector.load %arg1[%c0_1, %c0_2] : memref<32x32xf32, #tpu.memory_space<vmem>>, vector<32x32xf32>
    %cst = arith.constant dense<0.000000e+00> : vector<32xf32>
    %2 = vector.multi_reduction <add>, %0, %cst [1] : vector<32x32xf32> to vector<32xf32>
    %3 = vector.shape_cast %2 : vector<32xf32> to vector<32x1xf32>
    %cst_3 = arith.constant dense<0.000000e+00> : vector<32xf32>
    %4 = vector.multi_reduction <add>, %1, %cst_3 [1] : vector<32x32xf32> to vector<32xf32>
    %5 = vector.shape_cast %4 : vector<32xf32> to vector<32x1xf32>
    %cst_4 = arith.constant 1.000000e+00 : f32
    %6 = vector.broadcast %cst_4 : f32 to vector<32x1xf32>
    %7 = arith.maximumf %3, %6 : vector<32x1xf32>
    %8 = math.rsqrt %7 : vector<32x1xf32>
    %cst_5 = arith.constant 1.000000e+00 : f32
    %9 = vector.broadcast %cst_5 : f32 to vector<32x1xf32>
    %10 = arith.maximumf %5, %9 : vector<32x1xf32>
    %11 = math.rsqrt %10 : vector<32x1xf32>
    %cst_6 = arith.constant 0.000000e+00 : f32
    %12 = vector.broadcast %cst_6 : f32 to vector<32x32xf32>
    %13 = arith.cmpf ogt, %1, %12 : vector<32x32xf32>
    %14 = tpu.iota {dimensions = array<i32: 0>} : vector<32x32xi32>
    %15 = tpu.iota {dimensions = array<i32: 1>} : vector<32x32xi32>
    %c0_7 = arith.constant 0 : index
    %c0_8 = arith.constant 0 : index
    %16 = vector.load %arg2[%c0_7, %c0_8] : memref<32x8xf32, #tpu.memory_space<vmem>>, vector<32x8xf32>
    %c0_9 = arith.constant 0 : index
    %c0_10 = arith.constant 0 : index
    %17 = vector.load %arg3[%c0_9, %c0_10] : memref<8x48xf32, #tpu.memory_space<vmem>>, vector<8x48xf32>
    %c0_11 = arith.constant 0 : index
    %c0_12 = arith.constant 0 : index
    %18 = vector.load %arg4[%c0_11, %c0_12] : memref<1x48xf32, #tpu.memory_space<vmem>>, vector<1x48xf32>
    %19 = vector.broadcast %8 : vector<32x1xf32> to vector<32x8xf32>
    %20 = arith.mulf %16, %19 : vector<32x8xf32>
    %cst_13 = arith.constant dense<0.000000e+00> : vector<32x8xf32>
    %21 = tpu.matmul %1, %20, %cst_13 {dimension_numbers = #tpu.dot_dimension_numbers<[1], [0], [0], [1], [0, 0, 1, 1], [], []>} : vector<32x32xf32>, vector<32x8xf32>, vector<32x8xf32> -> vector<32x8xf32>
    %22 = vector.broadcast %11 : vector<32x1xf32> to vector<32x8xf32>
    %23 = arith.mulf %21, %22 : vector<32x8xf32>
    %cst_14 = arith.constant dense<0.000000e+00> : vector<32x48xf32>
    %24 = tpu.matmul %23, %17, %cst_14 {dimension_numbers = #tpu.dot_dimension_numbers<[1], [0], [0], [1], [0, 0, 1, 1], [], []>} : vector<32x8xf32>, vector<8x48xf32>, vector<32x48xf32> -> vector<32x48xf32>
    %25 = vector.broadcast %18 : vector<1x48xf32> to vector<32x48xf32>
    %26 = arith.addf %24, %25 : vector<32x48xf32>
    %c0_15 = arith.constant 0 : index
    %c0_16 = arith.constant 0 : index
    %27 = vector.load %arg8[%c0_15, %c0_16] : memref<1x48xf32, #tpu.memory_space<vmem>>, vector<1x48xf32>
    %c0_17 = arith.constant 0 : index
    %c0_18 = arith.constant 0 : index
    %28 = vector.load %arg9[%c0_17, %c0_18] : memref<48x49xf32, #tpu.memory_space<vmem>>, vector<48x49xf32>
    %c0_19 = arith.constant 0 : index
    %c0_20 = arith.constant 0 : index
    %29 = vector.load %arg10[%c0_19, %c0_20] : memref<1x48xf32, #tpu.memory_space<vmem>>, vector<1x48xf32>
    %30 = arith.mulf %27, %27 : vector<1x48xf32>
    %31 = vector.shape_cast %30 : vector<1x48xf32> to vector<1x1x48xf32>
    %cst_21 = arith.constant dense<0.000000e+00> : vector<1xf32>
    %32 = vector.multi_reduction <add>, %31, %cst_21 [1, 2] : vector<1x1x48xf32> to vector<1xf32>
    %33 = vector.shape_cast %32 : vector<1xf32> to vector<1x1x1xf32>
    %34 = vector.extract %33[0, 0, 0] : f32 from vector<1x1x1xf32>
    %35 = vector.broadcast %34 : f32 to vector<1x1xf32>
    %cst_22 = arith.constant 1.000000e-24 : f32
    %36 = vector.broadcast %cst_22 : f32 to vector<1x1xf32>
    %37 = arith.maximumf %35, %36 : vector<1x1xf32>
    %38 = math.rsqrt %37 : vector<1x1xf32>
    %cst_23 = arith.constant dense<0.000000e+00> : vector<32x1xf32>
    %39 = tpu.matmul %26, %27, %cst_23 {dimension_numbers = #tpu.dot_dimension_numbers<[1], [1], [0], [0], [0, 0, 1, 0], [], []>} : vector<32x48xf32>, vector<1x48xf32>, vector<32x1xf32> -> vector<32x1xf32>
    %40 = math.absf %39 : vector<32x1xf32>
    %41 = vector.broadcast %38 : vector<1x1xf32> to vector<32x1xf32>
    %42 = arith.mulf %40, %41 : vector<32x1xf32>
    %cst_24 = arith.constant dense<0.000000e+00> : vector<1x32xf32>
    %43 = tpu.matmul %27, %26, %cst_24 {dimension_numbers = #tpu.dot_dimension_numbers<[1], [1], [0], [0], [0, 0, 1, 0], [], []>} : vector<1x48xf32>, vector<32x48xf32>, vector<1x32xf32> -> vector<1x32xf32>
    %44 = math.absf %43 : vector<1x32xf32>
    %45 = vector.broadcast %38 : vector<1x1xf32> to vector<1x32xf32>
    %46 = arith.mulf %44, %45 : vector<1x32xf32>
    %47 = vector.broadcast %42 : vector<32x1xf32> to vector<32x32xf32>
    %48 = vector.broadcast %46 : vector<1x32xf32> to vector<32x32xf32>
    %49 = arith.cmpf ogt, %47, %48 : vector<32x32xf32>
    %50 = vector.broadcast %42 : vector<32x1xf32> to vector<32x32xf32>
    %51 = vector.broadcast %46 : vector<1x32xf32> to vector<32x32xf32>
    %52 = arith.cmpf oeq, %50, %51 : vector<32x32xf32>
    %53 = arith.cmpi slt, %14, %15 : vector<32x32xi32>
    %54 = arith.andi %52, %53 : vector<32x32xi1>
    %55 = arith.ori %49, %54 : vector<32x32xi1>
    %56 = arith.cmpi ne, %14, %15 : vector<32x32xi32>
    %57 = arith.andi %55, %56 : vector<32x32xi1>
    %58 = arith.extui %57 : vector<32x32xi1> to vector<32x32xi32>
    %59 = arith.sitofp %58 : vector<32x32xi32> to vector<32x32xf32>
    %cst_25 = arith.constant dense<0.000000e+00> : vector<32x32xf32>
    %60 = tpu.matmul %1, %59, %cst_25 {dimension_numbers = #tpu.dot_dimension_numbers<[1], [0], [0], [1], [0, 0, 1, 1], [], []>} : vector<32x32xf32>, vector<32x32xf32>, vector<32x32xf32> -> vector<32x32xf32>
    %cst_26 = arith.constant 8.000000e+00 : f32
    %61 = vector.broadcast %cst_26 : f32 to vector<32x32xf32>
    %62 = arith.cmpf olt, %60, %61 : vector<32x32xf32>
    %63 = arith.andi %13, %62 : vector<32x32xi1>
    %64 = arith.negf %42 : vector<32x1xf32>
    %65 = math.exp %64 : vector<32x1xf32>
    %cst_27 = arith.constant 1.000000e+00 : f32
    %66 = vector.broadcast %cst_27 : f32 to vector<32x1xf32>
    %67 = arith.addf %66, %65 : vector<32x1xf32>
    %68 = arith.divf %66, %67 : vector<32x1xf32>
    %69 = vector.broadcast %68 : vector<32x1xf32> to vector<32x48xf32>
    %70 = arith.mulf %69, %26 : vector<32x48xf32>
    %cst_28 = arith.constant dense<0.000000e+00> : vector<32x49xf32>
    %71 = tpu.matmul %70, %28, %cst_28 {dimension_numbers = #tpu.dot_dimension_numbers<[1], [0], [0], [1], [0, 0, 1, 1], [], []>} : vector<32x48xf32>, vector<48x49xf32>, vector<32x49xf32> -> vector<32x49xf32>
    %72 = vector.extract_strided_slice %71 {offsets = [0, 0], sizes = [32, 48], strides = [1, 1]} : vector<32x49xf32> to vector<32x48xf32>
    %73 = vector.extract_strided_slice %71 {offsets = [0, 48], sizes = [32, 1], strides = [1, 1]} : vector<32x49xf32> to vector<32x1xf32>
    %cst_29 = arith.constant dense<0.000000e+00> : vector<1x32xf32>
    %74 = tpu.matmul %29, %72, %cst_29 {dimension_numbers = #tpu.dot_dimension_numbers<[1], [1], [0], [0], [0, 0, 1, 0], [], []>} : vector<1x48xf32>, vector<32x48xf32>, vector<1x32xf32> -> vector<1x32xf32>
    %75 = vector.broadcast %73 : vector<32x1xf32> to vector<32x32xf32>
    %76 = vector.broadcast %74 : vector<1x32xf32> to vector<32x32xf32>
    %77 = arith.addf %75, %76 : vector<32x32xf32>
    %cst_30 = arith.constant 0.000000e+00 : f32
    %78 = vector.broadcast %cst_30 : f32 to vector<32x32xf32>
    %79 = arith.cmpf oge, %77, %78 : vector<32x32xf32>
    %cst_31 = arith.constant 2.000000e-01 : f32
    %80 = vector.broadcast %cst_31 : f32 to vector<32x32xf32>
    %81 = arith.mulf %80, %77 : vector<32x32xf32>
    %82 = arith.select %79, %77, %81 : vector<32x32xi1>, vector<32x32xf32>
    %cst_32 = arith.constant -1.000000e+30 : f32
    %83 = vector.broadcast %cst_32 : f32 to vector<32x32xf32>
    %84 = arith.select %63, %82, %83 : vector<32x32xi1>, vector<32x32xf32>
    %cst_33 = arith.constant dense<0xFF800000> : vector<32xf32>
    %85 = vector.multi_reduction <maximumf>, %84, %cst_33 [1] : vector<32x32xf32> to vector<32xf32>
    %86 = vector.shape_cast %85 : vector<32xf32> to vector<32x1xf32>
    %87 = vector.broadcast %86 : vector<32x1xf32> to vector<32x32xf32>
    %88 = arith.subf %84, %87 : vector<32x32xf32>
    %89 = math.exp %88 : vector<32x32xf32>
    %cst_34 = arith.constant 0.000000e+00 : f32
    %90 = vector.broadcast %cst_34 : f32 to vector<32x32xf32>
    %91 = arith.select %63, %89, %90 : vector<32x32xi1>, vector<32x32xf32>
    %cst_35 = arith.constant dense<0.000000e+00> : vector<32xf32>
    %92 = vector.multi_reduction <add>, %91, %cst_35 [1] : vector<32x32xf32> to vector<32xf32>
    %93 = vector.shape_cast %92 : vector<32xf32> to vector<32x1xf32>
    %cst_36 = arith.constant 0.000000e+00 : f32
    %94 = vector.broadcast %cst_36 : f32 to vector<32x1xf32>
    %95 = arith.cmpf ogt, %93, %94 : vector<32x1xf32>
    %cst_37 = arith.constant 1.000000e+00 : f32
    %96 = vector.broadcast %cst_37 : f32 to vector<32x1xf32>
    %97 = arith.select %95, %93, %96 : vector<32x1xi1>, vector<32x1xf32>
    %98 = tpu.reciprocal %97 {approx = true} : vector<32x1xf32> -> vector<32x1xf32>
    %99 = vector.broadcast %98 : vector<32x1xf32> to vector<32x32xf32>
    %100 = arith.mulf %91, %99 : vector<32x32xf32>
    %cst_38 = arith.constant dense<0.000000e+00> : vector<32x48xf32>
    %101 = tpu.matmul %100, %72, %cst_38 {dimension_numbers = #tpu.dot_dimension_numbers<[1], [0], [0], [1], [0, 0, 1, 1], [], []>} : vector<32x32xf32>, vector<32x48xf32>, vector<32x48xf32> -> vector<32x48xf32>
    %c0_39 = arith.constant 0 : index
    %c0_40 = arith.constant 0 : index
    %102 = vector.load %arg11[%c0_39, %c0_40] : memref<48x16xf32, #tpu.memory_space<vmem>>, vector<48x16xf32>
    %103 = vector.broadcast %8 : vector<32x1xf32> to vector<32x48xf32>
    %104 = arith.mulf %101, %103 : vector<32x48xf32>
    %cst_41 = arith.constant dense<0.000000e+00> : vector<32x48xf32>
    %105 = tpu.matmul %1, %104, %cst_41 {dimension_numbers = #tpu.dot_dimension_numbers<[1], [0], [0], [1], [0, 0, 1, 1], [], []>} : vector<32x32xf32>, vector<32x48xf32>, vector<32x48xf32> -> vector<32x48xf32>
    %106 = vector.broadcast %11 : vector<32x1xf32> to vector<32x48xf32>
    %107 = arith.mulf %105, %106 : vector<32x48xf32>
    %cst_42 = arith.constant dense<0.000000e+00> : vector<32x16xf32>
    %108 = tpu.matmul %107, %102, %cst_42 {dimension_numbers = #tpu.dot_dimension_numbers<[1], [0], [0], [1], [0, 0, 1, 1], [], []>} : vector<32x48xf32>, vector<48x16xf32>, vector<32x16xf32> -> vector<32x16xf32>
    %c0_43 = arith.constant 0 : index
    %c0_44 = arith.constant 0 : index
    %109 = vector.load %arg12[%c0_43, %c0_44] : memref<48x16xf32, #tpu.memory_space<vmem>>, vector<48x16xf32>
    %cst_45 = arith.constant dense<0.000000e+00> : vector<32x16xf32>
    %110 = tpu.matmul %26, %109, %cst_45 {dimension_numbers = #tpu.dot_dimension_numbers<[1], [0], [0], [1], [0, 0, 1, 1], [], []>} : vector<32x48xf32>, vector<48x16xf32>, vector<32x16xf32> -> vector<32x16xf32>
    %111 = arith.addf %108, %110 : vector<32x16xf32>
    %c0_46 = arith.constant 0 : index
    %c0_47 = arith.constant 0 : index
    %112 = vector.load %arg13[%c0_46, %c0_47] : memref<1x16xf32, #tpu.memory_space<vmem>>, vector<1x16xf32>
    %113 = vector.broadcast %112 : vector<1x16xf32> to vector<32x16xf32>
    %114 = arith.addf %111, %113 : vector<32x16xf32>
    %c0_48 = arith.constant 0 : index
    %c0_49 = arith.constant 0 : index
    %115 = vector.load %arg5[%c0_48, %c0_49] : memref<48x16xf32, #tpu.memory_space<vmem>>, vector<48x16xf32>
    %cst_50 = arith.constant dense<0.000000e+00> : vector<32x16xf32>
    %116 = tpu.matmul %26, %115, %cst_50 {dimension_numbers = #tpu.dot_dimension_numbers<[1], [0], [0], [1], [0, 0, 1, 1], [], []>} : vector<32x48xf32>, vector<48x16xf32>, vector<32x16xf32> -> vector<32x16xf32>
    %117 = arith.addf %114, %116 : vector<32x16xf32>
    %c0_51 = arith.constant 0 : index
    %c0_52 = arith.constant 0 : index
    %118 = vector.load %arg14[%c0_51, %c0_52] : memref<1x16xf32, #tpu.memory_space<vmem>>, vector<1x16xf32>
    %c0_53 = arith.constant 0 : index
    %c0_54 = arith.constant 0 : index
    %119 = vector.load %arg15[%c0_53, %c0_54] : memref<16x17xf32, #tpu.memory_space<vmem>>, vector<16x17xf32>
    %c0_55 = arith.constant 0 : index
    %c0_56 = arith.constant 0 : index
    %120 = vector.load %arg16[%c0_55, %c0_56] : memref<1x16xf32, #tpu.memory_space<vmem>>, vector<1x16xf32>
    %121 = arith.mulf %118, %118 : vector<1x16xf32>
    %122 = vector.shape_cast %121 : vector<1x16xf32> to vector<1x1x16xf32>
    %cst_57 = arith.constant dense<0.000000e+00> : vector<1xf32>
    %123 = vector.multi_reduction <add>, %122, %cst_57 [1, 2] : vector<1x1x16xf32> to vector<1xf32>
    %124 = vector.shape_cast %123 : vector<1xf32> to vector<1x1x1xf32>
    %125 = vector.extract %124[0, 0, 0] : f32 from vector<1x1x1xf32>
    %126 = vector.broadcast %125 : f32 to vector<1x1xf32>
    %cst_58 = arith.constant 1.000000e-24 : f32
    %127 = vector.broadcast %cst_58 : f32 to vector<1x1xf32>
    %128 = arith.maximumf %126, %127 : vector<1x1xf32>
    %129 = math.rsqrt %128 : vector<1x1xf32>
    %cst_59 = arith.constant dense<0.000000e+00> : vector<32x1xf32>
    %130 = tpu.matmul %117, %118, %cst_59 {dimension_numbers = #tpu.dot_dimension_numbers<[1], [1], [0], [0], [0, 0, 1, 0], [], []>} : vector<32x16xf32>, vector<1x16xf32>, vector<32x1xf32> -> vector<32x1xf32>
    %131 = math.absf %130 : vector<32x1xf32>
    %132 = vector.broadcast %129 : vector<1x1xf32> to vector<32x1xf32>
    %133 = arith.mulf %131, %132 : vector<32x1xf32>
    %cst_60 = arith.constant dense<0.000000e+00> : vector<1x32xf32>
    %134 = tpu.matmul %118, %117, %cst_60 {dimension_numbers = #tpu.dot_dimension_numbers<[1], [1], [0], [0], [0, 0, 1, 0], [], []>} : vector<1x16xf32>, vector<32x16xf32>, vector<1x32xf32> -> vector<1x32xf32>
    %135 = math.absf %134 : vector<1x32xf32>
    %136 = vector.broadcast %129 : vector<1x1xf32> to vector<1x32xf32>
    %137 = arith.mulf %135, %136 : vector<1x32xf32>
    %138 = vector.broadcast %133 : vector<32x1xf32> to vector<32x32xf32>
    %139 = vector.broadcast %137 : vector<1x32xf32> to vector<32x32xf32>
    %140 = arith.cmpf ogt, %138, %139 : vector<32x32xf32>
    %141 = vector.broadcast %133 : vector<32x1xf32> to vector<32x32xf32>
    %142 = vector.broadcast %137 : vector<1x32xf32> to vector<32x32xf32>
    %143 = arith.cmpf oeq, %141, %142 : vector<32x32xf32>
    %144 = arith.cmpi slt, %14, %15 : vector<32x32xi32>
    %145 = arith.andi %143, %144 : vector<32x32xi1>
    %146 = arith.ori %140, %145 : vector<32x32xi1>
    %147 = arith.cmpi ne, %14, %15 : vector<32x32xi32>
    %148 = arith.andi %146, %147 : vector<32x32xi1>
    %149 = arith.extui %148 : vector<32x32xi1> to vector<32x32xi32>
    %150 = arith.sitofp %149 : vector<32x32xi32> to vector<32x32xf32>
    %cst_61 = arith.constant dense<0.000000e+00> : vector<32x32xf32>
    %151 = tpu.matmul %1, %150, %cst_61 {dimension_numbers = #tpu.dot_dimension_numbers<[1], [0], [0], [1], [0, 0, 1, 1], [], []>} : vector<32x32xf32>, vector<32x32xf32>, vector<32x32xf32> -> vector<32x32xf32>
    %cst_62 = arith.constant 8.000000e+00 : f32
    %152 = vector.broadcast %cst_62 : f32 to vector<32x32xf32>
    %153 = arith.cmpf olt, %151, %152 : vector<32x32xf32>
    %154 = arith.andi %13, %153 : vector<32x32xi1>
    %155 = arith.negf %133 : vector<32x1xf32>
    %156 = math.exp %155 : vector<32x1xf32>
    %cst_63 = arith.constant 1.000000e+00 : f32
    %157 = vector.broadcast %cst_63 : f32 to vector<32x1xf32>
    %158 = arith.addf %157, %156 : vector<32x1xf32>
    %159 = arith.divf %157, %158 : vector<32x1xf32>
    %160 = vector.broadcast %159 : vector<32x1xf32> to vector<32x16xf32>
    %161 = arith.mulf %160, %117 : vector<32x16xf32>
    %cst_64 = arith.constant dense<0.000000e+00> : vector<32x17xf32>
    %162 = tpu.matmul %161, %119, %cst_64 {dimension_numbers = #tpu.dot_dimension_numbers<[1], [0], [0], [1], [0, 0, 1, 1], [], []>} : vector<32x16xf32>, vector<16x17xf32>, vector<32x17xf32> -> vector<32x17xf32>
    %163 = vector.extract_strided_slice %162 {offsets = [0, 0], sizes = [32, 16], strides = [1, 1]} : vector<32x17xf32> to vector<32x16xf32>
    %164 = vector.extract_strided_slice %162 {offsets = [0, 16], sizes = [32, 1], strides = [1, 1]} : vector<32x17xf32> to vector<32x1xf32>
    %cst_65 = arith.constant dense<0.000000e+00> : vector<1x32xf32>
    %165 = tpu.matmul %120, %163, %cst_65 {dimension_numbers = #tpu.dot_dimension_numbers<[1], [1], [0], [0], [0, 0, 1, 0], [], []>} : vector<1x16xf32>, vector<32x16xf32>, vector<1x32xf32> -> vector<1x32xf32>
    %166 = vector.broadcast %164 : vector<32x1xf32> to vector<32x32xf32>
    %167 = vector.broadcast %165 : vector<1x32xf32> to vector<32x32xf32>
    %168 = arith.addf %166, %167 : vector<32x32xf32>
    %cst_66 = arith.constant 0.000000e+00 : f32
    %169 = vector.broadcast %cst_66 : f32 to vector<32x32xf32>
    %170 = arith.cmpf oge, %168, %169 : vector<32x32xf32>
    %cst_67 = arith.constant 2.000000e-01 : f32
    %171 = vector.broadcast %cst_67 : f32 to vector<32x32xf32>
    %172 = arith.mulf %171, %168 : vector<32x32xf32>
    %173 = arith.select %170, %168, %172 : vector<32x32xi1>, vector<32x32xf32>
    %cst_68 = arith.constant -1.000000e+30 : f32
    %174 = vector.broadcast %cst_68 : f32 to vector<32x32xf32>
    %175 = arith.select %154, %173, %174 : vector<32x32xi1>, vector<32x32xf32>
    %cst_69 = arith.constant dense<0xFF800000> : vector<32xf32>
    %176 = vector.multi_reduction <maximumf>, %175, %cst_69 [1] : vector<32x32xf32> to vector<32xf32>
    %177 = vector.shape_cast %176 : vector<32xf32> to vector<32x1xf32>
    %178 = vector.broadcast %177 : vector<32x1xf32> to vector<32x32xf32>
    %179 = arith.subf %175, %178 : vector<32x32xf32>
    %180 = math.exp %179 : vector<32x32xf32>
    %cst_70 = arith.constant 0.000000e+00 : f32
    %181 = vector.broadcast %cst_70 : f32 to vector<32x32xf32>
    %182 = arith.select %154, %180, %181 : vector<32x32xi1>, vector<32x32xf32>
    %cst_71 = arith.constant dense<0.000000e+00> : vector<32xf32>
    %183 = vector.multi_reduction <add>, %182, %cst_71 [1] : vector<32x32xf32> to vector<32xf32>
    %184 = vector.shape_cast %183 : vector<32xf32> to vector<32x1xf32>
    %cst_72 = arith.constant 0.000000e+00 : f32
    %185 = vector.broadcast %cst_72 : f32 to vector<32x1xf32>
    %186 = arith.cmpf ogt, %184, %185 : vector<32x1xf32>
    %cst_73 = arith.constant 1.000000e+00 : f32
    %187 = vector.broadcast %cst_73 : f32 to vector<32x1xf32>
    %188 = arith.select %186, %184, %187 : vector<32x1xi1>, vector<32x1xf32>
    %189 = tpu.reciprocal %188 {approx = true} : vector<32x1xf32> -> vector<32x1xf32>
    %190 = vector.broadcast %189 : vector<32x1xf32> to vector<32x32xf32>
    %191 = arith.mulf %182, %190 : vector<32x32xf32>
    %cst_74 = arith.constant dense<0.000000e+00> : vector<32x16xf32>
    %192 = tpu.matmul %191, %163, %cst_74 {dimension_numbers = #tpu.dot_dimension_numbers<[1], [0], [0], [1], [0, 0, 1, 1], [], []>} : vector<32x32xf32>, vector<32x16xf32>, vector<32x16xf32> -> vector<32x16xf32>
    %c0_75 = arith.constant 0 : index
    %c0_76 = arith.constant 0 : index
    %193 = vector.load %arg17[%c0_75, %c0_76] : memref<16x16xf32, #tpu.memory_space<vmem>>, vector<16x16xf32>
    %194 = vector.broadcast %8 : vector<32x1xf32> to vector<32x16xf32>
    %195 = arith.mulf %192, %194 : vector<32x16xf32>
    %cst_77 = arith.constant dense<0.000000e+00> : vector<32x16xf32>
    %196 = tpu.matmul %1, %195, %cst_77 {dimension_numbers = #tpu.dot_dimension_numbers<[1], [0], [0], [1], [0, 0, 1, 1], [], []>} : vector<32x32xf32>, vector<32x16xf32>, vector<32x16xf32> -> vector<32x16xf32>
    %197 = vector.broadcast %11 : vector<32x1xf32> to vector<32x16xf32>
    %198 = arith.mulf %196, %197 : vector<32x16xf32>
    %cst_78 = arith.constant dense<0.000000e+00> : vector<32x16xf32>
    %199 = tpu.matmul %198, %193, %cst_78 {dimension_numbers = #tpu.dot_dimension_numbers<[1], [0], [0], [1], [0, 0, 1, 1], [], []>} : vector<32x16xf32>, vector<16x16xf32>, vector<32x16xf32> -> vector<32x16xf32>
    %200 = arith.addf %199, %117 : vector<32x16xf32>
    %201 = arith.addf %200, %117 : vector<32x16xf32>
    %c0_79 = arith.constant 0 : index
    %c0_80 = arith.constant 0 : index
    %202 = vector.load %arg18[%c0_79, %c0_80] : memref<1x16xf32, #tpu.memory_space<vmem>>, vector<1x16xf32>
    %c0_81 = arith.constant 0 : index
    %c0_82 = arith.constant 0 : index
    %203 = vector.load %arg19[%c0_81, %c0_82] : memref<16x17xf32, #tpu.memory_space<vmem>>, vector<16x17xf32>
    %c0_83 = arith.constant 0 : index
    %c0_84 = arith.constant 0 : index
    %204 = vector.load %arg20[%c0_83, %c0_84] : memref<1x16xf32, #tpu.memory_space<vmem>>, vector<1x16xf32>
    %205 = arith.mulf %202, %202 : vector<1x16xf32>
    %206 = vector.shape_cast %205 : vector<1x16xf32> to vector<1x1x16xf32>
    %cst_85 = arith.constant dense<0.000000e+00> : vector<1xf32>
    %207 = vector.multi_reduction <add>, %206, %cst_85 [1, 2] : vector<1x1x16xf32> to vector<1xf32>
    %208 = vector.shape_cast %207 : vector<1xf32> to vector<1x1x1xf32>
    %209 = vector.extract %208[0, 0, 0] : f32 from vector<1x1x1xf32>
    %210 = vector.broadcast %209 : f32 to vector<1x1xf32>
    %cst_86 = arith.constant 1.000000e-24 : f32
    %211 = vector.broadcast %cst_86 : f32 to vector<1x1xf32>
    %212 = arith.maximumf %210, %211 : vector<1x1xf32>
    %213 = math.rsqrt %212 : vector<1x1xf32>
    %cst_87 = arith.constant dense<0.000000e+00> : vector<32x1xf32>
    %214 = tpu.matmul %201, %202, %cst_87 {dimension_numbers = #tpu.dot_dimension_numbers<[1], [1], [0], [0], [0, 0, 1, 0], [], []>} : vector<32x16xf32>, vector<1x16xf32>, vector<32x1xf32> -> vector<32x1xf32>
    %215 = math.absf %214 : vector<32x1xf32>
    %216 = vector.broadcast %213 : vector<1x1xf32> to vector<32x1xf32>
    %217 = arith.mulf %215, %216 : vector<32x1xf32>
    %cst_88 = arith.constant dense<0.000000e+00> : vector<1x32xf32>
    %218 = tpu.matmul %202, %201, %cst_88 {dimension_numbers = #tpu.dot_dimension_numbers<[1], [1], [0], [0], [0, 0, 1, 0], [], []>} : vector<1x16xf32>, vector<32x16xf32>, vector<1x32xf32> -> vector<1x32xf32>
    %219 = math.absf %218 : vector<1x32xf32>
    %220 = vector.broadcast %213 : vector<1x1xf32> to vector<1x32xf32>
    %221 = arith.mulf %219, %220 : vector<1x32xf32>
    %222 = vector.broadcast %217 : vector<32x1xf32> to vector<32x32xf32>
    %223 = vector.broadcast %221 : vector<1x32xf32> to vector<32x32xf32>
    %224 = arith.cmpf ogt, %222, %223 : vector<32x32xf32>
    %225 = vector.broadcast %217 : vector<32x1xf32> to vector<32x32xf32>
    %226 = vector.broadcast %221 : vector<1x32xf32> to vector<32x32xf32>
    %227 = arith.cmpf oeq, %225, %226 : vector<32x32xf32>
    %228 = arith.cmpi slt, %14, %15 : vector<32x32xi32>
    %229 = arith.andi %227, %228 : vector<32x32xi1>
    %230 = arith.ori %224, %229 : vector<32x32xi1>
    %231 = arith.cmpi ne, %14, %15 : vector<32x32xi32>
    %232 = arith.andi %230, %231 : vector<32x32xi1>
    %233 = arith.extui %232 : vector<32x32xi1> to vector<32x32xi32>
    %234 = arith.sitofp %233 : vector<32x32xi32> to vector<32x32xf32>
    %cst_89 = arith.constant dense<0.000000e+00> : vector<32x32xf32>
    %235 = tpu.matmul %1, %234, %cst_89 {dimension_numbers = #tpu.dot_dimension_numbers<[1], [0], [0], [1], [0, 0, 1, 1], [], []>} : vector<32x32xf32>, vector<32x32xf32>, vector<32x32xf32> -> vector<32x32xf32>
    %cst_90 = arith.constant 8.000000e+00 : f32
    %236 = vector.broadcast %cst_90 : f32 to vector<32x32xf32>
    %237 = arith.cmpf olt, %235, %236 : vector<32x32xf32>
    %238 = arith.andi %13, %237 : vector<32x32xi1>
    %239 = arith.negf %217 : vector<32x1xf32>
    %240 = math.exp %239 : vector<32x1xf32>
    %cst_91 = arith.constant 1.000000e+00 : f32
    %241 = vector.broadcast %cst_91 : f32 to vector<32x1xf32>
    %242 = arith.addf %241, %240 : vector<32x1xf32>
    %243 = arith.divf %241, %242 : vector<32x1xf32>
    %244 = vector.broadcast %243 : vector<32x1xf32> to vector<32x16xf32>
    %245 = arith.mulf %244, %201 : vector<32x16xf32>
    %cst_92 = arith.constant dense<0.000000e+00> : vector<32x17xf32>
    %246 = tpu.matmul %245, %203, %cst_92 {dimension_numbers = #tpu.dot_dimension_numbers<[1], [0], [0], [1], [0, 0, 1, 1], [], []>} : vector<32x16xf32>, vector<16x17xf32>, vector<32x17xf32> -> vector<32x17xf32>
    %247 = vector.extract_strided_slice %246 {offsets = [0, 0], sizes = [32, 16], strides = [1, 1]} : vector<32x17xf32> to vector<32x16xf32>
    %248 = vector.extract_strided_slice %246 {offsets = [0, 16], sizes = [32, 1], strides = [1, 1]} : vector<32x17xf32> to vector<32x1xf32>
    %cst_93 = arith.constant dense<0.000000e+00> : vector<1x32xf32>
    %249 = tpu.matmul %204, %247, %cst_93 {dimension_numbers = #tpu.dot_dimension_numbers<[1], [1], [0], [0], [0, 0, 1, 0], [], []>} : vector<1x16xf32>, vector<32x16xf32>, vector<1x32xf32> -> vector<1x32xf32>
    %250 = vector.broadcast %248 : vector<32x1xf32> to vector<32x32xf32>
    %251 = vector.broadcast %249 : vector<1x32xf32> to vector<32x32xf32>
    %252 = arith.addf %250, %251 : vector<32x32xf32>
    %cst_94 = arith.constant 0.000000e+00 : f32
    %253 = vector.broadcast %cst_94 : f32 to vector<32x32xf32>
    %254 = arith.cmpf oge, %252, %253 : vector<32x32xf32>
    %cst_95 = arith.constant 2.000000e-01 : f32
    %255 = vector.broadcast %cst_95 : f32 to vector<32x32xf32>
    %256 = arith.mulf %255, %252 : vector<32x32xf32>
    %257 = arith.select %254, %252, %256 : vector<32x32xi1>, vector<32x32xf32>
    %cst_96 = arith.constant -1.000000e+30 : f32
    %258 = vector.broadcast %cst_96 : f32 to vector<32x32xf32>
    %259 = arith.select %238, %257, %258 : vector<32x32xi1>, vector<32x32xf32>
    %cst_97 = arith.constant dense<0xFF800000> : vector<32xf32>
    %260 = vector.multi_reduction <maximumf>, %259, %cst_97 [1] : vector<32x32xf32> to vector<32xf32>
    %261 = vector.shape_cast %260 : vector<32xf32> to vector<32x1xf32>
    %262 = vector.broadcast %261 : vector<32x1xf32> to vector<32x32xf32>
    %263 = arith.subf %259, %262 : vector<32x32xf32>
    %264 = math.exp %263 : vector<32x32xf32>
    %cst_98 = arith.constant 0.000000e+00 : f32
    %265 = vector.broadcast %cst_98 : f32 to vector<32x32xf32>
    %266 = arith.select %238, %264, %265 : vector<32x32xi1>, vector<32x32xf32>
    %cst_99 = arith.constant dense<0.000000e+00> : vector<32xf32>
    %267 = vector.multi_reduction <add>, %266, %cst_99 [1] : vector<32x32xf32> to vector<32xf32>
    %268 = vector.shape_cast %267 : vector<32xf32> to vector<32x1xf32>
    %cst_100 = arith.constant 0.000000e+00 : f32
    %269 = vector.broadcast %cst_100 : f32 to vector<32x1xf32>
    %270 = arith.cmpf ogt, %268, %269 : vector<32x1xf32>
    %cst_101 = arith.constant 1.000000e+00 : f32
    %271 = vector.broadcast %cst_101 : f32 to vector<32x1xf32>
    %272 = arith.select %270, %268, %271 : vector<32x1xi1>, vector<32x1xf32>
    %273 = tpu.reciprocal %272 {approx = true} : vector<32x1xf32> -> vector<32x1xf32>
    %274 = vector.broadcast %273 : vector<32x1xf32> to vector<32x32xf32>
    %275 = arith.mulf %266, %274 : vector<32x32xf32>
    %cst_102 = arith.constant dense<0.000000e+00> : vector<32x16xf32>
    %276 = tpu.matmul %275, %247, %cst_102 {dimension_numbers = #tpu.dot_dimension_numbers<[1], [0], [0], [1], [0, 0, 1, 1], [], []>} : vector<32x32xf32>, vector<32x16xf32>, vector<32x16xf32> -> vector<32x16xf32>
    %c0_103 = arith.constant 0 : index
    %c0_104 = arith.constant 0 : index
    %277 = vector.load %arg21[%c0_103, %c0_104] : memref<16x16xf32, #tpu.memory_space<vmem>>, vector<16x16xf32>
    %278 = vector.broadcast %8 : vector<32x1xf32> to vector<32x16xf32>
    %279 = arith.mulf %276, %278 : vector<32x16xf32>
    %cst_105 = arith.constant dense<0.000000e+00> : vector<32x16xf32>
    %280 = tpu.matmul %1, %279, %cst_105 {dimension_numbers = #tpu.dot_dimension_numbers<[1], [0], [0], [1], [0, 0, 1, 1], [], []>} : vector<32x32xf32>, vector<32x16xf32>, vector<32x16xf32> -> vector<32x16xf32>
    %281 = vector.broadcast %11 : vector<32x1xf32> to vector<32x16xf32>
    %282 = arith.mulf %280, %281 : vector<32x16xf32>
    %cst_106 = arith.constant dense<0.000000e+00> : vector<32x16xf32>
    %283 = tpu.matmul %282, %277, %cst_106 {dimension_numbers = #tpu.dot_dimension_numbers<[1], [0], [0], [1], [0, 0, 1, 1], [], []>} : vector<32x16xf32>, vector<16x16xf32>, vector<32x16xf32> -> vector<32x16xf32>
    %284 = arith.addf %283, %201 : vector<32x16xf32>
    %285 = arith.addf %284, %201 : vector<32x16xf32>
    %c0_107 = arith.constant 0 : index
    %c0_108 = arith.constant 0 : index
    %286 = vector.load %arg22[%c0_107, %c0_108] : memref<1x16xf32, #tpu.memory_space<vmem>>, vector<1x16xf32>
    %c0_109 = arith.constant 0 : index
    %c0_110 = arith.constant 0 : index
    %287 = vector.load %arg23[%c0_109, %c0_110] : memref<16x17xf32, #tpu.memory_space<vmem>>, vector<16x17xf32>
    %c0_111 = arith.constant 0 : index
    %c0_112 = arith.constant 0 : index
    %288 = vector.load %arg24[%c0_111, %c0_112] : memref<1x16xf32, #tpu.memory_space<vmem>>, vector<1x16xf32>
    %289 = arith.mulf %286, %286 : vector<1x16xf32>
    %290 = vector.shape_cast %289 : vector<1x16xf32> to vector<1x1x16xf32>
    %cst_113 = arith.constant dense<0.000000e+00> : vector<1xf32>
    %291 = vector.multi_reduction <add>, %290, %cst_113 [1, 2] : vector<1x1x16xf32> to vector<1xf32>
    %292 = vector.shape_cast %291 : vector<1xf32> to vector<1x1x1xf32>
    %293 = vector.extract %292[0, 0, 0] : f32 from vector<1x1x1xf32>
    %294 = vector.broadcast %293 : f32 to vector<1x1xf32>
    %cst_114 = arith.constant 1.000000e-24 : f32
    %295 = vector.broadcast %cst_114 : f32 to vector<1x1xf32>
    %296 = arith.maximumf %294, %295 : vector<1x1xf32>
    %297 = math.rsqrt %296 : vector<1x1xf32>
    %cst_115 = arith.constant dense<0.000000e+00> : vector<32x1xf32>
    %298 = tpu.matmul %285, %286, %cst_115 {dimension_numbers = #tpu.dot_dimension_numbers<[1], [1], [0], [0], [0, 0, 1, 0], [], []>} : vector<32x16xf32>, vector<1x16xf32>, vector<32x1xf32> -> vector<32x1xf32>
    %299 = math.absf %298 : vector<32x1xf32>
    %300 = vector.broadcast %297 : vector<1x1xf32> to vector<32x1xf32>
    %301 = arith.mulf %299, %300 : vector<32x1xf32>
    %cst_116 = arith.constant dense<0.000000e+00> : vector<1x32xf32>
    %302 = tpu.matmul %286, %285, %cst_116 {dimension_numbers = #tpu.dot_dimension_numbers<[1], [1], [0], [0], [0, 0, 1, 0], [], []>} : vector<1x16xf32>, vector<32x16xf32>, vector<1x32xf32> -> vector<1x32xf32>
    %303 = math.absf %302 : vector<1x32xf32>
    %304 = vector.broadcast %297 : vector<1x1xf32> to vector<1x32xf32>
    %305 = arith.mulf %303, %304 : vector<1x32xf32>
    %306 = vector.broadcast %301 : vector<32x1xf32> to vector<32x32xf32>
    %307 = vector.broadcast %305 : vector<1x32xf32> to vector<32x32xf32>
    %308 = arith.cmpf ogt, %306, %307 : vector<32x32xf32>
    %309 = vector.broadcast %301 : vector<32x1xf32> to vector<32x32xf32>
    %310 = vector.broadcast %305 : vector<1x32xf32> to vector<32x32xf32>
    %311 = arith.cmpf oeq, %309, %310 : vector<32x32xf32>
    %312 = arith.cmpi slt, %14, %15 : vector<32x32xi32>
    %313 = arith.andi %311, %312 : vector<32x32xi1>
    %314 = arith.ori %308, %313 : vector<32x32xi1>
    %315 = arith.cmpi ne, %14, %15 : vector<32x32xi32>
    %316 = arith.andi %314, %315 : vector<32x32xi1>
    %317 = arith.extui %316 : vector<32x32xi1> to vector<32x32xi32>
    %318 = arith.sitofp %317 : vector<32x32xi32> to vector<32x32xf32>
    %cst_117 = arith.constant dense<0.000000e+00> : vector<32x32xf32>
    %319 = tpu.matmul %1, %318, %cst_117 {dimension_numbers = #tpu.dot_dimension_numbers<[1], [0], [0], [1], [0, 0, 1, 1], [], []>} : vector<32x32xf32>, vector<32x32xf32>, vector<32x32xf32> -> vector<32x32xf32>
    %cst_118 = arith.constant 8.000000e+00 : f32
    %320 = vector.broadcast %cst_118 : f32 to vector<32x32xf32>
    %321 = arith.cmpf olt, %319, %320 : vector<32x32xf32>
    %322 = arith.andi %13, %321 : vector<32x32xi1>
    %323 = arith.negf %301 : vector<32x1xf32>
    %324 = math.exp %323 : vector<32x1xf32>
    %cst_119 = arith.constant 1.000000e+00 : f32
    %325 = vector.broadcast %cst_119 : f32 to vector<32x1xf32>
    %326 = arith.addf %325, %324 : vector<32x1xf32>
    %327 = arith.divf %325, %326 : vector<32x1xf32>
    %328 = vector.broadcast %327 : vector<32x1xf32> to vector<32x16xf32>
    %329 = arith.mulf %328, %285 : vector<32x16xf32>
    %cst_120 = arith.constant dense<0.000000e+00> : vector<32x17xf32>
    %330 = tpu.matmul %329, %287, %cst_120 {dimension_numbers = #tpu.dot_dimension_numbers<[1], [0], [0], [1], [0, 0, 1, 1], [], []>} : vector<32x16xf32>, vector<16x17xf32>, vector<32x17xf32> -> vector<32x17xf32>
    %331 = vector.extract_strided_slice %330 {offsets = [0, 0], sizes = [32, 16], strides = [1, 1]} : vector<32x17xf32> to vector<32x16xf32>
    %332 = vector.extract_strided_slice %330 {offsets = [0, 16], sizes = [32, 1], strides = [1, 1]} : vector<32x17xf32> to vector<32x1xf32>
    %cst_121 = arith.constant dense<0.000000e+00> : vector<1x32xf32>
    %333 = tpu.matmul %288, %331, %cst_121 {dimension_numbers = #tpu.dot_dimension_numbers<[1], [1], [0], [0], [0, 0, 1, 0], [], []>} : vector<1x16xf32>, vector<32x16xf32>, vector<1x32xf32> -> vector<1x32xf32>
    %334 = vector.broadcast %332 : vector<32x1xf32> to vector<32x32xf32>
    %335 = vector.broadcast %333 : vector<1x32xf32> to vector<32x32xf32>
    %336 = arith.addf %334, %335 : vector<32x32xf32>
    %cst_122 = arith.constant 0.000000e+00 : f32
    %337 = vector.broadcast %cst_122 : f32 to vector<32x32xf32>
    %338 = arith.cmpf oge, %336, %337 : vector<32x32xf32>
    %cst_123 = arith.constant 2.000000e-01 : f32
    %339 = vector.broadcast %cst_123 : f32 to vector<32x32xf32>
    %340 = arith.mulf %339, %336 : vector<32x32xf32>
    %341 = arith.select %338, %336, %340 : vector<32x32xi1>, vector<32x32xf32>
    %cst_124 = arith.constant -1.000000e+30 : f32
    %342 = vector.broadcast %cst_124 : f32 to vector<32x32xf32>
    %343 = arith.select %322, %341, %342 : vector<32x32xi1>, vector<32x32xf32>
    %cst_125 = arith.constant dense<0xFF800000> : vector<32xf32>
    %344 = vector.multi_reduction <maximumf>, %343, %cst_125 [1] : vector<32x32xf32> to vector<32xf32>
    %345 = vector.shape_cast %344 : vector<32xf32> to vector<32x1xf32>
    %346 = vector.broadcast %345 : vector<32x1xf32> to vector<32x32xf32>
    %347 = arith.subf %343, %346 : vector<32x32xf32>
    %348 = math.exp %347 : vector<32x32xf32>
    %cst_126 = arith.constant 0.000000e+00 : f32
    %349 = vector.broadcast %cst_126 : f32 to vector<32x32xf32>
    %350 = arith.select %322, %348, %349 : vector<32x32xi1>, vector<32x32xf32>
    %cst_127 = arith.constant dense<0.000000e+00> : vector<32xf32>
    %351 = vector.multi_reduction <add>, %350, %cst_127 [1] : vector<32x32xf32> to vector<32xf32>
    %352 = vector.shape_cast %351 : vector<32xf32> to vector<32x1xf32>
    %cst_128 = arith.constant 0.000000e+00 : f32
    %353 = vector.broadcast %cst_128 : f32 to vector<32x1xf32>
    %354 = arith.cmpf ogt, %352, %353 : vector<32x1xf32>
    %cst_129 = arith.constant 1.000000e+00 : f32
    %355 = vector.broadcast %cst_129 : f32 to vector<32x1xf32>
    %356 = arith.select %354, %352, %355 : vector<32x1xi1>, vector<32x1xf32>
    %357 = tpu.reciprocal %356 {approx = true} : vector<32x1xf32> -> vector<32x1xf32>
    %358 = vector.broadcast %357 : vector<32x1xf32> to vector<32x32xf32>
    %359 = arith.mulf %350, %358 : vector<32x32xf32>
    %cst_130 = arith.constant dense<0.000000e+00> : vector<32x16xf32>
    %360 = tpu.matmul %359, %331, %cst_130 {dimension_numbers = #tpu.dot_dimension_numbers<[1], [0], [0], [1], [0, 0, 1, 1], [], []>} : vector<32x32xf32>, vector<32x16xf32>, vector<32x16xf32> -> vector<32x16xf32>
    %c0_131 = arith.constant 0 : index
    %c0_132 = arith.constant 0 : index
    %361 = vector.load %arg25[%c0_131, %c0_132] : memref<16x16xf32, #tpu.memory_space<vmem>>, vector<16x16xf32>
    %362 = vector.broadcast %8 : vector<32x1xf32> to vector<32x16xf32>
    %363 = arith.mulf %360, %362 : vector<32x16xf32>
    %cst_133 = arith.constant dense<0.000000e+00> : vector<32x16xf32>
    %364 = tpu.matmul %1, %363, %cst_133 {dimension_numbers = #tpu.dot_dimension_numbers<[1], [0], [0], [1], [0, 0, 1, 1], [], []>} : vector<32x32xf32>, vector<32x16xf32>, vector<32x16xf32> -> vector<32x16xf32>
    %365 = vector.broadcast %11 : vector<32x1xf32> to vector<32x16xf32>
    %366 = arith.mulf %364, %365 : vector<32x16xf32>
    %cst_134 = arith.constant dense<0.000000e+00> : vector<32x16xf32>
    %367 = tpu.matmul %366, %361, %cst_134 {dimension_numbers = #tpu.dot_dimension_numbers<[1], [0], [0], [1], [0, 0, 1, 1], [], []>} : vector<32x16xf32>, vector<16x16xf32>, vector<32x16xf32> -> vector<32x16xf32>
    %368 = arith.addf %367, %285 : vector<32x16xf32>
    %369 = arith.addf %368, %285 : vector<32x16xf32>
    %c0_135 = arith.constant 0 : index
    %c0_136 = arith.constant 0 : index
    %370 = vector.load %arg6[%c0_135, %c0_136] : memref<16x7xf32, #tpu.memory_space<vmem>>, vector<16x7xf32>
    %c0_137 = arith.constant 0 : index
    %c0_138 = arith.constant 0 : index
    %371 = vector.load %arg7[%c0_137, %c0_138] : memref<1x7xf32, #tpu.memory_space<vmem>>, vector<1x7xf32>
    %372 = vector.broadcast %8 : vector<32x1xf32> to vector<32x16xf32>
    %373 = arith.mulf %369, %372 : vector<32x16xf32>
    %cst_139 = arith.constant dense<0.000000e+00> : vector<32x16xf32>
    %374 = tpu.matmul %1, %373, %cst_139 {dimension_numbers = #tpu.dot_dimension_numbers<[1], [0], [0], [1], [0, 0, 1, 1], [], []>} : vector<32x32xf32>, vector<32x16xf32>, vector<32x16xf32> -> vector<32x16xf32>
    %375 = vector.broadcast %11 : vector<32x1xf32> to vector<32x16xf32>
    %376 = arith.mulf %374, %375 : vector<32x16xf32>
    %cst_140 = arith.constant dense<0.000000e+00> : vector<32x7xf32>
    %377 = tpu.matmul %376, %370, %cst_140 {dimension_numbers = #tpu.dot_dimension_numbers<[1], [0], [0], [1], [0, 0, 1, 1], [], []>} : vector<32x16xf32>, vector<16x7xf32>, vector<32x7xf32> -> vector<32x7xf32>
    %378 = vector.broadcast %371 : vector<1x7xf32> to vector<32x7xf32>
    %379 = arith.addf %377, %378 : vector<32x7xf32>
    %c0_141 = arith.constant 0 : index
    %c0_142 = arith.constant 0 : index
    %380 = vector.load %arg26[%c0_141, %c0_142] : memref<32x7xf32, #tpu.memory_space<vmem>>, vector<32x7xf32>
    tpu.vector_store %arg26[%c0_141, %c0_142], %379 {strides = array<i32>} : memref<32x7xf32, #tpu.memory_space<vmem>>, vector<32x7xf32>,
    return
  }
}

</mosaic_0001>

<bundles_post_ra>
// kernel: hardganet_forward.1
= control target key start
LH: loop header
LB: loop body
LE: loop exit
PB: predicated region body
PF: predicated region fallthrough
CT: control target
= control target key end

     0   :  { %vm91_vm0 = vcmask 261120   ;;  %vm367_vm1 = vcmask 385024   ;;  %vm260_vm2 = vcmask 64512   ;;  %v5256_v60 = vmov 0.0   ;;  %s6479_s0 = inlined_call_operand.vmem [shape: f32[32,32], index: 0, kind: input, shape index: {}]   ;;  %s6480_s1 = inlined_call_operand.vmem [shape: f32[32,32], index: 1, kind: input, shape index: {}]   ;;  %s6481_s2 = inlined_call_operand.vmem [shape: f32[32,8], index: 2, kind: input, shape index: {}]   ;;  %s6482_s3 = inlined_call_operand.vmem [shape: f32[8,48], index: 3, kind: input, shape index: {}]   ;;  %s6483_s8 = inlined_call_operand.vmem [shape: f32[1,48], index: 8, kind: input, shape index: {}]   ;;  %s6484_s4 = inlined_call_operand.vmem [shape: f32[1,48], index: 4, kind: input, shape index: {}]   ;;  %s6485_s9 = inlined_call_operand.vmem [shape: f32[48,49], index: 9, kind: input, shape index: {}]   ;;  %s6486_s10 = inlined_call_operand.vmem [shape: f32[1,48], index: 10, kind: input, shape index: {}]   ;;  %s6487_s12 = inlined_call_operand.vmem [shape: f32[48,16], index: 12, kind: input, shape index: {}]   ;;  %s6488_s5 = inlined_call_operand.vmem [shape: f32[48,16], index: 5, kind: input, shape index: {}]   ;;  %s6489_s11 = inlined_call_operand.vmem [shape: f32[48,16], index: 11, kind: input, shape index: {}]   ;;  %s6490_s14 = inlined_call_operand.vmem [shape: f32[1,16], index: 14, kind: input, shape index: {}]   ;;  %s6491_s13 = inlined_call_operand.vmem [shape: f32[1,16], index: 13, kind: input, shape index: {}]   ;;  %s6492_s15 = inlined_call_operand.vmem [shape: f32[16,17], index: 15, kind: input, shape index: {}]   ;;  %s6493_s16 = inlined_call_operand.vmem [shape: f32[1,16], index: 16, kind: input, shape index: {}]   ;;  %s6494_s17 = inlined_call_operand.vmem [shape: f32[16,16], index: 17, kind: input, shape index: {}]   ;;  %s6495_s18 = inlined_call_operand.vmem [shape: f32[1,16], index: 18, kind: input, shape index: {}]   ;;  %s6496_s19 = inlined_call_operand.vmem [shape: f32[16,17], index: 19, kind: input, shape index: {}]   ;;  %s6497_s20 = inlined_call_operand.vmem [shape: f32[1,16], index: 20, kind: input, shape index: {}]   ;;  %s6498_s21 = inlined_call_operand.vmem [shape: f32[16,16], index: 21, kind: input, shape index: {}]   ;;  %s6499_s22 = inlined_call_operand.vmem [shape: f32[1,16], index: 22, kind: input, shape index: {}]   ;;  %s6500_s23 = inlined_call_operand.vmem [shape: f32[16,17], index: 23, kind: input, shape index: {}]   ;;  %s6501_s24 = inlined_call_operand.vmem [shape: f32[1,16], index: 24, kind: input, shape index: {}]   ;;  %s6502_s25 = inlined_call_operand.vmem [shape: f32[16,16], index: 25, kind: input, shape index: {}]   ;;  %s6503_s6 = inlined_call_operand.vmem [shape: f32[16,7], index: 6, kind: input, shape index: {}]   ;;  %s6504_s7 = inlined_call_operand.vmem [shape: f32[1,7], index: 7, kind: input, shape index: {}]   ;;  %s6505_s26 = inlined_call_operand.vmem [shape: f32[32,7], index: 26, kind: output, shape index: {}]  }
   0x1   :  { %6525 = sst [smem:[#allocation2_spill]] %s6479_s0  ;;  %vm5257_vm3 = vmmov 0   ;;  %vm391_vm4 = vcmask 392192  }
   0x2   :  { %6526 = sst [smem:[#allocation3_spill]] %s6480_s1 }
   0x3   :  { %6527 = sst [smem:[#allocation4_spill]] %s6481_s2 }
   0x4   :  { %6528 = sst [smem:[#allocation5_spill]] %s6482_s3 }
   0x5   :  { %6529 = sst [smem:[#allocation6_spill]] %s6483_s8 }
   0x6   :  { %6530 = sst [smem:[#allocation7_spill]] %s6484_s4 }
   0x7   :  { %6531 = sst [smem:[#allocation8_spill]] %s6485_s9 }
   0x8   :  { %6532 = sst [smem:[#allocation9_spill]] %s6486_s10 }
   0x9   :  { %6533 = sst [smem:[#allocation10_spill]] %s6487_s12 }
   0xa   :  { %6534 = sst [smem:[#allocation11_spill]] %s6488_s5 }
   0xb   :  { %6535 = sst [smem:[#allocation12_spill]] %s6489_s11 }
   0xc   :  { %s6536_s10 = sld [smem:[#allocation2_spill]] }
   0xd   :  { %s6537_s4 = sld [smem:[#allocation3_spill]] }
   0xe   :  { %s6538_s8 = sld [smem:[#allocation4_spill]] }
   0xf   :  { %s6539_s27 = sld [smem:[#allocation5_spill]] }
  0x10   :  { %s6540_s28 = sld [smem:[#allocation6_spill]] }
  0x11   :  { %s6541_s29 = sld [smem:[#allocation7_spill]] }
  0x12   :  { %v86_v0 = vld [vmem:[%s6536_s10 + $0x18] sm:$0xff]  ;;  %v85_v1 = vld [vmem:[%s6536_s10 + $0x10] sm:$0xff]  ;;  %v84_v2 = vld [vmem:[%s6536_s10 + $0x8] sm:$0xff]  ;;  %s6542_s2 = sld [smem:[#allocation8_spill]] }
  0x13   :  { %v101_v3 = vsel %vm91_vm0, %v86_v0, 0.0  ;;  %v95_v4 = vsel %vm91_vm0, %v84_v2, 0.0  ;;  %v83_v5 = vld [vmem:[%s6536_s10] sm:$0xff]  ;;  %v98_v6 = vsel %vm91_vm0, %v85_v1, 0.0  ;;  %v5422_v9 = vld [vmem:[%s6537_s4 + $0x8] sm:$0xff]  ;;  %v5431_v12 = vld [vmem:[%s6537_s4 + $0x10] sm:$0xff] }
  0x14   :  { %102 = vadd.xlane.f32.xlu0 %v101_v3  ;;  %96 = vadd.xlane.f32.xlu1 %v95_v4  ;;  %v92_v7 = vsel %vm91_vm0, %v83_v5, 0.0  ;;  %v5415_v8 = vld [vmem:[%s6537_s4] sm:$0xff]  ;;  %v107_v10 = vsel %vm91_vm0, %v5422_v9, 0.0  ;;  %v5436_v13 = vld [vmem:[%s6537_s4 + $0x18] sm:$0xff]  ;;  %v110_v15 = vsel %vm91_vm0, %v5431_v12, 0.0  ;;  %v145_v27 = vld [vmem:[%s6538_s8 + $0x10] sm:$0xff]  ;;  %v136_v4 = vlaneseq }
  0x15   :  { %4653 = vmatprep.mubr.msk.f32.mxu0 %vm91_vm0, %v5415_v8  ;;  %v104_v11 = vsel %vm91_vm0, %v5415_v8, 0.0  ;;  %v113_v14 = vsel %vm91_vm0, %v5436_v13, 0.0  ;;  %v146_v24 = vld [vmem:[%s6538_s8 + $0x18] sm:$0xff]  ;;  %v144_v30 = vld [vmem:[%s6538_s8 + $0x8] sm:$0xff]  ;;  %v143_v31 = vld [vmem:[%s6538_s8] sm:$0xff]  ;;  %s6543_s30 = sld [smem:[#allocation9_spill]] }
  0x16   :  { %v147_v36 = vld [vmem:[%s6539_s27] sm:$0xff]  ;;  %v5500_v5 = vshrl.u32 %v136_v4, 7  ;;  %s6552_s9 = sld [smem:[#allocation10_spill]] }
  0x17   :  { %4659 = vmatprep.subr.mxu1 %v147_v36  ;;  %v5480_v37 = vld [vmem:[%s6540_s28] sm:$0x1]  ;;  %s6553_s11 = sld [smem:[#allocation11_spill]] }
  0x18   :  { %99 = vadd.xlane.f32.xlu0 %v98_v6  ;;  %93 = vadd.xlane.f32.xlu1 %v92_v7  ;;  %v366_v38 = vmul.f32 %v5480_v37, %v5480_v37  ;;  %v5503_v6 = vsub.s32 0, %v5500_v5  ;;  %v4215_v7 = vld [vmem:[%s6541_s29] ss:$0 sm:$0xff] }
  0x19   :  { %4660 = vmatpush3.msra.mxu1 %v147_v36 }
  0x1a   :  { %v368_v39 = vsel %vm367_vm1, %v366_v38, 0.0  ;;  %4667 = vmatprep.subr.mxu1 %v5256_v60 }
  0x1c   :  { %108 = vadd.xlane.f32.xlu1 %v107_v10  ;;  %105 = vadd.xlane.f32.xlu0 %v104_v11  ;;  %v385_v10 = vrot.slane %v5480_v37, %v5503_v6 }
  0x20   :  { %114 = vadd.xlane.f32.xlu1 %v113_v14  ;;  %111 = vadd.xlane.f32.xlu0 %v110_v15 }
  0x24   :  { %369 = vadd.xlane.f32.xlu0 %v368_v39 }
  0x9d   :  { %v103_v16 = vpop.xlane.xlu0 %102  ;;  %v97_v17 = vpop.xlane.xlu1 %96 }
  0x9e   :  { %v119_v18 = vmax.f32 %v103_v16, 1.0  ;;  %v117_v19 = vmax.f32 %v97_v17, 1.0 }
  0xa0   :  { %5096 = vrsqrt.f32 %v119_v18 }
  0xa1   :  { %v100_v20 = vpop.xlane.xlu0 %99  ;;  %v94_v21 = vpop.xlane.xlu1 %93  ;;  %5098 = vrsqrt.f32 %v117_v19 }
  0xa2   :  { %v118_v22 = vmax.f32 %v100_v20, 1.0  ;;  %v116_v23 = vmax.f32 %v94_v21, 1.0 }
  0xa4   :  { %5100 = vrsqrt.f32 %v118_v22 }
  0xa5   :  { %5102 = vrsqrt.f32 %v116_v23  ;;  %v106_v40 = vpop.xlane.xlu0 %105  ;;  %v109_v41 = vpop.xlane.xlu1 %108 }
  0xa6   :  { %v124_v42 = vmax.f32 %v106_v40, 1.0  ;;  %v125_v43 = vmax.f32 %v109_v41, 1.0 }
  0xa8   :  { %5104 = vrsqrt.f32 %v124_v42 }
  0xa9   :  { %v112_v44 = vpop.xlane.xlu0 %111  ;;  %v115_v45 = vpop.xlane.xlu1 %114  ;;  %5106 = vrsqrt.f32 %v125_v43 }
  0xaa   :  { %v126_v46 = vmax.f32 %v112_v44, 1.0  ;;  %v127_v47 = vmax.f32 %v115_v45, 1.0 }
  0xac   :  { %5108 = vrsqrt.f32 %v126_v46 }
  0xad   :  { %v5445_v25 = vpop.eup %5096  ;;  %5110 = vrsqrt.f32 %v127_v47  ;;  %v370_v61 = vpop.xlane.xlu0 %369 }
  0xae   :  { %v152_v26 = vmul.f32 %v5445_v25, %v146_v24  ;;  %v5451_v28 = vpop.eup %5098  ;;  %v371_v62 = vrot.slane %v370_v61, 4 }
  0xaf   :  { %v150_v34 = vmul.f32 %v5451_v28, %v144_v30 }
  0xb0   :  { %4645 = vmatprep.subr.mxu0 %v152_v26  ;;  %v372_v63 = vadd.f32 %v371_v62, %v370_v61 }
  0xb1   :  { %v5453_v29 = vpop.eup %5100  ;;  %4646 = vmatpush3.msra.mxu0 %v152_v26 }
  0xb2   :  { %v5461_v32 = vpop.eup %5102  ;;  %v151_v33 = vmul.f32 %v5453_v29, %v145_v27  ;;  %v373_v0 = vrot.slane %v372_v63, 2 }
  0xb3   :  { %v149_v35 = vmul.f32 %v5461_v32, %v143_v31 }
  0xb4   :  { %4647 = vmatprep.subr.mxu0 %v151_v33  ;;  %v374_v1 = vadd.f32 %v373_v0, %v372_v63  ;;  %v5552_v0 = vadd.s32 16, %v5500_v5 }
  0xb5   :  { %4648 = vmatpush3.msra.mxu0 %v151_v33  ;;  %v5484_v48 = vpop.eup %5104 }
  0xb6   :  { %4649 = vmatprep.subr.mxu0 %v150_v34  ;;  %v5486_v50 = vpop.eup %5106  ;;  %v375_v2 = vrot.slane %v374_v1, 1 }
  0xb7   :  { %4650 = vmatpush3.msra.mxu0 %v150_v34 }
  0xb8   :  { %4651 = vmatprep.subr.mxu0 %v149_v35  ;;  %v376_v3 = vadd.f32 %v375_v2, %v374_v1 }
  0xb9   :  { %4652 = vmatpush3.msra.mxu0 %v149_v35  ;;  %v5489_v53 = vpop.eup %5108 }
  0xba   :  { %4654 = vmatmul.mubr.msk.f32.vlgmr.msra.gmra.mxu0 %vm91_vm0, %v5422_v9  ;;  %v5492_v56 = vpop.eup %5110  ;;  %5079 = vpush %v376_v3  ;;  %v5560_v3 = vadd.s32 8, %v5500_v5 }
  0xbb   :  { %4656 = vmatprep.mubr.msk.f32.mxu0 %vm91_vm0, %v5431_v12 }
  0xbe   :  { %4657 = vmatmul.mubr.msk.f32.gmra.mxu0 %vm91_vm0, %v5436_v13 }
  0xbf   :  { %4686 = vmatprep.mubr.msk.f32.mxu0 %vm91_vm0, %v5415_v8 }
  0xeb   :  { %s5080_s0 = spop %5079 }
  0xec   :  { %v378_v33 = vstv %s5080_s0 }
  0xed   :  { %v379_v34 = vmax.f32 %v378_v33, 1e-24  ;;  %v359_v33 = vld [vmem:[%s6542_s2] sm:$0xff] }
  0xef   :  { %5112 = vrsqrt.f32 %v379_v34 }
  0xfc   :  { %v5113_v39 = vpop.eup %5112 }
 0x17a   :  { %v4655_v49 = vpop.f32.mrf.mxu0 }
 0x17b   :  { %v251_v54 = vmul.f32 %v5486_v50, %v4655_v49 }
 0x17c   :  { %v231_v51 = vpop.f32.mrf.mxu0 }
 0x17d   :  { %v250_v52 = vmul.f32 %v5484_v48, %v231_v51 }
 0x17e   :  { %v4658_v55 = vpop.f32.mrf.mxu0 }
 0x17f   :  { %4661 = vmatprep.mubr.msk.f32.mxu1 %vm260_vm2, %v250_v52  ;;  %v253_v59 = vmul.f32 %v5492_v56, %v4658_v55 }
 0x180   :  { %v241_v57 = vpop.f32.mrf.mxu0  ;;  %4662 = vmatmul.mubr.msk.f32.vlgmr.msra.gmra.mxu1 %vm260_vm2, %v251_v54 }
 0x181   :  { %v252_v58 = vmul.f32 %v5489_v53, %v241_v57 }
 0x183   :  { %4664 = vmatprep.mubr.msk.f32.mxu1 %vm260_vm2, %v252_v58  ;;  %v5546_v58 = vadd.s32 24, %v5500_v5 }
 0x184   :  { %4665 = vmatmul.mubr.msk.f32.gmra.mxu1 %vm260_vm2, %v253_v59  ;;  %v5549_v59 = vand.u32 127, %v136_v4 }
 0x185   :  { %4675 = vmatprep.mubr.msk.f32.mxu1 %vm5257_vm3, %v5256_v60 }
 0x186   :  { %vm513_vm5 = vcmp.lt.s32.totalorder %v5546_v58, %v5549_v59  ;;  %vm6513_vm8 = vcmp.ne.s32.totalorder %v5546_v58, %v5549_v59  ;;  %vm6514_vm11 = vcmp.lt.s32.totalorder %v5552_v0, %v5549_v59  ;;  %vm6515_vm15 = vcmp.ne.s32.totalorder %v5552_v0, %v5549_v59 }
 0x240   :  { %v4663_v11 = vpop.f32.mrf.mxu1 }
 0x241   :  { %v5510_v14 = vadd.f32 %v4663_v11, %v4215_v7 }
 0x242   :  { %v339_v15 = vpop.f32.mrf.mxu1 }
 0x243   :  { %v5512_v16 = vadd.f32 %v4215_v7, %v339_v15  ;;  %v388_v17 = vmul.f32 %v385_v10, %v5510_v14 }
 0x244   :  { %v4666_v18 = vpop.f32.mrf.mxu1 }
 0x245   :  { %v5515_v19 = vadd.f32 %v4666_v18, %v4215_v7  ;;  %v395_v20 = vsel %vm391_vm4, %v388_v17, 0.0  ;;  %v387_v21 = vmul.f32 %v385_v10, %v5512_v16 }
 0x246   :  { %396 = vadd.xlane.f32.xlu0 %v395_v20  ;;  %v349_v22 = vpop.f32.mrf.mxu1  ;;  %v364_v20 = vld [vmem:[%s6542_s2 + $0x28] sm:$0xff] }
 0x247   :  { %v5519_v23 = vadd.f32 %v4215_v7, %v349_v22  ;;  %4668 = vmatpush3.xpose.msk.msra.mxu1 %vm391_vm4, %v5515_v19  ;;  %v392_v24 = vsel %vm391_vm4, %v387_v21, 0.0  ;;  %v390_v26 = vmul.f32 %v385_v10, %v5515_v19  ;;  %v363_v21 = vld [vmem:[%s6542_s2 + $0x20] sm:$0xff] }
 0x248   :  { %393 = vadd.xlane.f32.xlu1 %v392_v24  ;;  %4669 = vmatprep.subr.mxu1 %v5256_v60  ;;  %v362_v24 = vld [vmem:[%s6542_s2 + $0x18] sm:$0xff] }
 0x249   :  { %v401_v27 = vsel %vm391_vm4, %v390_v26, 0.0  ;;  %v389_v30 = vmul.f32 %v385_v10, %v5519_v23  ;;  %v5258_v10 = vmov 1.0  }
 0x24a   :  { %402 = vadd.xlane.f32.xlu0 %v401_v27  ;;  %v361_v27 = vld [vmem:[%s6542_s2 + $0x10] sm:$0xff] }
 0x24b   :  { %4670 = vmatpush3.xpose.msk.msra.mxu1 %vm391_vm4, %v5519_v23  ;;  %v398_v31 = vsel %vm391_vm4, %v389_v30, 0.0  ;;  %v360_v30 = vld [vmem:[%s6542_s2 + $0x8] sm:$0xff]  ;;  %s6554_s2 = sld [smem:[#allocation12_spill]] }
 0x24c   :  { %399 = vadd.xlane.f32.xlu1 %v398_v31  ;;  %4671 = vmatprep.subr.mxu1 %v5256_v60 }
 0x24f   :  { %4672 = vmatpush3.xpose.msk.msra.mxu1 %vm391_vm4, %v5510_v14 }
 0x250   :  { %4673 = vmatprep.subr.mxu1 %v5256_v60 }
 0x253   :  { %4674 = vmatpush3.xpose.msk.msra.mxu1 %vm391_vm4, %v5512_v16 }
 0x254   :  { %4710 = vmatprep.subr.mxu1 %v5256_v60 }
 0x256   :  { %4676 = vmatmul.mubr.msk.f32.vlgmr.msra.gmra.mxu1 %vm391_vm4, %v5480_v37 }
 0x257   :  { %4718 = vmatprep.mubr.msk.f32.mxu1 %vm5257_vm3, %v5256_v60 }
 0x2cf   :  { %v397_v38 = vpop.xlane.xlu0 %396 }
 0x2d0   :  { %v405_v42 = vand.u32 2147483647, %v397_v38 }
 0x2d1   :  { %v394_v35 = vpop.xlane.xlu1 %393 }
 0x2d2   :  { %v404_v36 = vand.u32 2147483647, %v394_v35  ;;  %v409_v37 = vmul.f32 %v5113_v39, %v405_v42 }
 0x2d3   :  { %v403_v44 = vpop.xlane.xlu0 %402 }
 0x2d4   :  { %v5542_v40 = vmul.f32 %v5113_v39, %v404_v36  ;;  %v407_v46 = vand.u32 2147483647, %v403_v44  ;;  %v4238_v49 = vmul.f32 -1.442695, %v409_v37 }
 0x2d5   :  { %v400_v41 = vpop.xlane.xlu1 %399 }
 0x2d6   :  { %v4237_v43 = vmul.f32 -1.442695, %v5542_v40  ;;  %v406_v45 = vand.u32 2147483647, %v400_v41  ;;  %v411_v51 = vmul.f32 %v5113_v39, %v407_v46 }
 0x2d8   :  { %5114 = vpow2.f32 %v4237_v43  ;;  %v410_v47 = vmul.f32 %v5113_v39, %v406_v45  ;;  %v4240_v54 = vmul.f32 -1.442695, %v411_v51 }
 0x2d9   :  { %5116 = vpow2.f32 %v4238_v49  ;;  %v365_v49 = vld [vmem:[%s6543_s30] sm:$0x1] }
 0x2da   :  { %v4239_v52 = vmul.f32 -1.442695, %v410_v47 }
 0x2dc   :  { %5118 = vpow2.f32 %v4239_v52 }
 0x2dd   :  { %5120 = vpow2.f32 %v4240_v54 }
 0x2e5   :  { %v5115_v61 = vpop.eup %5114 }
 0x2e6   :  { %v643_v1 = vadd.f32 1.0, %v5115_v61  ;;  %v5117_v4 = vpop.eup %5116 }
 0x2e7   :  { %v644_v11 = vadd.f32 1.0, %v5117_v4 }
 0x2e8   :  { %5122 = vrcp.f32 %v643_v1 }
 0x2e9   :  { %v5119_v7 = vpop.eup %5118  ;;  %5124 = vrcp.f32 %v644_v11 }
 0x2ea   :  { %v5121_v15 = vpop.eup %5120  ;;  %v645_v17 = vadd.f32 1.0, %v5119_v7 }
 0x2eb   :  { %v646_v18 = vadd.f32 1.0, %v5121_v15  ;;  %v1138_v15 = vld [vmem:[%s6552_s9 + $0x28] sm:$0xff] }
 0x2ec   :  { %5126 = vrcp.f32 %v645_v17 }
 0x2ed   :  { %5128 = vrcp.f32 %v646_v18 }
 0x2f5   :  { %v5123_v22 = vpop.eup %5122 }
 0x2f6   :  { %v655_v26 = vmul.f32 %v5123_v22, %v5512_v16  ;;  %v5125_v31 = vpop.eup %5124 }
 0x2f7   :  { %v656_v35 = vmul.f32 %v5125_v31, %v5510_v14 }
 0x2f9   :  { %v5127_v34 = vpop.eup %5126 }
 0x2fa   :  { %v5129_v36 = vpop.eup %5128  ;;  %v657_v38 = vmul.f32 %v5127_v34, %v5519_v23 }
 0x316   :  { %v492_v55 = vpop.f32.mrf.mxu1 }
 0x317   :  { %v496_v57 = vand.u32 2147483647, %v492_v55 }
 0x318   :  { %v4677_v62 = vpop.f32.mrf.mxu1 }
 0x319   :  { %v497_v63 = vmul.f32 %v5113_v39, %v496_v57  ;;  %v658_v39 = vmul.f32 %v5129_v36, %v5515_v19 }
 0x31b   :  { %v501_v2 = vrot.slane %v497_v63, %v5503_v6 }
 0x31d   :  { %vm505_vm6 = vcmp.gt.f32.partialorder %v411_v51, %v501_v2  ;;  %vm509_vm7 = vcmp.eq.f32.partialorder %v411_v51, %v501_v2  ;;  %vm508_vm10 = vcmp.eq.f32.partialorder %v410_v47, %v501_v2  ;;  %vm504_vm13 = vcmp.gt.f32.partialorder %v410_v47, %v501_v2 }
 0x31e   :  { %vm517_vm9 = vmand %vm509_vm7, %vm513_vm5  ;;  %vm507_vm2 = vcmp.eq.f32.partialorder %v409_v37, %v501_v2 }
 0x31f   :  { %vm521_vm12 = vmor %vm505_vm6, %vm517_vm9  ;;  %vm511_vm6 = vcmp.lt.s32.totalorder %v5560_v3, %v5549_v59  ;;  %vm503_vm9 = vcmp.gt.f32.partialorder %v409_v37, %v501_v2 }
 0x320   :  { %vm529_vm14 = vmand %vm521_vm12, %vm6513_vm8  ;;  %vm6518_vm8 = vcmp.ne.s32.totalorder %v5560_v3, %v5549_v59 }
 0x321   :  { %4678 = vmatprep.subr.msk.mxu0 %vm529_vm14, %v5258_v10  ;;  %vm516_vm1 = vmand %vm508_vm10, %vm6514_vm11  ;;  %vm506_vm11 = vcmp.eq.f32.partialorder %v5542_v40, %v501_v2 }
 0x322   :  { %4679 = vmatpush3.msk.msra.mxu0 %vm529_vm14, %v5258_v10  ;;  %vm520_vm7 = vmor %vm504_vm13, %vm516_vm1  ;;  %vm6517_vm13 = vcmp.lt.s32.totalorder %v5500_v5, %v5549_v59  ;;  %vm502_vm1 = vcmp.gt.f32.partialorder %v5542_v40, %v501_v2  ;;  %v5259_v40 = vmov 48  }
 0x323   :  { %vm528_vm12 = vmand %vm520_vm7, %vm6515_vm15  ;;  %vm6516_vm15 = vcmp.ne.s32.totalorder %v5500_v5, %v5549_v59  ;;  %5092 = vset.pattern.permute.xlu0 %v5259_v40  ;;  %5093 = vset.pattern.permute.xlu1 %v5259_v40 }
 0x324   :  { %4680 = vmatprep.subr.msk.mxu0 %vm528_vm12, %v5258_v10  ;;  %vm515_vm10 = vmand %vm507_vm2, %vm511_vm6 }
 0x325   :  { %4681 = vmatpush3.msk.msra.mxu0 %vm528_vm12, %v5258_v10  ;;  %vm519_vm14 = vmor %vm503_vm9, %vm515_vm10 }
 0x326   :  { %vm527_vm7 = vmand %vm519_vm14, %vm6518_vm8  ;;  %vm6523_vm14 = vcmp.gt.f32.partialorder %v5415_v8, 0.0 }
 0x327   :  { %4682 = vmatprep.subr.msk.mxu0 %vm527_vm7, %v5258_v10  ;;  %vm514_vm2 = vmand %vm506_vm11, %vm6517_vm13  ;;  %vm6519_vm11 = vcmp.gt.f32.partialorder %v5422_v9, 0.0 }
 0x328   :  { %4683 = vmatpush3.msk.msra.mxu0 %vm527_vm7, %v5258_v10  ;;  %vm518_vm9 = vmor %vm502_vm1, %vm514_vm2 }
 0x329   :  { %vm526_vm12 = vmand %vm518_vm9, %vm6516_vm15 }
 0x32a   :  { %4684 = vmatprep.subr.msk.mxu0 %vm526_vm12, %v5258_v10 }
 0x32b   :  { %4685 = vmatpush3.msk.msra.mxu0 %vm526_vm12, %v5258_v10  ;;  %vm6522_vm12 = vcmp.gt.f32.partialorder %v5431_v12, 0.0 }
 0x32c   :  { %4687 = vmatmul.mubr.msk.f32.vlgmr.msra.gmra.mxu0 %vm91_vm0, %v5422_v9  ;;  %4692 = vmatprep.subr.mxu0 %v364_v20 }
 0x32d   :  { %4693 = vmatpush3.msra.mxu0 %v364_v20  ;;  %4689 = vmatprep.mubr.msk.f32.mxu0 %vm91_vm0, %v5431_v12 }
 0x32e   :  { %4694 = vmatprep.subr.mxu0 %v363_v21 }
 0x32f   :  { %4695 = vmatpush3.msra.mxu0 %v363_v21 }
 0x330   :  { %4690 = vmatmul.mubr.msk.f32.gmra.mxu0 %vm91_vm0, %v5436_v13  ;;  %4696 = vmatprep.subr.mxu0 %v362_v24 }
 0x331   :  { %4697 = vmatpush3.msra.mxu0 %v362_v24  ;;  %4704 = vmatprep.mubr.msk.f32.mxu0 %vm391_vm4, %v655_v26 }
 0x332   :  { %4698 = vmatprep.subr.mxu0 %v361_v27 }
 0x333   :  { %4699 = vmatpush3.msra.mxu0 %v361_v27 }
 0x334   :  { %4700 = vmatprep.subr.mxu0 %v360_v30 }
 0x335   :  { %4701 = vmatpush3.msra.mxu0 %v360_v30 }
 0x336   :  { %4702 = vmatprep.subr.mxu0 %v359_v33 }
 0x337   :  { %4703 = vmatpush3.msra.mxu0 %v359_v33 }
 0x338   :  { %4705 = vmatmul.mubr.msk.f32.vlgmr.msra.gmra.mxu0 %vm391_vm4, %v656_v35 }
 0x339   :  { %4707 = vmatprep.mubr.msk.f32.mxu0 %vm391_vm4, %v657_v38 }
 0x33c   :  { %4708 = vmatmul.mubr.msk.f32.gmra.mxu0 %vm391_vm4, %v658_v39 }
 0x3ec   :  { %v4688_v41 = vpop.f32.mrf.mxu0 }
 0x3ed   :  { %vm624_vm10 = vcmp.lt.f32.partialorder %v4688_v41, 8.0 }
 0x3ee   :  { %v604_v42 = vpop.f32.mrf.mxu0  ;;  %vm5660_vm9 = vmand %vm6519_vm11, %vm624_vm10 }
 0x3ef   :  { %vm623_vm1 = vcmp.lt.f32.partialorder %v604_v42, 8.0 }
 0x3f0   :  { %v5640_v43 = vpop.f32.mrf.mxu0  ;;  %vm5667_vm8 = vmand %vm6523_vm14, %vm623_vm1  ;;  %vm6521_vm1 = vcmp.gt.f32.partialorder %v5436_v13, 0.0 }
 0x3f2   :  { %v614_v44 = vpop.f32.mrf.mxu0 }
 0x3f3   :  { %vm625_vm15 = vcmp.lt.f32.partialorder %v614_v44, 8.0 }
 0x3f4   :  { %vm5677_vm11 = vmand %vm6522_vm12, %vm625_vm15 }
 0x3f8   :  { %v4706_v45 = vpop.f32.mrf.mxu0 }
 0x3f9   :  { %846 = vperm.xlu0 %5092, %v4706_v45  }
 0x3fa   :  { %v737_v37 = vpop.f32.mrf.mxu0 }
 0x3fb   :  { %842 = vperm.xlu1 %5093, %v737_v37  }
 0x3fc   :  { %v4709_v46 = vpop.f32.mrf.mxu0 }
 0x3fd   :  { %4711 = vmatpush3.xpose.msk.msra.mxu1 %vm391_vm4, %v4709_v46  ;;  %4721 = vmatprep.subr.mxu0 %v4709_v46 }
 0x3fe   :  { %v747_v47 = vpop.f32.mrf.mxu0  ;;  %4722 = vmatpush3.msra.mxu0 %v4709_v46  ;;  %4712 = vmatprep.subr.mxu1 %v5256_v60 }
 0x3ff   :  { %850 = vperm.xlu1 %5093, %v747_v47   ;;  %4723 = vmatprep.subr.mxu0 %v747_v47 }
 0x400   :  { %4724 = vmatpush3.msra.mxu0 %v747_v47 }
 0x401   :  { %4713 = vmatpush3.xpose.msk.msra.mxu1 %vm391_vm4, %v747_v47  ;;  %4725 = vmatprep.subr.mxu0 %v4706_v45 }
 0x402   :  { %4726 = vmatpush3.msra.mxu0 %v4706_v45  ;;  %4714 = vmatprep.subr.mxu1 %v5256_v60 }
 0x403   :  { %854 = vperm.xlu1 %5093, %v4709_v46   ;;  %4727 = vmatprep.subr.mxu0 %v737_v37 }
 0x404   :  { %4728 = vmatpush3.msra.mxu0 %v737_v37 }
 0x405   :  { %4715 = vmatpush3.xpose.msk.msra.mxu1 %vm391_vm4, %v4706_v45  ;;  %4749 = vmatprep.subr.mxu0 %v1138_v15 }
 0x406   :  { %4716 = vmatprep.subr.mxu1 %v5256_v60 }
 0x409   :  { %4717 = vmatpush3.xpose.msk.msra.mxu1 %vm391_vm4, %v737_v37 }
 0x40c   :  { %4719 = vmatmul.mubr.msk.f32.vlgmr.msra.gmra.mxu1 %vm391_vm4, %v365_v49 }
 0x40d   :  { %4743 = vmatprep.mubr.msk.f32.mxu1 %vm91_vm0, %v5415_v8 }
 0x474   :  { %v847_v55 = vpop.permute.xlu0 %846 }
 0x476   :  { %v843_v51 = vpop.permute.xlu1 %842 }
 0x47a   :  { %v851_v52 = vpop.permute.xlu1 %850 }
 0x47e   :  { %v855_v61 = vpop.permute.xlu1 %854 }
 0x4cc   :  { %v837_v54 = vpop.f32.mrf.mxu1 }
 0x4cd   :  { %v860_v57 = vrot.slane %v837_v54, %v5503_v6 }
 0x4ce   :  { %v4720_v62 = vpop.f32.mrf.mxu1 }
 0x4cf   :  { %v862_v63 = vadd.f32 %v860_v57, %v847_v55  ;;  %v861_v1 = vadd.f32 %v860_v57, %v843_v51  ;;  %v863_v2 = vadd.f32 %v860_v57, %v851_v52  ;;  %v864_v4 = vadd.f32 %v860_v57, %v855_v61 }
 0x4d1   :  { %vm866_vm7 = vcmp.ge.f32.partialorder %v862_v63, 0.0  ;;  %v870_v7 = vmul.f32 0.2, %v862_v63  ;;  %vm865_vm2 = vcmp.ge.f32.partialorder %v861_v1, 0.0  ;;  %v869_v11 = vmul.f32 0.2, %v861_v1 }
 0x4d2   :  { %vm867_vm13 = vcmp.ge.f32.partialorder %v863_v2, 0.0  ;;  %v871_v17 = vmul.f32 0.2, %v863_v2  ;;  %v872_v22 = vmul.f32 0.2, %v864_v4  ;;  %vm868_vm10 = vcmp.ge.f32.partialorder %v864_v4, 0.0 }
 0x4d3   :  { %v874_v20 = vsel %vm866_vm7, %v862_v63, %v870_v7  ;;  %v873_v21 = vsel %vm865_vm2, %v861_v1, %v869_v11  ;;  %vm626_vm7 = vcmp.lt.f32.partialorder %v5640_v43, 8.0 }
 0x4d4   :  { %v878_v24 = vsel %vm5660_vm9, %v874_v20, -1e+30  ;;  %v877_v26 = vsel %vm5667_vm8, %v873_v21, -1e+30  ;;  %v875_v27 = vsel %vm867_vm13, %v863_v2, %v871_v17  ;;  %v876_v35 = vsel %vm868_vm10, %v864_v4, %v872_v22  ;;  %vm5689_vm15 = vmand %vm6521_vm1, %vm626_vm7 }
 0x4d5   :  { %v884_v31 = vsel %vm91_vm0, %v878_v24, -inf  ;;  %v881_v33 = vsel %vm91_vm0, %v877_v26, -inf  ;;  %v879_v34 = vsel %vm5677_vm11, %v875_v27, -1e+30  ;;  %v880_v39 = vsel %vm5689_vm15, %v876_v35, -1e+30 }
 0x4d6   :  { %885 = vmax.xlane.f32.xlu0 %v884_v31  ;;  %882 = vmax.xlane.f32.xlu1 %v881_v33  ;;  %v887_v38 = vsel %vm91_vm0, %v879_v34, -inf  ;;  %v890_v40 = vsel %vm91_vm0, %v880_v39, -inf  ;;  %vm6556_vm1 = vcmp.lt.s32.totalorder %v5552_v0, %v5549_v59 }
 0x4da   :  { %888 = vmax.xlane.f32.xlu1 %v887_v38  ;;  %v1137_v38 = vld [vmem:[%s6552_s9 + $0x20] sm:$0xff] }
 0x4de   :  { %891 = vmax.xlane.f32.xlu1 %v890_v40 }
 0x55f   :  { %v886_v41 = vpop.xlane.xlu0 %885  ;;  %v883_v42 = vpop.xlane.xlu1 %882 }
 0x560   :  { %v894_v43 = vsub.f32 %v878_v24, %v886_v41  ;;  %v893_v44 = vsub.f32 %v877_v26, %v883_v42  ;;  %v1136_v41 = vld [vmem:[%s6552_s9 + $0x18] sm:$0xff] }
 0x562   :  { %v899_v45 = vmul.f32 1.442695, %v894_v43  ;;  %v897_v37 = vmul.f32 1.442695, %v893_v44  ;;  %v1135_v44 = vld [vmem:[%s6552_s9 + $0x10] sm:$0xff] }
 0x563   :  { %v889_v46 = vpop.xlane.xlu1 %888 }
 0x564   :  { %5130 = vpow2.f32 %v899_v45  ;;  %v895_v47 = vsub.f32 %v879_v34, %v889_v46  ;;  %v1134_v45 = vld [vmem:[%s6552_s9 + $0x8] sm:$0xff] }
 0x565   :  { %5132 = vpow2.f32 %v897_v37  ;;  %v1133_v37 = vld [vmem:[%s6552_s9] sm:$0xff]  ;;  %v1337_v46 = vld [vmem:[%s6553_s11 + $0x28] sm:$0xff] }
 0x566   :  { %v901_v49 = vmul.f32 1.442695, %v895_v47  ;;  %v1336_v47 = vld [vmem:[%s6553_s11 + $0x20] sm:$0xff] }
 0x567   :  { %v892_v51 = vpop.xlane.xlu1 %891 }
 0x568   :  { %v896_v52 = vsub.f32 %v880_v39, %v892_v51  ;;  %5134 = vpow2.f32 %v901_v49  ;;  %v1335_v49 = vld [vmem:[%s6553_s11 + $0x18] sm:$0xff]  ;;  %v1334_v51 = vld [vmem:[%s6553_s11 + $0x10] sm:$0xff] }
 0x56a   :  { %v903_v54 = vmul.f32 1.442695, %v896_v52  ;;  %v1333_v52 = vld [vmem:[%s6553_s11 + $0x8] sm:$0xff] }
 0x56c   :  { %5136 = vpow2.f32 %v903_v54  ;;  %v1332_v54 = vld [vmem:[%s6553_s11] sm:$0xff] }
 0x571   :  { %v5131_v55 = vpop.eup %5130 }
 0x572   :  { %v5133_v57 = vpop.eup %5132  ;;  %v906_v63 = vsel %vm5660_vm9, %v5131_v55, 0.0  ;;  %vm6520_vm9 = vcmask 122880  }
 0x573   :  { %v905_v61 = vsel %vm5667_vm8, %v5133_v57, 0.0  ;;  %v912_v2 = vsel %vm91_vm0, %v906_v63, 0.0 }
 0x574   :  { %v909_v62 = vsel %vm91_vm0, %v905_v61, 0.0 }
 0x575   :  { %910 = vadd.xlane.f32.xlu1 %v909_v62  ;;  %v5135_v1 = vpop.eup %5134 }
 0x576   :  { %v907_v7 = vsel %vm5677_vm11, %v5135_v1, 0.0  ;;  %v1038_v1 = vld [vmem:[%s6554_s2 + $0x20] sm:$0xff] }
 0x577   :  { %v915_v18 = vsel %vm91_vm0, %v907_v7, 0.0 }
 0x579   :  { %v5137_v4 = vpop.eup %5136  ;;  %913 = vadd.xlane.f32.xlu1 %v912_v2  ;;  %v1037_v2 = vld [vmem:[%s6554_s2 + $0x18] sm:$0xff] }
 0x57a   :  { %v908_v11 = vsel %vm5689_vm15, %v5137_v4, 0.0  ;;  %v1036_v4 = vld [vmem:[%s6554_s2 + $0x10] sm:$0xff] }
 0x57b   :  { %v918_v17 = vsel %vm91_vm0, %v908_v11, 0.0 }
 0x57c   :  { %919 = vadd.xlane.f32.xlu0 %v918_v17  ;;  %v5799_v17 = vld [vmem:[%s6490_s14] sm:$0x1] }
 0x57d   :  { %916 = vadd.xlane.f32.xlu1 %v915_v18  ;;  %v1431_v18 = vmul.f32 %v5799_v17, %v5799_v17 }
 0x5fe   :  { %v911_v20 = vpop.xlane.xlu1 %910 }
 0x5ff   :  { %vm921_vm8 = vcmp.gt.f32.partialorder %v911_v20, 0.0 }
 0x600   :  { %v925_v21 = vsel %vm921_vm8, %v911_v20, 1.0 }
 0x601   :  { %5138 = vrcp.f32 %v925_v21 }
 0x602   :  { %v914_v22 = vpop.xlane.xlu1 %913 }
 0x603   :  { %vm922_vm13 = vcmp.gt.f32.partialorder %v914_v22, 0.0 }
 0x604   :  { %v926_v24 = vsel %vm922_vm13, %v914_v22, 1.0 }
 0x605   :  { %5140 = vrcp.f32 %v926_v24  ;;  %v920_v26 = vpop.xlane.xlu0 %919 }
 0x606   :  { %vm924_vm11 = vcmp.gt.f32.partialorder %v920_v26, 0.0  ;;  %v917_v27 = vpop.xlane.xlu1 %916 }
 0x607   :  { %v928_v30 = vsel %vm924_vm11, %v920_v26, 1.0  ;;  %vm923_vm2 = vcmp.gt.f32.partialorder %v917_v27, 0.0 }
 0x608   :  { %5142 = vrcp.f32 %v928_v30  ;;  %v927_v31 = vsel %vm923_vm2, %v917_v27, 1.0  ;;  %vm6555_vm2 = vcmp.ne.s32.totalorder %v5546_v58, %v5549_v59 }
 0x609   :  { %5144 = vrcp.f32 %v927_v31 }
 0x60e   :  { %v5139_v33 = vpop.eup %5138 }
 0x60f   :  { %v933_v34 = vmul.f32 %v5139_v33, %v905_v61 }
 0x611   :  { %4729 = vmatprep.mubr.msk.f32.mxu0 %vm91_vm0, %v933_v34 }
 0x612   :  { %v5141_v35 = vpop.eup %5140 }
 0x613   :  { %v934_v36 = vmul.f32 %v5141_v35, %v906_v63 }
 0x615   :  { %v5143_v39 = vpop.eup %5142  ;;  %4730 = vmatmul.mubr.msk.f32.vlgmr.msra.gmra.mxu0 %vm91_vm0, %v934_v36 }
 0x616   :  { %v5145_v40 = vpop.eup %5144  ;;  %4750 = vmatpush3.msra.mxu0 %v1138_v15  ;;  %v936_v43 = vmul.f32 %v5143_v39, %v908_v11  ;;  %v1034_v11 = vld [vmem:[%s6554_s2] sm:$0xff]  ;;  %v1433_v15 = vsel %vm6520_vm9, %v1431_v18, 0.0 }
 0x617   :  { %4751 = vmatprep.subr.mxu0 %v1137_v38  ;;  %v935_v42 = vmul.f32 %v5145_v40, %v907_v7  ;;  %v1035_v7 = vld [vmem:[%s6554_s2 + $0x8] sm:$0xff]  ;;  %1434 = vadd.xlane.f32.xlu1 %v1433_v15 }
 0x618   :  { %4752 = vmatpush3.msra.mxu0 %v1137_v38 }
 0x619   :  { %4753 = vmatprep.subr.mxu0 %v1136_v41  ;;  %4732 = vmatprep.mubr.msk.f32.mxu0 %vm91_vm0, %v935_v42 }
 0x61a   :  { %4754 = vmatpush3.msra.mxu0 %v1136_v41 }
 0x61b   :  { %4733 = vmatmul.mubr.msk.f32.gmra.mxu0 %vm91_vm0, %v936_v43  ;;  %4755 = vmatprep.subr.mxu0 %v1135_v44 }
 0x61c   :  { %4756 = vmatpush3.msra.mxu0 %v1135_v44  ;;  %4761 = vmatprep.mubr.msk.f32.mxu0 %vm391_vm4, %v5512_v16 }
 0x61d   :  { %4757 = vmatprep.subr.mxu0 %v1134_v45 }
 0x61e   :  { %4758 = vmatpush3.msra.mxu0 %v1134_v45 }
 0x61f   :  { %4759 = vmatprep.subr.mxu0 %v1133_v37 }
 0x620   :  { %4760 = vmatpush3.msra.mxu0 %v1133_v37 }
 0x621   :  { %4762 = vmatmul.mubr.msk.f32.vlgmr.msra.gmra.mxu0 %vm391_vm4, %v5510_v14  ;;  %4785 = vmatprep.subr.mxu0 %v1337_v46 }
 0x622   :  { %4764 = vmatprep.mubr.msk.f32.mxu0 %vm391_vm4, %v5519_v23  ;;  %4786 = vmatpush3.msra.mxu0 %v1337_v46  ;;  %v4266_v46 = vld [vmem:[%s6491_s13] ss:$0 sm:$0xff] }
 0x623   :  { %4787 = vmatprep.subr.mxu0 %v1336_v47 }
 0x624   :  { %4788 = vmatpush3.msra.mxu0 %v1336_v47 }
 0x625   :  { %4765 = vmatmul.mubr.msk.f32.gmra.mxu0 %vm391_vm4, %v5515_v19  ;;  %4789 = vmatprep.subr.mxu0 %v1335_v49 }
 0x626   :  { %4790 = vmatpush3.msra.mxu0 %v1335_v49  ;;  %4797 = vmatprep.mubr.msk.f32.mxu0 %vm391_vm4, %v5512_v16 }
 0x627   :  { %4791 = vmatprep.subr.mxu0 %v1334_v51 }
 0x628   :  { %4792 = vmatpush3.msra.mxu0 %v1334_v51 }
 0x629   :  { %4793 = vmatprep.subr.mxu0 %v1333_v52 }
 0x62a   :  { %4794 = vmatpush3.msra.mxu0 %v1333_v52  ;;  %v1450_v52 = vrot.slane %v5799_v17, %v5503_v6 }
 0x62b   :  { %4795 = vmatprep.subr.mxu0 %v1332_v54 }
 0x62c   :  { %4796 = vmatpush3.msra.mxu0 %v1332_v54 }
 0x62d   :  { %4798 = vmatmul.mubr.msk.f32.vlgmr.msra.gmra.mxu0 %vm391_vm4, %v5510_v14 }
 0x62e   :  { %4800 = vmatprep.mubr.msk.f32.mxu0 %vm391_vm4, %v5519_v23 }
 0x631   :  { %4801 = vmatmul.mubr.msk.f32.gmra.mxu0 %vm391_vm4, %v5515_v19  ;;  %v1039_v19 = vld [vmem:[%s6554_s2 + $0x28] sm:$0xff] }
 0x632   :  { %4822 = vmatprep.mubr.msk.f32.mxu0 %vm91_vm0, %v5415_v8 }
 0x6a0   :  { %v1435_v33 = vpop.xlane.xlu1 %1434 }
 0x6a1   :  { %v1436_v34 = vrot.slane %v1435_v33, 4 }
 0x6a3   :  { %v1437_v35 = vadd.f32 %v1436_v34, %v1435_v33  ;;  %v5260_v33 = vmov 16  }
 0x6a4   :  { %5095 = vset.pattern.permute.xlu1 %v5260_v33  ;;  %5094 = vset.pattern.permute.xlu0 %v5260_v33 }
 0x6a5   :  { %v1438_v36 = vrot.slane %v1437_v35, 2 }
 0x6a7   :  { %v1439_v38 = vadd.f32 %v1438_v36, %v1437_v35 }
 0x6a9   :  { %v1440_v39 = vrot.slane %v1439_v38, 1 }
 0x6ab   :  { %v1441_v40 = vadd.f32 %v1440_v39, %v1439_v38 }
 0x6ad   :  { %5081 = vpush %v1441_v40 }
 0x6d5   :  { %v4731_v16 = vpop.f32.mrf.mxu0 }
 0x6d6   :  { %v1041_v14 = vmul.f32 %v5451_v28, %v4731_v16 }
 0x6d7   :  { %v1015_v55 = vpop.f32.mrf.mxu0 }
 0x6d8   :  { %v1040_v23 = vmul.f32 %v5461_v32, %v1015_v55 }
 0x6db   :  { %v4734_v57 = vpop.f32.mrf.mxu0 }
 0x6dc   :  { %v1043_v61 = vmul.f32 %v5445_v25, %v4734_v57 }
 0x6dd   :  { %v1025_v62 = vpop.f32.mrf.mxu0 }
 0x6de   :  { %v1042_v63 = vmul.f32 %v5453_v29, %v1025_v62  ;;  %4735 = vmatprep.subr.mxu1 %v1043_v61  ;;  %s5082_s27 = spop %5081 }
 0x6df   :  { %4736 = vmatpush3.msra.mxu1 %v1043_v61  ;;  %v1443_v34 = vstv %s5082_s27 }
 0x6e0   :  { %4737 = vmatprep.subr.mxu1 %v1042_v63  ;;  %v1444_v35 = vmax.f32 %v1443_v34, 1e-24  ;;  %v5908_v34 = vld [vmem:[%s6537_s4 + $0x8] sm:$0xff] }
 0x6e1   :  { %4738 = vmatpush3.msra.mxu1 %v1042_v63  ;;  %v4763_v41 = vpop.f32.mrf.mxu0 }
 0x6e2   :  { %4739 = vmatprep.subr.mxu1 %v1041_v14  ;;  %5146 = vrsqrt.f32 %v1444_v35  ;;  %v5916_v35 = vld [vmem:[%s6537_s4 + $0x10] sm:$0xff] }
 0x6e3   :  { %4740 = vmatpush3.msra.mxu1 %v1041_v14  ;;  %v1205_v42 = vpop.f32.mrf.mxu0 }
 0x6e4   :  { %4741 = vmatprep.subr.mxu1 %v1040_v23 }
 0x6e5   :  { %4742 = vmatpush3.msra.mxu1 %v1040_v23  ;;  %v4766_v43 = vpop.f32.mrf.mxu0 }
 0x6e6   :  { %4744 = vmatmul.mubr.msk.f32.vlgmr.msra.gmra.mxu1 %vm91_vm0, %v5422_v9  ;;  %4767 = vmatprep.subr.mxu1 %v1039_v19 }
 0x6e7   :  { %4746 = vmatprep.mubr.msk.f32.mxu1 %vm91_vm0, %v5431_v12  ;;  %4768 = vmatpush3.msra.mxu1 %v1039_v19  ;;  %v1215_v44 = vpop.f32.mrf.mxu0 }
 0x6e8   :  { %4769 = vmatprep.subr.mxu1 %v1038_v1 }
 0x6e9   :  { %4770 = vmatpush3.msra.mxu1 %v1038_v1 }
 0x6ea   :  { %4747 = vmatmul.mubr.msk.f32.gmra.mxu1 %vm91_vm0, %v5436_v13  ;;  %4771 = vmatprep.subr.mxu1 %v1037_v2 }
 0x6eb   :  { %4772 = vmatpush3.msra.mxu1 %v1037_v2 }
 0x6ec   :  { %4773 = vmatprep.subr.mxu1 %v1036_v4 }
 0x6ed   :  { %4774 = vmatpush3.msra.mxu1 %v1036_v4  ;;  %v4799_v45 = vpop.f32.mrf.mxu0 }
 0x6ee   :  { %4775 = vmatprep.subr.mxu1 %v1035_v7 }
 0x6ef   :  { %4776 = vmatpush3.msra.mxu1 %v1035_v7  ;;  %v1404_v49 = vpop.f32.mrf.mxu0  ;;  %v5147_v38 = vpop.eup %5146 }
 0x6f0   :  { %4777 = vmatprep.subr.mxu1 %v1034_v11 }
 0x6f1   :  { %4778 = vmatpush3.msra.mxu1 %v1034_v11  ;;  %v4802_v63 = vpop.f32.mrf.mxu0 }
 0x6f2   :  { %4803 = vmatprep.subr.mxu1 %v5256_v60 }
 0x6f3   :  { %v1414_v15 = vpop.f32.mrf.mxu0 }
 0x7a6   :  { %v4745_v20 = vpop.f32.mrf.mxu1 }
 0x7a7   :  { %v1130_v24 = vmul.f32 %v5486_v50, %v4745_v20 }
 0x7a8   :  { %v1110_v21 = vpop.f32.mrf.mxu1 }
 0x7a9   :  { %v1129_v22 = vmul.f32 %v5484_v48, %v1110_v21 }
 0x7aa   :  { %v4748_v26 = vpop.f32.mrf.mxu1 }
 0x7ab   :  { %4779 = vmatprep.mubr.msk.f32.mxu1 %vm391_vm4, %v1129_v22  ;;  %v1132_v31 = vmul.f32 %v5492_v56, %v4748_v26 }
 0x7ac   :  { %v1120_v27 = vpop.f32.mrf.mxu1  ;;  %4780 = vmatmul.mubr.msk.f32.vlgmr.msra.gmra.mxu1 %vm391_vm4, %v1130_v24 }
 0x7ad   :  { %v1131_v30 = vmul.f32 %v5489_v53, %v1120_v27 }
 0x7af   :  { %4782 = vmatprep.mubr.msk.f32.mxu1 %vm391_vm4, %v1131_v30  ;;  %v1429_v30 = vld [vmem:[%s6492_s15 + $0x8] sm:$0xff] }
 0x7b0   :  { %4783 = vmatmul.mubr.msk.f32.gmra.mxu1 %vm391_vm4, %v1132_v31  ;;  %vm6524_vm4 = vcmask 130048   ;;  %v1428_v31 = vld [vmem:[%s6492_s15] sm:$0xff] }
 0x7b1   :  { %4811 = vmatprep.mubr.msk.f32.mxu1 %vm5257_vm3, %v5256_v60 }
 0x86c   :  { %v4781_v37 = vpop.f32.mrf.mxu1 }
 0x86d   :  { %v1308_v47 = vadd.f32 %v4781_v37, %v4763_v41 }
 0x86e   :  { %v1302_v51 = vpop.f32.mrf.mxu1 }
 0x86f   :  { %v1329_v54 = vadd.f32 %v4266_v46, %v1308_v47  ;;  %v1303_v16 = vadd.f32 %v1302_v51, %v1205_v42 }
 0x870   :  { %v4784_v55 = vpop.f32.mrf.mxu1 }
 0x871   :  { %v5819_v57 = vadd.f32 %v4799_v45, %v1329_v54  ;;  %v1328_v61 = vadd.f32 %v4266_v46, %v1303_v16  ;;  %v1318_v62 = vadd.f32 %v4784_v55, %v4766_v43 }
 0x872   :  { %v1312_v14 = vpop.f32.mrf.mxu1 }
 0x873   :  { %v5821_v23 = vadd.f32 %v1404_v49, %v1328_v61  ;;  %v1331_v19 = vadd.f32 %v4266_v46, %v1318_v62  ;;  %v1313_v1 = vadd.f32 %v1312_v14, %v1215_v44  ;;  %v1453_v2 = vmul.f32 %v1450_v52, %v5819_v57 }
 0x875   :  { %v5824_v4 = vadd.f32 %v4802_v63, %v1331_v19  ;;  %v1330_v7 = vadd.f32 %v4266_v46, %v1313_v1  ;;  %v1460_v11 = vsel %vm6524_vm4, %v1453_v2, 0.0  ;;  %v1452_v18 = vmul.f32 %v1450_v52, %v5821_v23 }
 0x876   :  { %1461 = vadd.xlane.f32.xlu1 %v1460_v11 }
 0x877   :  { %v5828_v20 = vadd.f32 %v1414_v15, %v1330_v7  ;;  %4804 = vmatpush3.xpose.msk.msra.mxu1 %vm6524_vm4, %v5824_v4  ;;  %v1457_v21 = vsel %vm6524_vm4, %v1452_v18, 0.0  ;;  %v1455_v22 = vmul.f32 %v1450_v52, %v5824_v4 }
 0x878   :  { %1458 = vadd.xlane.f32.xlu0 %v1457_v21  ;;  %4805 = vmatprep.subr.mxu1 %v5256_v60 }
 0x879   :  { %v1466_v24 = vsel %vm6524_vm4, %v1455_v22, 0.0  ;;  %v1454_v26 = vmul.f32 %v1450_v52, %v5828_v20 }
 0x87a   :  { %1467 = vadd.xlane.f32.xlu1 %v1466_v24 }
 0x87b   :  { %4806 = vmatpush3.xpose.msk.msra.mxu1 %vm6524_vm4, %v5828_v20  ;;  %v1463_v27 = vsel %vm6524_vm4, %v1454_v26, 0.0 }
 0x87c   :  { %1464 = vadd.xlane.f32.xlu0 %v1463_v27  ;;  %4807 = vmatprep.subr.mxu1 %v5256_v60 }
 0x87f   :  { %4808 = vmatpush3.xpose.msk.msra.mxu1 %vm6524_vm4, %v5819_v57 }
 0x880   :  { %4809 = vmatprep.subr.mxu1 %v5256_v60 }
 0x883   :  { %4810 = vmatpush3.xpose.msk.msra.mxu1 %vm6524_vm4, %v5821_v23 }
 0x884   :  { %4828 = vmatprep.subr.mxu1 %v1429_v30 }
 0x886   :  { %4812 = vmatmul.mubr.msk.f32.vlgmr.msra.gmra.mxu1 %vm6524_vm4, %v5799_v17 }
 0x887   :  { %4829 = vmatpush3.msra.mxu1 %v1429_v30 }
 0x888   :  { %4830 = vmatprep.subr.mxu1 %v1428_v31 }
 0x889   :  { %4831 = vmatpush3.msra.mxu1 %v1428_v31 }
 0x8ff   :  { %v1462_v17 = vpop.xlane.xlu1 %1461 }
 0x900   :  { %v1470_v36 = vand.u32 2147483647, %v1462_v17  ;;  %v5923_v17 = vld [vmem:[%s6537_s4 + $0x18] sm:$0xff] }
 0x901   :  { %v1459_v39 = vpop.xlane.xlu0 %1458 }
 0x902   :  { %v5854_v40 = vmul.f32 %v5147_v38, %v1470_v36  ;;  %v1469_v41 = vand.u32 2147483647, %v1459_v39 }
 0x903   :  { %v1468_v42 = vpop.xlane.xlu1 %1467 }
 0x904   :  { %v4289_v43 = vmul.f32 -1.442695, %v5854_v40  ;;  %v5857_v44 = vmul.f32 %v5147_v38, %v1469_v41  ;;  %v1472_v45 = vand.u32 2147483647, %v1468_v42  ;;  %v1430_v41 = vld [vmem:[%s6493_s16] sm:$0x1] }
 0x905   :  { %v1465_v37 = vpop.xlane.xlu0 %1464 }
 0x906   :  { %5148 = vpow2.f32 %v4289_v43  ;;  %v4288_v46 = vmul.f32 -1.442695, %v5857_v44  ;;  %v1476_v47 = vmul.f32 %v5147_v38, %v1472_v45  ;;  %v1471_v49 = vand.u32 2147483647, %v1465_v37 }
 0x908   :  { %5150 = vpow2.f32 %v4288_v46  ;;  %v4291_v51 = vmul.f32 -1.442695, %v1476_v47  ;;  %v1475_v52 = vmul.f32 %v5147_v38, %v1471_v49 }
 0x90a   :  { %5152 = vpow2.f32 %v4291_v51  ;;  %v4290_v54 = vmul.f32 -1.442695, %v1475_v52 }
 0x90c   :  { %5154 = vpow2.f32 %v4290_v54 }
 0x913   :  { %v5149_v16 = vpop.eup %5148 }
 0x914   :  { %v1701_v55 = vadd.f32 1.0, %v5149_v16 }
 0x915   :  { %v5151_v61 = vpop.eup %5150 }
 0x916   :  { %v1700_v62 = vadd.f32 1.0, %v5151_v61  ;;  %5156 = vrcp.f32 %v1701_v55 }
 0x917   :  { %v5153_v63 = vpop.eup %5152 }
 0x918   :  { %5158 = vrcp.f32 %v1700_v62  ;;  %v1703_v14 = vadd.f32 1.0, %v5153_v63 }
 0x919   :  { %v5155_v19 = vpop.eup %5154 }
 0x91a   :  { %v1702_v1 = vadd.f32 1.0, %v5155_v19  ;;  %5160 = vrcp.f32 %v1703_v14 }
 0x91c   :  { %5162 = vrcp.f32 %v1702_v1 }
 0x923   :  { %v5157_v2 = vpop.eup %5156 }
 0x924   :  { %v1713_v18 = vmul.f32 %v5157_v2, %v5819_v57 }
 0x925   :  { %v5159_v7 = vpop.eup %5158 }
 0x926   :  { %v1712_v11 = vmul.f32 %v5159_v7, %v5821_v23 }
 0x927   :  { %v5161_v15 = vpop.eup %5160 }
 0x928   :  { %4832 = vmatprep.mubr.msk.f32.mxu1 %vm6524_vm4, %v1712_v11  ;;  %v1715_v24 = vmul.f32 %v5161_v15, %v5824_v4 }
 0x929   :  { %v5163_v21 = vpop.eup %5162  ;;  %4833 = vmatmul.mubr.msk.f32.vlgmr.msra.gmra.mxu1 %vm6524_vm4, %v1713_v18 }
 0x92a   :  { %v1714_v22 = vmul.f32 %v5163_v21, %v5828_v20 }
 0x92c   :  { %4835 = vmatprep.mubr.msk.f32.mxu1 %vm6524_vm4, %v1714_v22 }
 0x92d   :  { %4836 = vmatmul.mubr.msk.f32.gmra.mxu1 %vm6524_vm4, %v1715_v24 }
 0x946   :  { %v1557_v26 = vpop.f32.mrf.mxu1 }
 0x947   :  { %v1561_v27 = vand.u32 2147483647, %v1557_v26 }
 0x948   :  { %v4813_v30 = vpop.f32.mrf.mxu1 }
 0x949   :  { %v1562_v31 = vmul.f32 %v5147_v38, %v1561_v27 }
 0x94b   :  { %v1566_v33 = vrot.slane %v1562_v31, %v5503_v6 }
 0x94d   :  { %vm1570_vm10 = vcmp.gt.f32.partialorder %v1476_v47, %v1566_v33  ;;  %vm1574_vm7 = vcmp.eq.f32.partialorder %v1476_v47, %v1566_v33  ;;  %vm1573_vm8 = vcmp.eq.f32.partialorder %v1475_v52, %v1566_v33  ;;  %vm1569_vm11 = vcmp.gt.f32.partialorder %v1475_v52, %v1566_v33 }
 0x94e   :  { %vm1578_vm15 = vmand %vm1574_vm7, %vm513_vm5  ;;  %vm1572_vm14 = vcmp.eq.f32.partialorder %v5854_v40, %v1566_v33  ;;  %vm1568_vm7 = vcmp.gt.f32.partialorder %v5854_v40, %v1566_v33 }
 0x94f   :  { %vm1582_vm13 = vmor %vm1570_vm10, %vm1578_vm15  ;;  %vm6557_vm10 = vcmp.ne.s32.totalorder %v5552_v0, %v5549_v59 }
 0x950   :  { %vm1586_vm9 = vmand %vm1582_vm13, %vm6555_vm2  ;;  %vm1571_vm2 = vcmp.eq.f32.partialorder %v5857_v44, %v1566_v33 }
 0x951   :  { %4814 = vmatprep.subr.msk.mxu0 %vm1586_vm9, %v5258_v10  ;;  %vm1577_vm12 = vmand %vm1573_vm8, %vm6556_vm1 }
 0x952   :  { %4815 = vmatpush3.msk.msra.mxu0 %vm1586_vm9, %v5258_v10  ;;  %vm1581_vm4 = vmor %vm1569_vm11, %vm1577_vm12  ;;  %vm1567_vm9 = vcmp.gt.f32.partialorder %v5857_v44, %v1566_v33  ;;  %vm6558_vm12 = vcmp.ne.s32.totalorder %v5560_v3, %v5549_v59 }
 0x953   :  { %vm1585_vm15 = vmand %vm1581_vm4, %vm6557_vm10  ;;  %vm6559_vm4 = vcmp.lt.s32.totalorder %v5500_v5, %v5549_v59  ;;  %vm6560_vm10 = vcmp.ne.s32.totalorder %v5500_v5, %v5549_v59 }
 0x954   :  { %4816 = vmatprep.subr.msk.mxu0 %vm1585_vm15, %v5258_v10  ;;  %vm1576_vm13 = vmand %vm1572_vm14, %vm511_vm6 }
 0x955   :  { %4817 = vmatpush3.msk.msra.mxu0 %vm1585_vm15, %v5258_v10  ;;  %vm1580_vm1 = vmor %vm1568_vm7, %vm1576_vm13  ;;  %vm6561_vm7 = vcmask 130048  }
 0x956   :  { %vm1584_vm8 = vmand %vm1580_vm1, %vm6558_vm12 }
 0x957   :  { %4818 = vmatprep.subr.msk.mxu0 %vm1584_vm8, %v5258_v10  ;;  %vm1575_vm11 = vmand %vm1571_vm2, %vm6559_vm4 }
 0x958   :  { %4819 = vmatpush3.msk.msra.mxu0 %vm1584_vm8, %v5258_v10  ;;  %vm1579_vm14 = vmor %vm1567_vm9, %vm1575_vm11 }
 0x959   :  { %vm1583_vm15 = vmand %vm1579_vm14, %vm6560_vm10  ;;  %vm6566_vm14 = vcmp.gt.f32.partialorder %v5422_v9, 0.0 }
 0x95a   :  { %4820 = vmatprep.subr.msk.mxu0 %vm1583_vm15, %v5258_v10  ;;  %vm6562_vm13 = vmmov %vm6561_vm7 }
 0x95b   :  { %4821 = vmatpush3.msk.msra.mxu0 %vm1583_vm15, %v5258_v10  ;;  %vm6563_vm2 = vmmov %vm6561_vm7 }
 0x95c   :  { %4823 = vmatmul.mubr.msk.f32.vlgmr.msra.gmra.mxu0 %vm91_vm0, %v5908_v34  ;;  %4838 = vmatprep.subr.mxu0 %v5256_v60  ;;  %vm6564_vm1 = vmmov %vm6563_vm2 }
 0x95d   :  { %4825 = vmatprep.mubr.msk.f32.mxu0 %vm91_vm0, %v5916_v35  ;;  %vm6565_vm9 = vmmov %vm6564_vm1 }
 0x960   :  { %4826 = vmatmul.mubr.msk.f32.gmra.mxu0 %vm91_vm0, %v5923_v17 }
 0x961   :  { %4846 = vmatprep.mubr.msk.f32.mxu0 %vm5257_vm3, %v5256_v60 }
 0x9e9   :  { %v4834_v36 = vpop.f32.mrf.mxu1 }
 0x9ea   :  { %1903 = vperm.xlu1 %5095, %v4834_v36  }
 0x9eb   :  { %v1794_v38 = vpop.f32.mrf.mxu1 }
 0x9ec   :  { %1899 = vperm.xlu0 %5094, %v1794_v38  }
 0x9ed   :  { %v4837_v39 = vpop.f32.mrf.mxu1 }
 0x9ee   :  { %4839 = vmatpush3.xpose.msk.msra.mxu0 %vm6561_vm7, %v4837_v39  ;;  %4849 = vmatprep.subr.mxu1 %v4837_v39 }
 0x9ef   :  { %v1804_v40 = vpop.f32.mrf.mxu1  ;;  %4850 = vmatpush3.msra.mxu1 %v4837_v39  ;;  %4840 = vmatprep.subr.mxu0 %v5256_v60 }
 0x9f0   :  { %1907 = vperm.xlu1 %5095, %v1804_v40   ;;  %4851 = vmatprep.subr.mxu1 %v1804_v40 }
 0x9f1   :  { %4852 = vmatpush3.msra.mxu1 %v1804_v40 }
 0x9f2   :  { %4841 = vmatpush3.xpose.msk.msra.mxu0 %vm6562_vm13, %v1804_v40  ;;  %4853 = vmatprep.subr.mxu1 %v4834_v36  ;;  %vm6569_vm13 = vcmp.gt.f32.partialorder %v5415_v8, 0.0 }
 0x9f3   :  { %4854 = vmatpush3.msra.mxu1 %v4834_v36  ;;  %4842 = vmatprep.subr.mxu0 %v5256_v60 }
 0x9f4   :  { %1911 = vperm.xlu1 %5095, %v4837_v39   ;;  %4855 = vmatprep.subr.mxu1 %v1794_v38 }
 0x9f5   :  { %4856 = vmatpush3.msra.mxu1 %v1794_v38 }
 0x9f6   :  { %4843 = vmatpush3.xpose.msk.msra.mxu0 %vm6563_vm2, %v4834_v36 }
 0x9f7   :  { %4844 = vmatprep.subr.mxu0 %v5256_v60 }
 0x9fa   :  { %4845 = vmatpush3.xpose.msk.msra.mxu0 %vm6564_vm1, %v1794_v38 }
 0x9fd   :  { %4847 = vmatmul.mubr.msk.f32.vlgmr.msra.gmra.mxu0 %vm6565_vm9, %v1430_v41  ;;  %vm6572_vm9 = vcmp.gt.f32.partialorder %v5431_v12, 0.0 }
 0xa1c   :  { %v4824_v42 = vpop.f32.mrf.mxu0 }
 0xa1d   :  { %vm1681_vm12 = vcmp.lt.f32.partialorder %v4824_v42, 8.0 }
 0xa1e   :  { %v1661_v44 = vpop.f32.mrf.mxu0  ;;  %vm5943_vm10 = vmand %vm6566_vm14, %vm1681_vm12 }
 0xa1f   :  { %vm1680_vm8 = vcmp.lt.f32.partialorder %v1661_v44, 8.0 }
 0xa20   :  { %v4827_v45 = vpop.f32.mrf.mxu0  ;;  %vm5949_vm2 = vmand %vm6569_vm13, %vm1680_vm8  ;;  %vm6578_vm13 = vcmask 122880  }
 0xa21   :  { %vm1683_vm8 = vcmp.lt.f32.partialorder %v4827_v45, 8.0 }
 0xa22   :  { %v1671_v46 = vpop.f32.mrf.mxu0 }
 0xa23   :  { %vm1682_vm15 = vcmp.lt.f32.partialorder %v1671_v46, 8.0 }
 0xa24   :  { %vm5959_vm12 = vmand %vm6572_vm9, %vm1682_vm15 }
 0xa65   :  { %v1904_v43 = vpop.permute.xlu1 %1903 }
 0xa67   :  { %v1900_v49 = vpop.permute.xlu0 %1899 }
 0xa6b   :  { %v1908_v37 = vpop.permute.xlu1 %1907 }
 0xa6f   :  { %v1912_v52 = vpop.permute.xlu1 %1911 }
 0xabd   :  { %v1894_v47 = vpop.f32.mrf.mxu0 }
 0xabe   :  { %v1917_v51 = vrot.slane %v1894_v47, %v5503_v6 }
 0xabf   :  { %v4848_v54 = vpop.f32.mrf.mxu0 }
 0xac0   :  { %v1918_v16 = vadd.f32 %v1917_v51, %v1900_v49  ;;  %v1919_v55 = vadd.f32 %v1917_v51, %v1904_v43  ;;  %v1920_v61 = vadd.f32 %v1917_v51, %v1908_v37  ;;  %v1921_v62 = vadd.f32 %v1917_v51, %v1912_v52 }
 0xac2   :  { %vm1922_vm4 = vcmp.ge.f32.partialorder %v1918_v16, 0.0  ;;  %v1926_v63 = vmul.f32 0.2, %v1918_v16  ;;  %vm1923_vm11 = vcmp.ge.f32.partialorder %v1919_v55, 0.0  ;;  %v1927_v14 = vmul.f32 0.2, %v1919_v55 }
 0xac3   :  { %vm1924_vm7 = vcmp.ge.f32.partialorder %v1920_v61, 0.0  ;;  %v1928_v1 = vmul.f32 0.2, %v1920_v61  ;;  %v1929_v18 = vmul.f32 0.2, %v1921_v62  ;;  %vm1925_vm1 = vcmp.ge.f32.partialorder %v1921_v62, 0.0 }
 0xac4   :  { %v1930_v7 = vsel %vm1922_vm4, %v1918_v16, %v1926_v63  ;;  %v1931_v11 = vsel %vm1923_vm11, %v1919_v55, %v1927_v14  ;;  %vm6575_vm4 = vcmp.gt.f32.partialorder %v5436_v13, 0.0 }
 0xac5   :  { %v1934_v15 = vsel %vm5949_vm2, %v1930_v7, -1e+30  ;;  %v1935_v21 = vsel %vm5943_vm10, %v1931_v11, -1e+30  ;;  %v1932_v22 = vsel %vm1924_vm7, %v1920_v61, %v1928_v1  ;;  %v1933_v31 = vsel %vm1925_vm1, %v1921_v62, %v1929_v18  ;;  %vm5969_vm11 = vmand %vm6575_vm4, %vm1683_vm8 }
 0xac6   :  { %v1938_v26 = vsel %vm91_vm0, %v1934_v15, -inf  ;;  %v1941_v27 = vsel %vm91_vm0, %v1935_v21, -inf  ;;  %v1936_v30 = vsel %vm5959_vm12, %v1932_v22, -1e+30  ;;  %v1937_v38 = vsel %vm5969_vm11, %v1933_v31, -1e+30 }
 0xac7   :  { %1939 = vmax.xlane.f32.xlu1 %v1938_v26  ;;  %1942 = vmax.xlane.f32.xlu0 %v1941_v27  ;;  %v1944_v36 = vsel %vm91_vm0, %v1936_v30, -inf  ;;  %v1947_v39 = vsel %vm91_vm0, %v1937_v38, -inf }
 0xacb   :  { %1945 = vmax.xlane.f32.xlu1 %v1944_v36 }
 0xacf   :  { %1948 = vmax.xlane.f32.xlu1 %v1947_v39 }
 0xb50   :  { %v1943_v40 = vpop.xlane.xlu0 %1942  ;;  %v1940_v41 = vpop.xlane.xlu1 %1939 }
 0xb51   :  { %v1951_v42 = vsub.f32 %v1935_v21, %v1943_v40  ;;  %v1950_v43 = vsub.f32 %v1934_v15, %v1940_v41 }
 0xb53   :  { %v1956_v44 = vmul.f32 1.442695, %v1951_v42  ;;  %v1954_v45 = vmul.f32 1.442695, %v1950_v43  ;;  %v5996_v43 = vld [vmem:[%s6537_s4] sm:$0xff] }
 0xb54   :  { %v1946_v37 = vpop.xlane.xlu1 %1945 }
 0xb55   :  { %5164 = vpow2.f32 %v1956_v44  ;;  %v1952_v46 = vsub.f32 %v1936_v30, %v1946_v37 }
 0xb56   :  { %5166 = vpow2.f32 %v1954_v45 }
 0xb57   :  { %v1958_v47 = vmul.f32 1.442695, %v1952_v46 }
 0xb58   :  { %v1949_v49 = vpop.xlane.xlu1 %1948 }
 0xb59   :  { %5168 = vpow2.f32 %v1958_v47  ;;  %v1953_v51 = vsub.f32 %v1937_v38, %v1949_v49 }
 0xb5b   :  { %v1960_v52 = vmul.f32 1.442695, %v1953_v51 }
 0xb5d   :  { %5170 = vpow2.f32 %v1960_v52 }
 0xb62   :  { %v5165_v54 = vpop.eup %5164 }
 0xb63   :  { %v5167_v16 = vpop.eup %5166  ;;  %v1963_v55 = vsel %vm5943_vm10, %v5165_v54, 0.0  ;;  %v2092_v54 = vld [vmem:[%s6494_s17 + $0x8] sm:$0xff] }
 0xb64   :  { %v1969_v61 = vsel %vm91_vm0, %v1963_v55, 0.0  ;;  %v1962_v62 = vsel %vm5949_vm2, %v5167_v16, 0.0  ;;  %4877 = vmatprep.subr.mxu0 %v2092_v54  ;;  %v2091_v16 = vld [vmem:[%s6494_s17] sm:$0xff]  ;;  %vm6579_vm2 = vcmask 130048  }
 0xb65   :  { %1970 = vadd.xlane.f32.xlu0 %v1969_v61  ;;  %v1966_v63 = vsel %vm91_vm0, %v1962_v62, 0.0  ;;  %4878 = vmatpush3.msra.mxu0 %v2092_v54  ;;  %vm6580_vm1 = vmmov %vm6579_vm2 }
 0xb66   :  { %v5169_v14 = vpop.eup %5168  ;;  %1967 = vadd.xlane.f32.xlu1 %v1966_v63  ;;  %4879 = vmatprep.subr.mxu0 %v2091_v16  ;;  %vm6581_vm9 = vmmov %vm6580_vm1 }
 0xb67   :  { %v1964_v1 = vsel %vm5959_vm12, %v5169_v14, 0.0  ;;  %4880 = vmatpush3.msra.mxu0 %v2091_v16  ;;  %vm6582_vm12 = vmmov %vm6580_vm1 }
 0xb68   :  { %v1972_v7 = vsel %vm91_vm0, %v1964_v1, 0.0  ;;  %4887 = vmatprep.subr.mxu0 %v5256_v60  ;;  %vm6583_vm8 = vmmov %vm6580_vm1 }
 0xb69   :  { %vm6584_vm4 = vmmov %vm6580_vm1 }
 0xb6a   :  { %v5171_v11 = vpop.eup %5170  ;;  %1973 = vadd.xlane.f32.xlu1 %v1972_v7 }
 0xb6b   :  { %v1965_v19 = vsel %vm5969_vm11, %v5171_v11, 0.0  ;;  %vm6585_vm11 = vmmov %vm6580_vm1 }
 0xb6c   :  { %v1975_v18 = vsel %vm91_vm0, %v1965_v19, 0.0 }
 0xb6d   :  { %1976 = vadd.xlane.f32.xlu0 %v1975_v18 }
 0xbee   :  { %v1971_v2 = vpop.xlane.xlu0 %1970 }
 0xbef   :  { %vm1979_vm14 = vcmp.gt.f32.partialorder %v1971_v2, 0.0  ;;  %v1968_v15 = vpop.xlane.xlu1 %1967 }
 0xbf0   :  { %v1983_v21 = vsel %vm1979_vm14, %v1971_v2, 1.0  ;;  %vm1978_vm10 = vcmp.gt.f32.partialorder %v1968_v15, 0.0  ;;  %vm6586_vm14 = vmmov %vm6580_vm1 }
 0xbf1   :  { %5172 = vrcp.f32 %v1983_v21  ;;  %v1982_v22 = vsel %vm1978_vm10, %v1968_v15, 1.0  ;;  %vm6587_vm10 = vmmov %vm6580_vm1 }
 0xbf2   :  { %5174 = vrcp.f32 %v1982_v22 }
 0xbf3   :  { %v1974_v24 = vpop.xlane.xlu1 %1973 }
 0xbf4   :  { %vm1980_vm15 = vcmp.gt.f32.partialorder %v1974_v24, 0.0 }
 0xbf5   :  { %v1984_v26 = vsel %vm1980_vm15, %v1974_v24, 1.0  ;;  %vm6588_vm15 = vmmov %vm6580_vm1 }
 0xbf6   :  { %5176 = vrcp.f32 %v1984_v26  ;;  %v1977_v27 = vpop.xlane.xlu0 %1976 }
 0xbf7   :  { %vm1981_vm7 = vcmp.gt.f32.partialorder %v1977_v27, 0.0 }
 0xbf8   :  { %v1985_v30 = vsel %vm1981_vm7, %v1977_v27, 1.0  ;;  %vm6589_vm7 = vmmov %vm6580_vm1 }
 0xbf9   :  { %5178 = vrcp.f32 %v1985_v30 }
 0xbfe   :  { %v5173_v31 = vpop.eup %5172 }
 0xbff   :  { %v5175_v33 = vpop.eup %5174  ;;  %v1991_v36 = vmul.f32 %v5173_v31, %v1963_v55  ;;  %v2287_v55 = vld [vmem:[%s6495_s18] sm:$0x1] }
 0xc00   :  { %v1990_v38 = vmul.f32 %v5175_v33, %v1962_v62  ;;  %v2291_v61 = vmul.f32 %v2287_v55, %v2287_v55  ;;  %v2309_v33 = vrot.slane %v2287_v55, %v5503_v6 }
 0xc02   :  { %4857 = vmatprep.mubr.msk.f32.mxu1 %vm91_vm0, %v1990_v38  ;;  %v2292_v62 = vsel %vm6578_vm13, %v2291_v61, 0.0  ;;  %vm6590_vm13 = vmmov %vm6580_vm1 }
 0xc03   :  { %v5177_v39 = vpop.eup %5176  ;;  %4858 = vmatmul.mubr.msk.f32.vlgmr.msra.gmra.mxu1 %vm91_vm0, %v1991_v36  ;;  %2293 = vadd.xlane.f32.xlu1 %v2292_v62 }
 0xc04   :  { %v1992_v40 = vmul.f32 %v5177_v39, %v1964_v1 }
 0xc06   :  { %v5179_v41 = vpop.eup %5178  ;;  %4860 = vmatprep.mubr.msk.f32.mxu1 %vm91_vm0, %v1992_v40 }
 0xc07   :  { %v1993_v42 = vmul.f32 %v5179_v41, %v1965_v19 }
 0xc09   :  { %4861 = vmatmul.mubr.msk.f32.gmra.mxu1 %vm91_vm0, %v1993_v42 }
 0xc0a   :  { %4871 = vmatprep.mubr.msk.f32.mxu1 %vm91_vm0, %v5996_v43 }
 0xc8c   :  { %v2294_v15 = vpop.xlane.xlu1 %2293 }
 0xc8d   :  { %v2295_v21 = vrot.slane %v2294_v15, 4 }
 0xc8f   :  { %v2296_v22 = vadd.f32 %v2295_v21, %v2294_v15 }
 0xc91   :  { %v2297_v24 = vrot.slane %v2296_v22, 2 }
 0xc93   :  { %v2298_v26 = vadd.f32 %v2297_v24, %v2296_v22 }
 0xc95   :  { %v2299_v27 = vrot.slane %v2298_v26, 1 }
 0xc97   :  { %v2300_v30 = vadd.f32 %v2299_v27, %v2298_v26 }
 0xc99   :  { %5083 = vpush %v2300_v30 }
 0xcc3   :  { %v4859_v44 = vpop.f32.mrf.mxu1 }
 0xcc4   :  { %v2094_v51 = vmul.f32 %v5451_v28, %v4859_v44 }
 0xcc5   :  { %v2072_v45 = vpop.f32.mrf.mxu1 }
 0xcc6   :  { %v2093_v52 = vmul.f32 %v5461_v32, %v2072_v45 }
 0xcc9   :  { %v4862_v37 = vpop.f32.mrf.mxu1 }
 0xcca   :  { %v2096_v46 = vmul.f32 %v5445_v25, %v4862_v37  ;;  %s5084_s17 = spop %5083 }
 0xccb   :  { %v2082_v47 = vpop.f32.mrf.mxu1  ;;  %v2302_v16 = vstv %s5084_s17 }
 0xccc   :  { %v2095_v49 = vmul.f32 %v5453_v29, %v2082_v47  ;;  %4863 = vmatprep.subr.mxu1 %v2096_v46  ;;  %v2303_v61 = vmax.f32 %v2302_v16, 1e-24 }
 0xccd   :  { %4864 = vmatpush3.msra.mxu1 %v2096_v46 }
 0xcce   :  { %4865 = vmatprep.subr.mxu1 %v2095_v49  ;;  %5180 = vrsqrt.f32 %v2303_v61 }
 0xccf   :  { %4866 = vmatpush3.msra.mxu1 %v2095_v49 }
 0xcd0   :  { %4867 = vmatprep.subr.mxu1 %v2094_v51 }
 0xcd1   :  { %4868 = vmatpush3.msra.mxu1 %v2094_v51 }
 0xcd2   :  { %4869 = vmatprep.subr.mxu1 %v2093_v52 }
 0xcd3   :  { %4870 = vmatpush3.msra.mxu1 %v2093_v52 }
 0xcd4   :  { %4872 = vmatmul.mubr.msk.f32.vlgmr.msra.gmra.mxu1 %vm91_vm0, %v5908_v34 }
 0xcd5   :  { %4874 = vmatprep.mubr.msk.f32.mxu1 %vm91_vm0, %v5916_v35 }
 0xcd8   :  { %4875 = vmatmul.mubr.msk.f32.gmra.mxu1 %vm91_vm0, %v5923_v17 }
 0xcd9   :  { %4906 = vmatprep.mubr.msk.f32.mxu1 %vm91_vm0, %v5996_v43 }
 0xd94   :  { %v4873_v63 = vpop.f32.mrf.mxu1 }
 0xd95   :  { %v2183_v7 = vmul.f32 %v5486_v50, %v4873_v63 }
 0xd96   :  { %v2163_v14 = vpop.f32.mrf.mxu1 }
 0xd97   :  { %v2182_v1 = vmul.f32 %v5484_v48, %v2163_v14 }
 0xd98   :  { %v4876_v11 = vpop.f32.mrf.mxu1 }
 0xd99   :  { %4881 = vmatprep.mubr.msk.f32.mxu0 %vm6579_vm2, %v2182_v1  ;;  %v2185_v2 = vmul.f32 %v5492_v56, %v4876_v11  ;;  %vm6591_vm2 = vmmov %vm6580_vm1 }
 0xd9a   :  { %v2173_v19 = vpop.f32.mrf.mxu1  ;;  %4882 = vmatmul.mubr.msk.f32.vlgmr.msra.gmra.mxu0 %vm6580_vm1, %v2183_v7  ;;  %v5181_v7 = vpop.eup %5180 }
 0xd9b   :  { %v2184_v18 = vmul.f32 %v5489_v53, %v2173_v19 }
 0xd9d   :  { %4884 = vmatprep.mubr.msk.f32.mxu0 %vm6581_vm9, %v2184_v18 }
 0xd9e   :  { %4885 = vmatmul.mubr.msk.f32.gmra.mxu0 %vm6582_vm12, %v2185_v2 }
 0xd9f   :  { %4895 = vmatprep.mubr.msk.f32.mxu0 %vm5257_vm3, %v5256_v60 }
 0xe5a   :  { %v4883_v31 = vpop.f32.mrf.mxu0 }
 0xe5b   :  { %v2270_v36 = vadd.f32 %v4883_v31, %v5819_v57 }
 0xe5c   :  { %v2264_v38 = vpop.f32.mrf.mxu0 }
 0xe5d   :  { %v6036_v39 = vadd.f32 %v2270_v36, %v5819_v57  ;;  %v2265_v40 = vadd.f32 %v2264_v38, %v5821_v23 }
 0xe5e   :  { %v4886_v41 = vpop.f32.mrf.mxu0 }
 0xe5f   :  { %v6040_v42 = vadd.f32 %v2265_v40, %v5821_v23  ;;  %v2280_v44 = vadd.f32 %v4886_v41, %v5824_v4  ;;  %v2312_v45 = vmul.f32 %v2309_v33, %v6036_v39 }
 0xe60   :  { %v2274_v37 = vpop.f32.mrf.mxu0 }
 0xe61   :  { %v6045_v46 = vadd.f32 %v2280_v44, %v5824_v4  ;;  %v2275_v47 = vadd.f32 %v2274_v37, %v5828_v20  ;;  %v2318_v49 = vsel %vm6583_vm8, %v2312_v45, 0.0  ;;  %v2311_v57 = vmul.f32 %v2309_v33, %v6040_v42 }
 0xe62   :  { %2319 = vadd.xlane.f32.xlu1 %v2318_v49 }
 0xe63   :  { %v6051_v51 = vadd.f32 %v2275_v47, %v5828_v20  ;;  %4888 = vmatpush3.xpose.msk.msra.mxu0 %vm6584_vm4, %v6045_v46  ;;  %v2315_v23 = vsel %vm6585_vm11, %v2311_v57, 0.0  ;;  %v2314_v52 = vmul.f32 %v2309_v33, %v6045_v46 }
 0xe64   :  { %2316 = vadd.xlane.f32.xlu0 %v2315_v23  ;;  %4889 = vmatprep.subr.mxu0 %v5256_v60 }
 0xe65   :  { %v2324_v4 = vsel %vm6586_vm14, %v2314_v52, 0.0  ;;  %v2313_v54 = vmul.f32 %v2309_v33, %v6051_v51  ;;  %vm6592_vm14 = vcmp.ne.s32.totalorder %v5546_v58, %v5549_v59  ;;  %v2289_v52 = vld [vmem:[%s6496_s19 + $0x8] sm:$0xff] }
 0xe66   :  { %2325 = vadd.xlane.f32.xlu1 %v2324_v4  ;;  %v2288_v4 = vld [vmem:[%s6496_s19] sm:$0xff] }
 0xe67   :  { %4890 = vmatpush3.xpose.msk.msra.mxu0 %vm6587_vm10, %v6051_v51  ;;  %v2321_v20 = vsel %vm6588_vm15, %v2313_v54, 0.0  ;;  %vm6593_vm15 = vcmp.lt.s32.totalorder %v5552_v0, %v5549_v59 }
 0xe68   :  { %2322 = vadd.xlane.f32.xlu0 %v2321_v20  ;;  %4891 = vmatprep.subr.mxu0 %v5256_v60 }
 0xe6b   :  { %4892 = vmatpush3.xpose.msk.msra.mxu0 %vm6589_vm7, %v6036_v39 }
 0xe6c   :  { %4893 = vmatprep.subr.mxu0 %v5256_v60 }
 0xe6f   :  { %4894 = vmatpush3.xpose.msk.msra.mxu0 %vm6590_vm13, %v6040_v42 }
 0xe70   :  { %4922 = vmatprep.subr.mxu0 %v5256_v60 }
 0xe72   :  { %4896 = vmatmul.mubr.msk.f32.vlgmr.msra.gmra.mxu0 %vm6591_vm2, %v2287_v55 }
 0xe73   :  { %4930 = vmatprep.mubr.msk.f32.mxu0 %vm5257_vm3, %v5256_v60 }
 0xeeb   :  { %v2320_v63 = vpop.xlane.xlu1 %2319 }
 0xeec   :  { %v2328_v11 = vand.u32 2147483647, %v2320_v63 }
 0xeed   :  { %v2317_v62 = vpop.xlane.xlu0 %2316 }
 0xeee   :  { %v2327_v14 = vand.u32 2147483647, %v2317_v62  ;;  %v2332_v15 = vmul.f32 %v5181_v7, %v2328_v11 }
 0xeef   :  { %v2326_v18 = vpop.xlane.xlu1 %2325 }
 0xef0   :  { %v2331_v19 = vmul.f32 %v5181_v7, %v2327_v14  ;;  %v2330_v21 = vand.u32 2147483647, %v2326_v18  ;;  %v4331_v24 = vmul.f32 -1.442695, %v2332_v15 }
 0xef1   :  { %v2323_v1 = vpop.xlane.xlu0 %2322 }
 0xef2   :  { %v2329_v2 = vand.u32 2147483647, %v2323_v1  ;;  %v4330_v22 = vmul.f32 -1.442695, %v2331_v19  ;;  %v2334_v26 = vmul.f32 %v5181_v7, %v2330_v21 }
 0xef4   :  { %v2333_v55 = vmul.f32 %v5181_v7, %v2329_v2  ;;  %5182 = vpow2.f32 %v4330_v22  ;;  %v4333_v30 = vmul.f32 -1.442695, %v2334_v26 }
 0xef5   :  { %5184 = vpow2.f32 %v4331_v24 }
 0xef6   :  { %v4332_v27 = vmul.f32 -1.442695, %v2333_v55 }
 0xef8   :  { %5186 = vpow2.f32 %v4332_v27 }
 0xef9   :  { %5188 = vpow2.f32 %v4333_v30 }
 0xf01   :  { %v5183_v36 = vpop.eup %5182 }
 0xf02   :  { %v5185_v41 = vpop.eup %5184  ;;  %v2558_v44 = vadd.f32 1.0, %v5183_v36 }
 0xf03   :  { %v2559_v47 = vadd.f32 1.0, %v5185_v41 }
 0xf04   :  { %5190 = vrcp.f32 %v2558_v44 }
 0xf05   :  { %v5187_v37 = vpop.eup %5186  ;;  %5192 = vrcp.f32 %v2559_v47 }
 0xf06   :  { %v5189_v49 = vpop.eup %5188  ;;  %v2560_v57 = vadd.f32 1.0, %v5187_v37 }
 0xf07   :  { %v2561_v23 = vadd.f32 1.0, %v5189_v49 }
 0xf08   :  { %5194 = vrcp.f32 %v2560_v57 }
 0xf09   :  { %5196 = vrcp.f32 %v2561_v23 }
 0xf11   :  { %v5191_v54 = vpop.eup %5190 }
 0xf12   :  { %v5193_v20 = vpop.eup %5192  ;;  %v2570_v16 = vmul.f32 %v5191_v54, %v6040_v42 }
 0xf13   :  { %v2571_v62 = vmul.f32 %v5193_v20, %v6036_v39 }
 0xf15   :  { %v5195_v61 = vpop.eup %5194 }
 0xf16   :  { %v5197_v63 = vpop.eup %5196  ;;  %v2572_v14 = vmul.f32 %v5195_v61, %v6051_v51 }
 0xf17   :  { %v2573_v1 = vmul.f32 %v5197_v63, %v6045_v46 }
 0xf32   :  { %v2415_v31 = vpop.f32.mrf.mxu0 }
 0xf33   :  { %v2419_v33 = vand.u32 2147483647, %v2415_v31 }
 0xf34   :  { %v4897_v38 = vpop.f32.mrf.mxu0 }
 0xf35   :  { %v2420_v40 = vmul.f32 %v5181_v7, %v2419_v33 }
 0xf37   :  { %v2424_v45 = vrot.slane %v2420_v40, %v5503_v6 }
 0xf39   :  { %vm2428_vm1 = vcmp.gt.f32.partialorder %v2334_v26, %v2424_v45  ;;  %vm2432_vm9 = vcmp.eq.f32.partialorder %v2334_v26, %v2424_v45  ;;  %vm2431_vm8 = vcmp.eq.f32.partialorder %v2333_v55, %v2424_v45  ;;  %vm2427_vm11 = vcmp.gt.f32.partialorder %v2333_v55, %v2424_v45  ;;  %v2290_v55 = vld [vmem:[%s6497_s20] sm:$0x1] }
 0xf3a   :  { %vm2436_vm12 = vmand %vm2432_vm9, %vm513_vm5  ;;  %vm2430_vm13 = vcmp.eq.f32.partialorder %v2332_v15, %v2424_v45  ;;  %vm2426_vm9 = vcmp.gt.f32.partialorder %v2332_v15, %v2424_v45 }
 0xf3b   :  { %vm2440_vm4 = vmor %vm2428_vm1, %vm2436_vm12  ;;  %vm6594_vm1 = vcmp.ne.s32.totalorder %v5552_v0, %v5549_v59 }
 0xf3c   :  { %vm2444_vm10 = vmand %vm2440_vm4, %vm6592_vm14  ;;  %vm2429_vm14 = vcmp.eq.f32.partialorder %v2331_v19, %v2424_v45 }
 0xf3d   :  { %4898 = vmatprep.subr.msk.mxu1 %vm2444_vm10, %v5258_v10  ;;  %vm2435_vm7 = vmand %vm2431_vm8, %vm6593_vm15  ;;  %vm2425_vm15 = vcmp.gt.f32.partialorder %v2331_v19, %v2424_v45 }
 0xf3e   :  { %4899 = vmatpush3.msk.msra.mxu1 %vm2444_vm10, %v5258_v10  ;;  %vm2439_vm2 = vmor %vm2427_vm11, %vm2435_vm7  ;;  %vm6595_vm11 = vcmp.ne.s32.totalorder %v5560_v3, %v5549_v59  ;;  %vm6596_vm7 = vcmp.lt.s32.totalorder %v5500_v5, %v5549_v59 }
 0xf3f   :  { %vm2443_vm12 = vmand %vm2439_vm2, %vm6594_vm1 }
 0xf40   :  { %4900 = vmatprep.subr.msk.mxu1 %vm2443_vm12, %v5258_v10  ;;  %vm2434_vm4 = vmand %vm2430_vm13, %vm511_vm6  ;;  %vm6597_vm13 = vcmp.ne.s32.totalorder %v5500_v5, %v5549_v59 }
 0xf41   :  { %4901 = vmatpush3.msk.msra.mxu1 %vm2443_vm12, %v5258_v10  ;;  %vm2438_vm8 = vmor %vm2426_vm9, %vm2434_vm4  ;;  %vm6598_vm9 = vcmask 130048  }
 0xf42   :  { %vm2442_vm10 = vmand %vm2438_vm8, %vm6595_vm11 }
 0xf43   :  { %4902 = vmatprep.subr.msk.mxu1 %vm2442_vm10, %v5258_v10  ;;  %vm2433_vm2 = vmand %vm2429_vm14, %vm6596_vm7 }
 0xf44   :  { %4903 = vmatpush3.msk.msra.mxu1 %vm2442_vm10, %v5258_v10  ;;  %vm2437_vm1 = vmor %vm2425_vm15, %vm2433_vm2 }
 0xf45   :  { %vm2441_vm12 = vmand %vm2437_vm1, %vm6597_vm13 }
 0xf46   :  { %4904 = vmatprep.subr.msk.mxu1 %vm2441_vm12, %v5258_v10  ;;  %vm6599_vm4 = vmmov %vm6598_vm9 }
 0xf47   :  { %4905 = vmatpush3.msk.msra.mxu1 %vm2441_vm12, %v5258_v10  ;;  %vm6600_vm14 = vmmov %vm6599_vm4 }
 0xf48   :  { %4907 = vmatmul.mubr.msk.f32.vlgmr.msra.gmra.mxu1 %vm91_vm0, %v5908_v34  ;;  %4912 = vmatprep.subr.mxu1 %v2289_v52  ;;  %vm6601_vm8 = vmmov %vm6599_vm4 }
 0xf49   :  { %4913 = vmatpush3.msra.mxu1 %v2289_v52  ;;  %4909 = vmatprep.mubr.msk.f32.mxu1 %vm91_vm0, %v5916_v35  ;;  %vm6602_vm15 = vmmov %vm6599_vm4 }
 0xf4a   :  { %4914 = vmatprep.subr.mxu1 %v2288_v4  ;;  %vm6603_vm11 = vmmov %vm6599_vm4 }
 0xf4b   :  { %4915 = vmatpush3.msra.mxu1 %v2288_v4  ;;  %vm6604_vm10 = vmmov %vm6599_vm4 }
 0xf4c   :  { %4910 = vmatmul.mubr.msk.f32.gmra.mxu1 %vm91_vm0, %v5923_v17  ;;  %vm6605_vm7 = vmmov %vm6599_vm4 }
 0xf4d   :  { %4916 = vmatprep.mubr.msk.f32.mxu1 %vm6598_vm9, %v2570_v16  ;;  %vm6606_vm2 = vmmov %vm6599_vm4 }
 0xf50   :  { %4917 = vmatmul.mubr.msk.f32.vlgmr.msra.gmra.mxu1 %vm6599_vm4, %v2571_v62  ;;  %vm6607_vm4 = vcmp.gt.f32.partialorder %v5422_v9, 0.0 }
 0xf51   :  { %4919 = vmatprep.mubr.msk.f32.mxu1 %vm6600_vm14, %v2572_v14 }
 0xf54   :  { %4920 = vmatmul.mubr.msk.f32.gmra.mxu1 %vm6601_vm8, %v2573_v1 }
0x1008   :  { %v4908_v7 = vpop.f32.mrf.mxu1 }
0x1009   :  { %vm2539_vm1 = vcmp.lt.f32.partialorder %v4908_v7, 8.0 }
0x100a   :  { %v2519_v11 = vpop.f32.mrf.mxu1  ;;  %vm6142_vm14 = vmand %vm6607_vm4, %vm2539_vm1 }
0x100b   :  { %vm2538_vm13 = vcmp.lt.f32.partialorder %v2519_v11, 8.0 }
0x100c   :  { %v6126_v19 = vpop.f32.mrf.mxu1 }
0x100e   :  { %v2529_v18 = vpop.f32.mrf.mxu1 }
0x100f   :  { %vm2540_vm8 = vcmp.lt.f32.partialorder %v2529_v18, 8.0 }
0x1010   :  { %v4918_v2 = vpop.f32.mrf.mxu1 }
0x1011   :  { %2761 = vperm.xlu1 %5095, %v4918_v2  }
0x1012   :  { %v2652_v15 = vpop.f32.mrf.mxu1 }
0x1013   :  { %2757 = vperm.xlu0 %5094, %v2652_v15  }
0x1014   :  { %v4921_v21 = vpop.f32.mrf.mxu1 }
0x1015   :  { %4923 = vmatpush3.xpose.msk.msra.mxu0 %vm6602_vm15, %v4921_v21  ;;  %4933 = vmatprep.subr.mxu1 %v4921_v21 }
0x1016   :  { %v2662_v22 = vpop.f32.mrf.mxu1  ;;  %4934 = vmatpush3.msra.mxu1 %v4921_v21  ;;  %4924 = vmatprep.subr.mxu0 %v5256_v60 }
0x1017   :  { %2765 = vperm.xlu1 %5095, %v2662_v22   ;;  %4935 = vmatprep.subr.mxu1 %v2662_v22 }
0x1018   :  { %4936 = vmatpush3.msra.mxu1 %v2662_v22 }
0x1019   :  { %4925 = vmatpush3.xpose.msk.msra.mxu0 %vm6603_vm11, %v2662_v22  ;;  %4937 = vmatprep.subr.mxu1 %v4918_v2  ;;  %vm6610_vm11 = vcmp.gt.f32.partialorder %v5415_v8, 0.0 }
0x101a   :  { %4938 = vmatpush3.msra.mxu1 %v4918_v2  ;;  %4926 = vmatprep.subr.mxu0 %v5256_v60 }
0x101b   :  { %2769 = vperm.xlu1 %5095, %v4921_v21   ;;  %4939 = vmatprep.subr.mxu1 %v2652_v15 }
0x101c   :  { %4940 = vmatpush3.msra.mxu1 %v2652_v15 }
0x101d   :  { %4927 = vmatpush3.xpose.msk.msra.mxu0 %vm6604_vm10, %v4918_v2  ;;  %vm6148_vm10 = vmand %vm6610_vm11, %vm2538_vm13  ;;  %vm2541_vm13 = vcmp.lt.f32.partialorder %v6126_v19, 8.0  ;;  %vm6619_vm11 = vcmask 122880  }
0x101e   :  { %4928 = vmatprep.subr.mxu0 %v5256_v60 }
0x1021   :  { %4929 = vmatpush3.xpose.msk.msra.mxu0 %vm6605_vm7, %v2652_v15 }
0x1024   :  { %4931 = vmatmul.mubr.msk.f32.vlgmr.msra.gmra.mxu0 %vm6606_vm2, %v2290_v55  ;;  %vm6613_vm2 = vcmp.gt.f32.partialorder %v5431_v12, 0.0 }
0x1025   :  { %vm6158_vm1 = vmand %vm6613_vm2, %vm2540_vm8 }
0x108c   :  { %v2762_v24 = vpop.permute.xlu1 %2761 }
0x108e   :  { %v2758_v30 = vpop.permute.xlu0 %2757 }
0x1092   :  { %v2766_v26 = vpop.permute.xlu1 %2765 }
0x1096   :  { %v2770_v33 = vpop.permute.xlu1 %2769 }
0x10e4   :  { %v2752_v27 = vpop.f32.mrf.mxu0 }
0x10e5   :  { %v2775_v31 = vrot.slane %v2752_v27, %v5503_v6 }
0x10e6   :  { %v4932_v36 = vpop.f32.mrf.mxu0 }
0x10e7   :  { %v2777_v38 = vadd.f32 %v2775_v31, %v2762_v24  ;;  %v2776_v40 = vadd.f32 %v2775_v31, %v2758_v30  ;;  %v2778_v41 = vadd.f32 %v2775_v31, %v2766_v26  ;;  %v2779_v44 = vadd.f32 %v2775_v31, %v2770_v33 }
0x10e9   :  { %vm2781_vm12 = vcmp.ge.f32.partialorder %v2777_v38, 0.0  ;;  %v2785_v45 = vmul.f32 0.2, %v2777_v38  ;;  %vm2780_vm9 = vcmp.ge.f32.partialorder %v2776_v40, 0.0  ;;  %v2784_v37 = vmul.f32 0.2, %v2776_v40 }
0x10ea   :  { %vm2782_vm15 = vcmp.ge.f32.partialorder %v2778_v41, 0.0  ;;  %v2786_v49 = vmul.f32 0.2, %v2778_v41  ;;  %v2787_v4 = vmul.f32 0.2, %v2779_v44  ;;  %vm2783_vm7 = vcmp.ge.f32.partialorder %v2779_v44, 0.0 }
0x10eb   :  { %v2789_v23 = vsel %vm2781_vm12, %v2777_v38, %v2785_v45  ;;  %v2788_v52 = vsel %vm2780_vm9, %v2776_v40, %v2784_v37  ;;  %vm6616_vm12 = vcmp.gt.f32.partialorder %v5436_v13, 0.0 }
0x10ec   :  { %v2793_v54 = vsel %vm6142_vm14, %v2789_v23, -1e+30  ;;  %v2792_v20 = vsel %vm6148_vm10, %v2788_v52, -1e+30  ;;  %v2790_v16 = vsel %vm2782_vm15, %v2778_v41, %v2786_v49  ;;  %v2791_v1 = vsel %vm2783_vm7, %v2779_v44, %v2787_v4  ;;  %vm6169_vm9 = vmand %vm6616_vm12, %vm2541_vm13 }
0x10ed   :  { %v2799_v62 = vsel %vm91_vm0, %v2793_v54, -inf  ;;  %v2796_v63 = vsel %vm91_vm0, %v2792_v20, -inf  ;;  %v2794_v14 = vsel %vm6158_vm1, %v2790_v16, -1e+30  ;;  %v2795_v18 = vsel %vm6169_vm9, %v2791_v1, -1e+30 }
0x10ee   :  { %2800 = vmax.xlane.f32.xlu1 %v2799_v62  ;;  %2797 = vmax.xlane.f32.xlu0 %v2796_v63  ;;  %v2802_v11 = vsel %vm91_vm0, %v2794_v14, -inf  ;;  %v2805_v19 = vsel %vm91_vm0, %v2795_v18, -inf }
0x10f2   :  { %2803 = vmax.xlane.f32.xlu0 %v2802_v11 }
0x10f6   :  { %2806 = vmax.xlane.f32.xlu0 %v2805_v19 }
0x1177   :  { %v2801_v2 = vpop.xlane.xlu1 %2800  ;;  %v2798_v15 = vpop.xlane.xlu0 %2797 }
0x1178   :  { %v2809_v21 = vsub.f32 %v2793_v54, %v2801_v2  ;;  %v2808_v22 = vsub.f32 %v2792_v20, %v2798_v15 }
0x117a   :  { %v2814_v55 = vmul.f32 1.442695, %v2809_v21  ;;  %v2812_v24 = vmul.f32 1.442695, %v2808_v22 }
0x117b   :  { %v2804_v26 = vpop.xlane.xlu0 %2803 }
0x117c   :  { %5198 = vpow2.f32 %v2814_v55  ;;  %v2810_v27 = vsub.f32 %v2794_v14, %v2804_v26 }
0x117d   :  { %5200 = vpow2.f32 %v2812_v24 }
0x117e   :  { %v2816_v30 = vmul.f32 1.442695, %v2810_v27 }
0x117f   :  { %v2807_v31 = vpop.xlane.xlu0 %2806 }
0x1180   :  { %5202 = vpow2.f32 %v2816_v30  ;;  %v2811_v33 = vsub.f32 %v2795_v18, %v2807_v31 }
0x1182   :  { %v2818_v36 = vmul.f32 1.442695, %v2811_v33 }
0x1184   :  { %5204 = vpow2.f32 %v2818_v36 }
0x1189   :  { %v5199_v38 = vpop.eup %5198 }
0x118a   :  { %v5201_v40 = vpop.eup %5200  ;;  %v2821_v41 = vsel %vm6142_vm14, %v5199_v38, 0.0  ;;  %v2950_v38 = vld [vmem:[%s6498_s21 + $0x8] sm:$0xff] }
0x118b   :  { %v2827_v44 = vsel %vm91_vm0, %v2821_v41, 0.0  ;;  %v2820_v45 = vsel %vm6148_vm10, %v5201_v40, 0.0  ;;  %4961 = vmatprep.subr.mxu0 %v2950_v38  ;;  %vm6620_vm10 = vcmask 130048  }
0x118c   :  { %2828 = vadd.xlane.f32.xlu1 %v2827_v44  ;;  %v2824_v37 = vsel %vm91_vm0, %v2820_v45, 0.0  ;;  %4962 = vmatpush3.msra.mxu0 %v2950_v38  ;;  %vm6621_vm7 = vmmov %vm6620_vm10 }
0x118d   :  { %v5203_v49 = vpop.eup %5202  ;;  %2825 = vadd.xlane.f32.xlu0 %v2824_v37  ;;  %vm6622_vm2 = vmmov %vm6621_vm7 }
0x118e   :  { %v2822_v23 = vsel %vm6158_vm1, %v5203_v49, 0.0  ;;  %vm6623_vm1 = vmmov %vm6622_vm2 }
0x118f   :  { %v2830_v52 = vsel %vm91_vm0, %v2822_v23, 0.0  ;;  %vm6624_vm13 = vmmov %vm6623_vm1 }
0x1190   :  { %vm6625_vm12 = vmmov %vm6623_vm1 }
0x1191   :  { %v5205_v4 = vpop.eup %5204  ;;  %2831 = vadd.xlane.f32.xlu0 %v2830_v52 }
0x1192   :  { %v2823_v47 = vsel %vm6169_vm9, %v5205_v4, 0.0  ;;  %vm6626_vm9 = vmmov %vm6623_vm1 }
0x1193   :  { %v2833_v54 = vsel %vm91_vm0, %v2823_v47, 0.0 }
0x1194   :  { %2834 = vadd.xlane.f32.xlu1 %v2833_v54 }
0x1215   :  { %v2829_v57 = vpop.xlane.xlu1 %2828 }
0x1216   :  { %vm2837_vm4 = vcmp.gt.f32.partialorder %v2829_v57, 0.0  ;;  %v2826_v20 = vpop.xlane.xlu0 %2825 }
0x1217   :  { %v2841_v16 = vsel %vm2837_vm4, %v2829_v57, 1.0  ;;  %vm2836_vm14 = vcmp.gt.f32.partialorder %v2826_v20, 0.0  ;;  %vm6627_vm4 = vmmov %vm6623_vm1 }
0x1218   :  { %5206 = vrcp.f32 %v2841_v16  ;;  %v2840_v62 = vsel %vm2836_vm14, %v2826_v20, 1.0  ;;  %vm6628_vm14 = vmmov %vm6623_vm1 }
0x1219   :  { %5208 = vrcp.f32 %v2840_v62 }
0x121a   :  { %v2832_v61 = vpop.xlane.xlu0 %2831 }
0x121b   :  { %vm2838_vm8 = vcmp.gt.f32.partialorder %v2832_v61, 0.0 }
0x121c   :  { %v2842_v63 = vsel %vm2838_vm8, %v2832_v61, 1.0  ;;  %vm6629_vm8 = vmmov %vm6623_vm1 }
0x121d   :  { %5210 = vrcp.f32 %v2842_v63  ;;  %v2835_v14 = vpop.xlane.xlu1 %2834 }
0x121e   :  { %vm2839_vm15 = vcmp.gt.f32.partialorder %v2835_v14, 0.0 }
0x121f   :  { %v2843_v1 = vsel %vm2839_vm15, %v2835_v14, 1.0  ;;  %vm6630_vm15 = vmmov %vm6623_vm1 }
0x1220   :  { %5212 = vrcp.f32 %v2843_v1 }
0x1225   :  { %v5207_v7 = vpop.eup %5206 }
0x1226   :  { %v5209_v11 = vpop.eup %5208  ;;  %v2849_v18 = vmul.f32 %v5207_v7, %v2821_v41 }
0x1227   :  { %v2848_v19 = vmul.f32 %v5209_v11, %v2820_v45 }
0x1229   :  { %4941 = vmatprep.mubr.msk.f32.mxu1 %vm91_vm0, %v2848_v19 }
0x122a   :  { %v5211_v2 = vpop.eup %5210  ;;  %4942 = vmatmul.mubr.msk.f32.vlgmr.msra.gmra.mxu1 %vm91_vm0, %v2849_v18 }
0x122b   :  { %v2850_v15 = vmul.f32 %v5211_v2, %v2822_v23 }
0x122d   :  { %v5213_v21 = vpop.eup %5212  ;;  %4944 = vmatprep.mubr.msk.f32.mxu1 %vm91_vm0, %v2850_v15 }
0x122e   :  { %v2851_v22 = vmul.f32 %v5213_v21, %v2823_v47 }
0x1230   :  { %4945 = vmatmul.mubr.msk.f32.gmra.mxu1 %vm91_vm0, %v2851_v22 }
0x1231   :  { %4955 = vmatprep.mubr.msk.f32.mxu1 %vm91_vm0, %v5996_v43 }
0x12ea   :  { %v4943_v55 = vpop.f32.mrf.mxu1 }
0x12eb   :  { %v2952_v33 = vmul.f32 %v5451_v28, %v4943_v55 }
0x12ec   :  { %v2930_v24 = vpop.f32.mrf.mxu1 }
0x12ed   :  { %v2951_v36 = vmul.f32 %v5461_v32, %v2930_v24 }
0x12f0   :  { %v4946_v26 = vpop.f32.mrf.mxu1 }
0x12f1   :  { %v2954_v27 = vmul.f32 %v5445_v25, %v4946_v26 }
0x12f2   :  { %v2940_v30 = vpop.f32.mrf.mxu1 }
0x12f3   :  { %v2953_v31 = vmul.f32 %v5453_v29, %v2940_v30  ;;  %4947 = vmatprep.subr.mxu1 %v2954_v27 }
0x12f4   :  { %4948 = vmatpush3.msra.mxu1 %v2954_v27 }
0x12f5   :  { %4949 = vmatprep.subr.mxu1 %v2953_v31 }
0x12f6   :  { %4950 = vmatpush3.msra.mxu1 %v2953_v31 }
0x12f7   :  { %4951 = vmatprep.subr.mxu1 %v2952_v33 }
0x12f8   :  { %4952 = vmatpush3.msra.mxu1 %v2952_v33 }
0x12f9   :  { %4953 = vmatprep.subr.mxu1 %v2951_v36 }
0x12fa   :  { %4954 = vmatpush3.msra.mxu1 %v2951_v36 }
0x12fb   :  { %4956 = vmatmul.mubr.msk.f32.vlgmr.msra.gmra.mxu1 %vm91_vm0, %v5908_v34  ;;  %4971 = vmatprep.subr.mxu1 %v5256_v60  ;;  %v2949_v34 = vld [vmem:[%s6498_s21] sm:$0xff] }
0x12fc   :  { %4958 = vmatprep.mubr.msk.f32.mxu1 %vm91_vm0, %v5916_v35  ;;  %4963 = vmatprep.subr.mxu0 %v2949_v34  ;;  %v3145_v35 = vld [vmem:[%s6499_s22] sm:$0x1] }
0x12fd   :  { %4964 = vmatpush3.msra.mxu0 %v2949_v34  ;;  %v3167_v14 = vrot.slane %v3145_v35, %v5503_v6 }
0x12ff   :  { %4959 = vmatmul.mubr.msk.f32.gmra.mxu1 %vm91_vm0, %v5923_v17  ;;  %v3149_v17 = vmul.f32 %v3145_v35, %v3145_v35 }
0x1300   :  { %4979 = vmatprep.mubr.msk.f32.mxu1 %vm5257_vm3, %v5256_v60 }
0x1301   :  { %v3150_v40 = vsel %vm6619_vm11, %v3149_v17, 0.0  ;;  %vm6631_vm11 = vmmov %vm6623_vm1 }
0x1302   :  { %3151 = vadd.xlane.f32.xlu0 %v3150_v40 }
0x138b   :  { %v3152_v47 = vpop.xlane.xlu0 %3151 }
0x138c   :  { %v3153_v54 = vrot.slane %v3152_v47, 4 }
0x138e   :  { %v3154_v57 = vadd.f32 %v3153_v54, %v3152_v47 }
0x1390   :  { %v3155_v20 = vrot.slane %v3154_v57, 2 }
0x1392   :  { %v3156_v16 = vadd.f32 %v3155_v20, %v3154_v57 }
0x1394   :  { %v3157_v62 = vrot.slane %v3156_v16, 1 }
0x1396   :  { %v3158_v61 = vadd.f32 %v3157_v62, %v3156_v16 }
0x1398   :  { %5085 = vpush %v3158_v61 }
0x13bb   :  { %v4957_v41 = vpop.f32.mrf.mxu1 }
0x13bc   :  { %v3041_v37 = vmul.f32 %v5486_v50, %v4957_v41 }
0x13bd   :  { %v3021_v44 = vpop.f32.mrf.mxu1 }
0x13be   :  { %v3040_v45 = vmul.f32 %v5484_v48, %v3021_v44 }
0x13bf   :  { %v4960_v49 = vpop.f32.mrf.mxu1 }
0x13c0   :  { %4965 = vmatprep.mubr.msk.f32.mxu0 %vm6620_vm10, %v3040_v45  ;;  %v3043_v4 = vmul.f32 %v5492_v56, %v4960_v49  ;;  %vm6632_vm10 = vmmov %vm6623_vm1 }
0x13c1   :  { %v3031_v23 = vpop.f32.mrf.mxu1  ;;  %4966 = vmatmul.mubr.msk.f32.vlgmr.msra.gmra.mxu0 %vm6621_vm7, %v3041_v37 }
0x13c2   :  { %v3042_v52 = vmul.f32 %v5489_v53, %v3031_v23 }
0x13c4   :  { %4968 = vmatprep.mubr.msk.f32.mxu0 %vm6622_vm2, %v3042_v52 }
0x13c5   :  { %4969 = vmatmul.mubr.msk.f32.gmra.mxu0 %vm6623_vm1, %v3043_v4 }
0x13c6   :  { %4990 = vmatprep.mubr.msk.f32.mxu0 %vm91_vm0, %v5996_v43 }
0x13c9   :  { %s5086_s21 = spop %5085 }
0x13ca   :  { %v3160_v31 = vstv %s5086_s21 }
0x13cb   :  { %v3161_v33 = vmax.f32 %v3160_v31, 1e-24 }
0x13cd   :  { %5214 = vrsqrt.f32 %v3161_v33 }
0x13da   :  { %v5215_v40 = vpop.eup %5214 }
0x1481   :  { %v4967_v63 = vpop.f32.mrf.mxu0 }
0x1482   :  { %v3128_v1 = vadd.f32 %v4967_v63, %v6036_v39 }
0x1483   :  { %v3122_v7 = vpop.f32.mrf.mxu0 }
0x1484   :  { %v6231_v11 = vadd.f32 %v3128_v1, %v6036_v39  ;;  %v3123_v18 = vadd.f32 %v3122_v7, %v6040_v42 }
0x1485   :  { %v4970_v43 = vpop.f32.mrf.mxu0 }
0x1486   :  { %v6235_v19 = vadd.f32 %v3123_v18, %v6040_v42  ;;  %v3138_v2 = vadd.f32 %v4970_v43, %v6045_v46  ;;  %v3170_v15 = vmul.f32 %v3167_v14, %v6231_v11 }
0x1487   :  { %v3132_v21 = vpop.f32.mrf.mxu0 }
0x1488   :  { %v6240_v22 = vadd.f32 %v3138_v2, %v6045_v46  ;;  %v3133_v55 = vadd.f32 %v3132_v21, %v6051_v51  ;;  %v3176_v24 = vsel %vm6624_vm13, %v3170_v15, 0.0  ;;  %v3169_v39 = vmul.f32 %v3167_v14, %v6235_v19 }
0x1489   :  { %3177 = vadd.xlane.f32.xlu0 %v3176_v24 }
0x148a   :  { %v6246_v26 = vadd.f32 %v3133_v55, %v6051_v51  ;;  %4972 = vmatpush3.xpose.msk.msra.mxu1 %vm6625_vm12, %v6240_v22  ;;  %v3173_v42 = vsel %vm6626_vm9, %v3169_v39, 0.0  ;;  %v3172_v27 = vmul.f32 %v3167_v14, %v6240_v22  ;;  %vm6633_vm9 = vcmp.ne.s32.totalorder %v5546_v58, %v5549_v59  ;;  %v3147_v58 = vld [vmem:[%s6500_s23 + $0x8] sm:$0xff]  ;;  %v6325_v39 = vld [vmem:[%s6537_s4 + $0x18] sm:$0xff] }
0x148b   :  { %3174 = vadd.xlane.f32.xlu1 %v3173_v42  ;;  %4973 = vmatprep.subr.mxu1 %v5256_v60  ;;  %v6310_v55 = vld [vmem:[%s6537_s4 + $0x8] sm:$0xff] }
0x148c   :  { %v3182_v46 = vsel %vm6627_vm4, %v3172_v27, 0.0  ;;  %v3171_v30 = vmul.f32 %v3167_v14, %v6246_v26 }
0x148d   :  { %3183 = vadd.xlane.f32.xlu0 %v3182_v46 }
0x148e   :  { %4974 = vmatpush3.xpose.msk.msra.mxu1 %vm6628_vm14, %v6246_v26  ;;  %v3179_v51 = vsel %vm6629_vm8, %v3171_v30, 0.0  ;;  %vm6634_vm14 = vcmp.lt.s32.totalorder %v5552_v0, %v5549_v59 }
0x148f   :  { %3180 = vadd.xlane.f32.xlu1 %v3179_v51  ;;  %4975 = vmatprep.subr.mxu1 %v5256_v60 }
0x1492   :  { %4976 = vmatpush3.xpose.msk.msra.mxu1 %vm6630_vm15, %v6231_v11 }
0x1493   :  { %4977 = vmatprep.subr.mxu1 %v5256_v60 }
0x1496   :  { %4978 = vmatpush3.xpose.msk.msra.mxu1 %vm6631_vm11, %v6235_v19 }
0x1497   :  { %5006 = vmatprep.subr.mxu1 %v5256_v60 }
0x1499   :  { %4980 = vmatmul.mubr.msk.f32.vlgmr.msra.gmra.mxu1 %vm6632_vm10, %v3145_v35  ;;  %vm6635_vm10 = vcmp.ne.s32.totalorder %v5552_v0, %v5549_v59  ;;  %v3146_v0 = vld [vmem:[%s6500_s23] sm:$0xff] }
0x149a   :  { %5014 = vmatprep.mubr.msk.f32.mxu1 %vm5257_vm3, %v5256_v60 }
0x1512   :  { %v3178_v38 = vpop.xlane.xlu0 %3177 }
0x1513   :  { %v3186_v41 = vand.u32 2147483647, %v3178_v38 }
0x1514   :  { %v3175_v36 = vpop.xlane.xlu1 %3174 }
0x1515   :  { %v3185_v34 = vand.u32 2147483647, %v3175_v36  ;;  %v3190_v49 = vmul.f32 %v5215_v40, %v3186_v41  ;;  %v3148_v41 = vld [vmem:[%s6501_s24] sm:$0x1] }
0x1516   :  { %v3184_v45 = vpop.xlane.xlu0 %3183 }
0x1517   :  { %v3189_v44 = vmul.f32 %v5215_v40, %v3185_v34  ;;  %v3188_v23 = vand.u32 2147483647, %v3184_v45  ;;  %v4373_v4 = vmul.f32 -1.442695, %v3190_v49 }
0x1518   :  { %v3181_v17 = vpop.xlane.xlu1 %3180 }
0x1519   :  { %v3187_v37 = vand.u32 2147483647, %v3181_v17  ;;  %v4372_v52 = vmul.f32 -1.442695, %v3189_v44  ;;  %v3192_v47 = vmul.f32 %v5215_v40, %v3188_v23 }
0x151b   :  { %v3191_v35 = vmul.f32 %v5215_v40, %v3187_v37  ;;  %5216 = vpow2.f32 %v4372_v52  ;;  %v4375_v57 = vmul.f32 -1.442695, %v3192_v47 }
0x151c   :  { %5218 = vpow2.f32 %v4373_v4 }
0x151d   :  { %v4374_v54 = vmul.f32 -1.442695, %v3191_v35 }
0x151f   :  { %5220 = vpow2.f32 %v4374_v54 }
0x1520   :  { %5222 = vpow2.f32 %v4375_v57 }
0x1528   :  { %v5217_v62 = vpop.eup %5216 }
0x1529   :  { %v5219_v14 = vpop.eup %5218  ;;  %v3416_v1 = vadd.f32 1.0, %v5217_v62 }
0x152a   :  { %v3417_v43 = vadd.f32 1.0, %v5219_v14 }
0x152b   :  { %5224 = vrcp.f32 %v3416_v1 }
0x152c   :  { %v5221_v18 = vpop.eup %5220  ;;  %5226 = vrcp.f32 %v3417_v43 }
0x152d   :  { %v5223_v2 = vpop.eup %5222  ;;  %v3418_v15 = vadd.f32 1.0, %v5221_v18  ;;  %v5255_v18 = vld [vmem:[%s6537_s4] sm:$0xff] }
0x152e   :  { %v3419_v21 = vadd.f32 1.0, %v5223_v2 }
0x152f   :  { %5228 = vrcp.f32 %v3418_v15 }
0x1530   :  { %5230 = vrcp.f32 %v3419_v21 }
0x1559   :  { %v3273_v20 = vpop.f32.mrf.mxu1 }
0x155a   :  { %v3277_v16 = vand.u32 2147483647, %v3273_v20 }
0x155b   :  { %v4981_v61 = vpop.f32.mrf.mxu1 }
0x155c   :  { %v3278_v63 = vmul.f32 %v5215_v40, %v3277_v16 }
0x155e   :  { %v3282_v7 = vrot.slane %v3278_v63, %v5503_v6 }
0x1560   :  { %vm3286_vm3 = vcmp.gt.f32.partialorder %v3192_v47, %v3282_v7  ;;  %vm3290_vm7 = vcmp.eq.f32.partialorder %v3192_v47, %v3282_v7  ;;  %vm3289_vm1 = vcmp.eq.f32.partialorder %v3191_v35, %v3282_v7  ;;  %vm3285_vm12 = vcmp.gt.f32.partialorder %v3191_v35, %v3282_v7 }
0x1561   :  { %vm3294_vm2 = vmand %vm3290_vm7, %vm513_vm5  ;;  %vm3288_vm15 = vcmp.eq.f32.partialorder %v3190_v49, %v3282_v7  ;;  %vm3284_vm11 = vcmp.gt.f32.partialorder %v3190_v49, %v3282_v7 }
0x1562   :  { %vm3298_vm13 = vmor %vm3286_vm3, %vm3294_vm2  ;;  %vm3287_vm2 = vcmp.eq.f32.partialorder %v3189_v44, %v3282_v7 }
0x1563   :  { %vm3302_vm4 = vmand %vm3298_vm13, %vm6633_vm9  ;;  %vm3283_vm13 = vcmp.gt.f32.partialorder %v3189_v44, %v3282_v7 }
0x1564   :  { %4982 = vmatprep.subr.msk.mxu0 %vm3302_vm4, %v5258_v10  ;;  %vm3293_vm8 = vmand %vm3289_vm1, %vm6634_vm14 }
0x1565   :  { %4983 = vmatpush3.msk.msra.mxu0 %vm3302_vm4, %v5258_v10  ;;  %vm3297_vm5 = vmor %vm3285_vm12, %vm3293_vm8  ;;  %vm6636_vm12 = vcmp.ne.s32.totalorder %v5560_v3, %v5549_v59  ;;  %vm6637_vm4 = vcmp.lt.s32.totalorder %v5500_v5, %v5549_v59  ;;  %v5225_v3 = vpop.eup %5224 }
0x1566   :  { %vm3301_vm3 = vmand %vm3297_vm5, %vm6635_vm10  ;;  %vm6639_vm5 = vcmask 130048  }
0x1567   :  { %4984 = vmatprep.subr.msk.mxu0 %vm3301_vm3, %v5258_v10  ;;  %vm3292_vm7 = vmand %vm3288_vm15, %vm511_vm6  ;;  %vm6638_vm6 = vcmp.ne.s32.totalorder %v5500_v5, %v5549_v59  ;;  %v6317_v5 = vld [vmem:[%s6537_s4 + $0x10] sm:$0xff]  ;;  %v5227_v59 = vpop.eup %5226 }
0x1568   :  { %4985 = vmatpush3.msk.msra.mxu0 %vm3301_vm3, %v5258_v10  ;;  %vm3296_vm1 = vmor %vm3284_vm11, %vm3292_vm7  ;;  %v5229_v24 = vpop.eup %5228  ;;  %v3429_v42 = vmul.f32 %v5227_v59, %v6231_v11 }
0x1569   :  { %vm3300_vm9 = vmand %vm3296_vm1, %vm6636_vm12  ;;  %v5231_v27 = vpop.eup %5230  ;;  %v3430_v46 = vmul.f32 %v5229_v24, %v6246_v26 }
0x156a   :  { %4986 = vmatprep.subr.msk.mxu0 %vm3300_vm9, %v5258_v10  ;;  %vm3291_vm14 = vmand %vm3287_vm2, %vm6637_vm4  ;;  %v3431_v30 = vmul.f32 %v5231_v27, %v6240_v22 }
0x156b   :  { %4987 = vmatpush3.msk.msra.mxu0 %vm3300_vm9, %v5258_v10  ;;  %vm3295_vm8 = vmor %vm3283_vm13, %vm3291_vm14 }
0x156c   :  { %vm3299_vm15 = vmand %vm3295_vm8, %vm6638_vm6  ;;  %vm6648_vm6 = vcmp.gt.f32.partialorder %v5422_v9, 0.0 }
0x156d   :  { %4988 = vmatprep.subr.msk.mxu0 %vm3299_vm15, %v5258_v10  ;;  %vm6640_vm11 = vmmov %vm6639_vm5 }
0x156e   :  { %4989 = vmatpush3.msk.msra.mxu0 %vm3299_vm15, %v5258_v10  ;;  %v3428_v10 = vmul.f32 %v5225_v3, %v6235_v19  ;;  %vm6641_vm10 = vmmov %vm6639_vm5 }
0x156f   :  { %4991 = vmatmul.mubr.msk.f32.vlgmr.msra.gmra.mxu0 %vm91_vm0, %v6310_v55  ;;  %4996 = vmatprep.subr.mxu0 %v3147_v58  ;;  %vm6642_vm3 = vmmov %vm6639_vm5 }
0x1570   :  { %4997 = vmatpush3.msra.mxu0 %v3147_v58  ;;  %4993 = vmatprep.mubr.msk.f32.mxu0 %vm91_vm0, %v6317_v5  ;;  %vm6643_vm7 = vmmov %vm6642_vm3 }
0x1571   :  { %4998 = vmatprep.subr.mxu0 %v3146_v0  ;;  %vm6644_vm2 = vmmov %vm6642_vm3 }
0x1572   :  { %4999 = vmatpush3.msra.mxu0 %v3146_v0  ;;  %vm6645_vm1 = vmmov %vm6644_vm2 }
0x1573   :  { %4994 = vmatmul.mubr.msk.f32.gmra.mxu0 %vm91_vm0, %v6325_v39  ;;  %vm6646_vm13 = vmmov %vm6645_vm1 }
0x1574   :  { %5000 = vmatprep.mubr.msk.f32.mxu0 %vm6639_vm5, %v3428_v10  ;;  %vm6647_vm12 = vmmov %vm6645_vm1 }
0x1577   :  { %5001 = vmatmul.mubr.msk.f32.vlgmr.msra.gmra.mxu0 %vm6640_vm11, %v3429_v42 }
0x1578   :  { %5003 = vmatprep.mubr.msk.f32.mxu0 %vm6641_vm10, %v3430_v46  ;;  %vm6651_vm10 = vcmp.gt.f32.partialorder %v5415_v8, 0.0 }
0x157b   :  { %5004 = vmatmul.mubr.msk.f32.gmra.mxu0 %vm6642_vm3, %v3431_v30 }
0x162f   :  { %v4992_v51 = vpop.f32.mrf.mxu0 }
0x1630   :  { %vm3397_vm9 = vcmp.lt.f32.partialorder %v4992_v51, 8.0 }
0x1631   :  { %v3377_v31 = vpop.f32.mrf.mxu0  ;;  %vm6352_vm15 = vmand %vm6648_vm6, %vm3397_vm9 }
0x1632   :  { %vm3396_vm4 = vcmp.lt.f32.partialorder %v3377_v31, 8.0 }
0x1633   :  { %v6336_v33 = vpop.f32.mrf.mxu0  ;;  %vm6358_vm3 = vmand %vm6651_vm10, %vm3396_vm4 }
0x1635   :  { %v3387_v36 = vpop.f32.mrf.mxu0 }
0x1636   :  { %vm3398_vm5 = vcmp.lt.f32.partialorder %v3387_v36, 8.0 }
0x1637   :  { %v5002_v38 = vpop.f32.mrf.mxu0 }
0x1638   :  { %3619 = vperm.xlu0 %5094, %v5002_v38  }
0x1639   :  { %v3510_v34 = vpop.f32.mrf.mxu0 }
0x163a   :  { %3615 = vperm.xlu1 %5095, %v3510_v34  }
0x163b   :  { %v5005_v17 = vpop.f32.mrf.mxu0 }
0x163c   :  { %5007 = vmatpush3.xpose.msk.msra.mxu1 %vm6643_vm7, %v5005_v17  ;;  %5017 = vmatprep.subr.mxu0 %v5005_v17 }
0x163d   :  { %v3520_v40 = vpop.f32.mrf.mxu0  ;;  %5018 = vmatpush3.msra.mxu0 %v5005_v17  ;;  %5008 = vmatprep.subr.mxu1 %v5256_v60 }
0x163e   :  { %3623 = vperm.xlu1 %5095, %v3520_v40   ;;  %5019 = vmatprep.subr.mxu0 %v3520_v40 }
0x163f   :  { %5020 = vmatpush3.msra.mxu0 %v3520_v40 }
0x1640   :  { %5009 = vmatpush3.xpose.msk.msra.mxu1 %vm6644_vm2, %v3520_v40  ;;  %5021 = vmatprep.subr.mxu0 %v5002_v38  ;;  %vm6654_vm2 = vcmp.gt.f32.partialorder %v5431_v12, 0.0 }
0x1641   :  { %5022 = vmatpush3.msra.mxu0 %v5002_v38  ;;  %5010 = vmatprep.subr.mxu1 %v5256_v60 }
0x1642   :  { %3627 = vperm.xlu1 %5095, %v5005_v17   ;;  %5023 = vmatprep.subr.mxu0 %v3510_v34 }
0x1643   :  { %5024 = vmatpush3.msra.mxu0 %v3510_v34 }
0x1644   :  { %5011 = vmatpush3.xpose.msk.msra.mxu1 %vm6645_vm1, %v5002_v38  ;;  %vm6368_vm1 = vmand %vm6654_vm2, %vm3398_vm5 }
0x1645   :  { %5012 = vmatprep.subr.mxu1 %v5256_v60 }
0x1648   :  { %5013 = vmatpush3.xpose.msk.msra.mxu1 %vm6646_vm13, %v3510_v34  ;;  %vm3399_vm13 = vcmp.lt.f32.partialorder %v6336_v33, 8.0 }
0x164b   :  { %5015 = vmatmul.mubr.msk.f32.vlgmr.msra.gmra.mxu1 %vm6647_vm12, %v3148_v41  ;;  %vm6657_vm12 = vcmp.gt.f32.partialorder %v5436_v13, 0.0 }
0x164c   :  { %vm6379_vm9 = vmand %vm6657_vm12, %vm3399_vm13 }
0x16b3   :  { %v3620_v49 = vpop.permute.xlu0 %3619 }
0x16b5   :  { %v3616_v44 = vpop.permute.xlu1 %3615 }
0x16b9   :  { %v3624_v45 = vpop.permute.xlu1 %3623 }
0x16bd   :  { %v3628_v52 = vpop.permute.xlu1 %3627 }
0x170b   :  { %v3610_v37 = vpop.f32.mrf.mxu1 }
0x170c   :  { %v3633_v23 = vrot.slane %v3610_v37, %v5503_v6 }
0x170d   :  { %v5016_v35 = vpop.f32.mrf.mxu1 }
0x170e   :  { %v3635_v4 = vadd.f32 %v3633_v23, %v3620_v49  ;;  %v3634_v47 = vadd.f32 %v3633_v23, %v3616_v44  ;;  %v3636_v60 = vadd.f32 %v3633_v23, %v3624_v45  ;;  %v3637_v54 = vadd.f32 %v3633_v23, %v3628_v52 }
0x1710   :  { %vm3639_vm14 = vcmp.ge.f32.partialorder %v3635_v4, 0.0  ;;  %v3643_v57 = vmul.f32 0.2, %v3635_v4  ;;  %vm3638_vm8 = vcmp.ge.f32.partialorder %v3634_v47, 0.0  ;;  %v3642_v20 = vmul.f32 0.2, %v3634_v47 }
0x1711   :  { %vm3640_vm11 = vcmp.ge.f32.partialorder %v3636_v60, 0.0  ;;  %v3644_v6 = vmul.f32 0.2, %v3636_v60  ;;  %v3645_v14 = vmul.f32 0.2, %v3637_v54  ;;  %vm3641_vm7 = vcmp.ge.f32.partialorder %v3637_v54, 0.0 }
0x1712   :  { %v3647_v61 = vsel %vm3639_vm14, %v3635_v4, %v3643_v57  ;;  %v3646_v63 = vsel %vm3638_vm8, %v3634_v47, %v3642_v20 }
0x1713   :  { %v3651_v1 = vsel %vm6352_vm15, %v3647_v61, -1e+30  ;;  %v3650_v9 = vsel %vm6358_vm3, %v3646_v63, -1e+30  ;;  %v3648_v7 = vsel %vm3640_vm11, %v3636_v60, %v3644_v6  ;;  %v3649_v15 = vsel %vm3641_vm7, %v3637_v54, %v3645_v14 }
0x1714   :  { %v3657_v8 = vsel %vm91_vm0, %v3651_v1, -inf  ;;  %v3654_v43 = vsel %vm91_vm0, %v3650_v9, -inf  ;;  %v3652_v2 = vsel %vm6368_vm1, %v3648_v7, -1e+30  ;;  %v3653_v58 = vsel %vm6379_vm9, %v3649_v15, -1e+30 }
0x1715   :  { %3658 = vmax.xlane.f32.xlu0 %v3657_v8  ;;  %3655 = vmax.xlane.f32.xlu1 %v3654_v43  ;;  %v3660_v21 = vsel %vm91_vm0, %v3652_v2, -inf  ;;  %v3663_v0 = vsel %vm91_vm0, %v3653_v58, -inf }
0x1719   :  { %3661 = vmax.xlane.f32.xlu0 %v3660_v21 }
0x171d   :  { %3664 = vmax.xlane.f32.xlu0 %v3663_v0 }
0x179e   :  { %v3659_v3 = vpop.xlane.xlu0 %3658  ;;  %v3656_v59 = vpop.xlane.xlu1 %3655 }
0x179f   :  { %v3667_v10 = vsub.f32 %v3651_v1, %v3659_v3  ;;  %v3666_v24 = vsub.f32 %v3650_v9, %v3656_v59  ;;  %v3808_v3 = vld [vmem:[%s6502_s25 + $0x8] sm:$0xff]  ;;  %v3807_v59 = vld [vmem:[%s6502_s25] sm:$0xff] }
0x17a0   :  { %5045 = vmatprep.subr.mxu1 %v3808_v3 }
0x17a1   :  { %v3672_v42 = vmul.f32 1.442695, %v3667_v10  ;;  %v3670_v27 = vmul.f32 1.442695, %v3666_v24  ;;  %5046 = vmatpush3.msra.mxu1 %v3808_v3 }
0x17a2   :  { %v3662_v13 = vpop.xlane.xlu0 %3661  ;;  %5047 = vmatprep.subr.mxu1 %v3807_v59 }
0x17a3   :  { %5232 = vpow2.f32 %v3672_v42  ;;  %v3668_v46 = vsub.f32 %v3652_v2, %v3662_v13  ;;  %5048 = vmatpush3.msra.mxu1 %v3807_v59 }
0x17a4   :  { %5234 = vpow2.f32 %v3670_v27 }
0x17a5   :  { %v3674_v30 = vmul.f32 1.442695, %v3668_v46 }
0x17a6   :  { %v3665_v51 = vpop.xlane.xlu0 %3664 }
0x17a7   :  { %5236 = vpow2.f32 %v3674_v30  ;;  %v3669_v31 = vsub.f32 %v3653_v58, %v3665_v51 }
0x17a9   :  { %v3676_v33 = vmul.f32 1.442695, %v3669_v31  ;;  %v4004_v31 = vld [vmem:[%s6503_s6 + $0x8] sm:$0xff] }
0x17aa   :  { %5069 = vmatprep.subr.mxu1 %v4004_v31 }
0x17ab   :  { %5238 = vpow2.f32 %v3676_v33 }
0x17b0   :  { %v5233_v36 = vpop.eup %5232 }
0x17b1   :  { %v5235_v38 = vpop.eup %5234  ;;  %v3679_v34 = vsel %vm6352_vm15, %v5233_v36, 0.0  ;;  %vm6660_vm15 = vcmask 130048  }
0x17b2   :  { %v3678_v17 = vsel %vm6358_vm3, %v5235_v38, 0.0  ;;  %v3685_v40 = vsel %vm91_vm0, %v3679_v34, 0.0  ;;  %vm6661_vm5 = vmmov %vm6660_vm15 }
0x17b3   :  { %v3682_v41 = vsel %vm91_vm0, %v3678_v17, 0.0  ;;  %3686 = vadd.xlane.f32.xlu0 %v3685_v40  ;;  %vm6662_vm11 = vmmov %vm6661_vm5 }
0x17b4   :  { %v5237_v44 = vpop.eup %5236  ;;  %3683 = vadd.xlane.f32.xlu1 %v3682_v41  ;;  %vm6663_vm10 = vmmov %vm6661_vm5 }
0x17b5   :  { %v3680_v45 = vsel %vm6368_vm1, %v5237_v44, 0.0  ;;  %vm6664_vm3 = vmmov %vm6661_vm5  ;;  %vm4202_vm1 = vcmask 56320  }
0x17b6   :  { %v3688_v37 = vsel %vm91_vm0, %v3680_v45, 0.0  ;;  %vm6665_vm7 = vmmov %vm6664_vm3 }
0x17b8   :  { %v5239_v49 = vpop.eup %5238  ;;  %3689 = vadd.xlane.f32.xlu1 %v3688_v37 }
0x17b9   :  { %v3681_v23 = vsel %vm6379_vm9, %v5239_v49, 0.0 }
0x17ba   :  { %v3691_v52 = vsel %vm91_vm0, %v3681_v23, 0.0 }
0x17bb   :  { %3692 = vadd.xlane.f32.xlu0 %v3691_v52 }
0x183c   :  { %v3687_v35 = vpop.xlane.xlu0 %3686 }
0x183d   :  { %v3684_v4 = vpop.xlane.xlu1 %3683  ;;  %vm3695_vm4 = vcmp.gt.f32.partialorder %v3687_v35, 0.0 }
0x183e   :  { %vm3694_vm14 = vcmp.gt.f32.partialorder %v3684_v4, 0.0  ;;  %v3699_v47 = vsel %vm3695_vm4, %v3687_v35, 1.0 }
0x183f   :  { %v3698_v60 = vsel %vm3694_vm14, %v3684_v4, 1.0  ;;  %5240 = vrcp.f32 %v3699_v47 }
0x1840   :  { %5242 = vrcp.f32 %v3698_v60 }
0x1841   :  { %v3690_v54 = vpop.xlane.xlu1 %3689 }
0x1842   :  { %vm3696_vm8 = vcmp.gt.f32.partialorder %v3690_v54, 0.0 }
0x1843   :  { %v3700_v57 = vsel %vm3696_vm8, %v3690_v54, 1.0 }
0x1844   :  { %5244 = vrcp.f32 %v3700_v57  ;;  %v3693_v20 = vpop.xlane.xlu0 %3692 }
0x1845   :  { %vm3697_vm6 = vcmp.gt.f32.partialorder %v3693_v20, 0.0 }
0x1846   :  { %v3701_v16 = vsel %vm3697_vm6, %v3693_v20, 1.0 }
0x1847   :  { %5246 = vrcp.f32 %v3701_v16 }
0x184c   :  { %v5241_v6 = vpop.eup %5240 }
0x184d   :  { %v5243_v62 = vpop.eup %5242  ;;  %v3707_v61 = vmul.f32 %v5241_v6, %v3679_v34 }
0x184e   :  { %v3706_v63 = vmul.f32 %v5243_v62, %v3678_v17 }
0x1850   :  { %5025 = vmatprep.mubr.msk.f32.mxu0 %vm91_vm0, %v3706_v63 }
0x1851   :  { %v5245_v14 = vpop.eup %5244  ;;  %5026 = vmatmul.mubr.msk.f32.vlgmr.msra.gmra.mxu0 %vm91_vm0, %v3707_v61 }
0x1852   :  { %v3708_v1 = vmul.f32 %v5245_v14, %v3680_v45 }
0x1854   :  { %v5247_v9 = vpop.eup %5246  ;;  %5028 = vmatprep.mubr.msk.f32.mxu0 %vm91_vm0, %v3708_v1 }
0x1855   :  { %v3709_v7 = vmul.f32 %v5247_v9, %v3681_v23 }
0x1857   :  { %5029 = vmatmul.mubr.msk.f32.gmra.mxu0 %vm91_vm0, %v3709_v7 }
0x1858   :  { %5039 = vmatprep.mubr.msk.f32.mxu0 %vm91_vm0, %v5255_v18 }
0x1911   :  { %v5027_v8 = vpop.f32.mrf.mxu0 }
0x1912   :  { %v3810_v58 = vmul.f32 %v5451_v28, %v5027_v8 }
0x1913   :  { %v3788_v43 = vpop.f32.mrf.mxu0 }
0x1914   :  { %v3809_v0 = vmul.f32 %v5461_v32, %v3788_v43 }
0x1917   :  { %v5030_v2 = vpop.f32.mrf.mxu0 }
0x1918   :  { %v3812_v15 = vmul.f32 %v5445_v25, %v5030_v2 }
0x1919   :  { %v3798_v12 = vpop.f32.mrf.mxu0 }
0x191a   :  { %v3811_v21 = vmul.f32 %v5453_v29, %v3798_v12  ;;  %5031 = vmatprep.subr.mxu0 %v3812_v15 }
0x191b   :  { %5032 = vmatpush3.msra.mxu0 %v3812_v15 }
0x191c   :  { %5033 = vmatprep.subr.mxu0 %v3811_v21 }
0x191d   :  { %5034 = vmatpush3.msra.mxu0 %v3811_v21 }
0x191e   :  { %5035 = vmatprep.subr.mxu0 %v3810_v58 }
0x191f   :  { %5036 = vmatpush3.msra.mxu0 %v3810_v58 }
0x1920   :  { %5037 = vmatprep.subr.mxu0 %v3809_v0 }
0x1921   :  { %5038 = vmatpush3.msra.mxu0 %v3809_v0 }
0x1922   :  { %5040 = vmatmul.mubr.msk.f32.vlgmr.msra.gmra.mxu0 %vm91_vm0, %v6310_v55 }
0x1923   :  { %5042 = vmatprep.mubr.msk.f32.mxu0 %vm91_vm0, %v6317_v5 }
0x1926   :  { %5043 = vmatmul.mubr.msk.f32.gmra.mxu0 %vm91_vm0, %v6325_v39 }
0x1927   :  { %5063 = vmatprep.mubr.msk.f32.mxu0 %vm91_vm0, %v5255_v18 }
0x19e2   :  { %v5041_v10 = vpop.f32.mrf.mxu0 }
0x19e3   :  { %v3899_v27 = vmul.f32 %v5486_v50, %v5041_v10 }
0x19e4   :  { %v3879_v24 = vpop.f32.mrf.mxu0 }
0x19e5   :  { %v3898_v42 = vmul.f32 %v5484_v48, %v3879_v24 }
0x19e6   :  { %v5044_v13 = vpop.f32.mrf.mxu0 }
0x19e7   :  { %5049 = vmatprep.mubr.msk.f32.mxu1 %vm6660_vm15, %v3898_v42  ;;  %v3901_v51 = vmul.f32 %v5492_v56, %v5044_v13 }
0x19e8   :  { %v3889_v46 = vpop.f32.mrf.mxu0  ;;  %5050 = vmatmul.mubr.msk.f32.vlgmr.msra.gmra.mxu1 %vm6661_vm5, %v3899_v27 }
0x19e9   :  { %v3900_v30 = vmul.f32 %v5489_v53, %v3889_v46  ;;  %5070 = vmatpush3.msra.mxu1 %v4004_v31 }
0x19eb   :  { %5052 = vmatprep.mubr.msk.f32.mxu1 %vm6662_vm11, %v3900_v30 }
0x19ec   :  { %5053 = vmatmul.mubr.msk.f32.gmra.mxu1 %vm6663_vm10, %v3901_v51 }
0x1aa8   :  { %v5051_v33 = vpop.f32.mrf.mxu1 }
0x1aa9   :  { %v3986_v34 = vadd.f32 %v5051_v33, %v6231_v11 }
0x1aaa   :  { %v3980_v36 = vpop.f32.mrf.mxu1 }
0x1aab   :  { %v3981_v41 = vadd.f32 %v3980_v36, %v6235_v19  ;;  %v4000_v37 = vadd.f32 %v3986_v34, %v6231_v11 }
0x1aac   :  { %v5054_v38 = vpop.f32.mrf.mxu1 }
0x1aad   :  { %v3996_v17 = vadd.f32 %v5054_v38, %v6240_v22  ;;  %v3999_v52 = vadd.f32 %v3981_v41, %v6235_v19  ;;  %v4007_v4 = vmul.f32 %v5451_v28, %v4000_v37 }
0x1aae   :  { %v3990_v40 = vpop.f32.mrf.mxu1 }
0x1aaf   :  { %v4002_v44 = vadd.f32 %v3996_v17, %v6240_v22  ;;  %v3991_v45 = vadd.f32 %v3990_v40, %v6246_v26  ;;  %v4006_v22 = vmul.f32 %v5461_v32, %v3999_v52 }
0x1ab1   :  { %v4001_v49 = vadd.f32 %v3991_v45, %v6246_v26  ;;  %v4009_v23 = vmul.f32 %v5445_v25, %v4002_v44  ;;  %v4003_v25 = vld [vmem:[%s6503_s6] sm:$0xff] }
0x1ab2   :  { %5071 = vmatprep.subr.mxu1 %v4003_v25 }
0x1ab3   :  { %5055 = vmatprep.subr.mxu0 %v4009_v23  ;;  %v4008_v35 = vmul.f32 %v5453_v29, %v4001_v49  ;;  %5072 = vmatpush3.msra.mxu1 %v4003_v25 }
0x1ab4   :  { %5056 = vmatpush3.msra.mxu0 %v4009_v23 }
0x1ab5   :  { %5057 = vmatprep.subr.mxu0 %v4008_v35 }
0x1ab6   :  { %5058 = vmatpush3.msra.mxu0 %v4008_v35 }
0x1ab7   :  { %5059 = vmatprep.subr.mxu0 %v4007_v4 }
0x1ab8   :  { %5060 = vmatpush3.msra.mxu0 %v4007_v4 }
0x1ab9   :  { %5061 = vmatprep.subr.mxu0 %v4006_v22 }
0x1aba   :  { %5062 = vmatpush3.msra.mxu0 %v4006_v22 }
0x1abb   :  { %5064 = vmatmul.mubr.msk.f32.vlgmr.msra.gmra.mxu0 %vm91_vm0, %v6310_v55 }
0x1abc   :  { %5066 = vmatprep.mubr.msk.f32.mxu0 %vm91_vm0, %v6317_v5 }
0x1abf   :  { %5067 = vmatmul.mubr.msk.f32.gmra.mxu0 %vm91_vm0, %v6325_v39  ;;  %vm6666_vm0 = vmmov %vm6664_vm3 }
0x1ac0   :  { %vm6667_vm2 = vmmov %vm6666_vm0 }
0x1b7b   :  { %v5065_v28 = vpop.f32.mrf.mxu0 }
0x1b7c   :  { %v4096_v11 = vmul.f32 %v5486_v50, %v5065_v28 }
0x1b7d   :  { %v4076_v29 = vpop.f32.mrf.mxu0 }
0x1b7e   :  { %v4095_v32 = vmul.f32 %v5484_v48, %v4076_v29  ;;  %v4401_v48 = vld [vmem:[%s6504_s7] ss:$0 sm:$0xff] }
0x1b7f   :  { %v5068_v19 = vpop.f32.mrf.mxu0 }
0x1b80   :  { %5073 = vmatprep.mubr.msk.f32.mxu1 %vm6664_vm3, %v4095_v32  ;;  %v4098_v5 = vmul.f32 %v5492_v56, %v5068_v19 }
0x1b81   :  { %v4086_v26 = vpop.f32.mrf.mxu0  ;;  %5074 = vmatmul.mubr.msk.f32.vlgmr.msra.gmra.mxu1 %vm6665_vm7, %v4096_v11 }
0x1b82   :  { %v4097_v55 = vmul.f32 %v5489_v53, %v4086_v26 }
0x1b84   :  { %5076 = vmatprep.mubr.msk.f32.mxu1 %vm6666_vm0, %v4097_v55 }
0x1b85   :  { %5077 = vmatmul.mubr.msk.f32.gmra.mxu1 %vm6667_vm2, %v4098_v5 }
0x1c41   :  { %v5075_v39 = vpop.f32.mrf.mxu1 }
0x1c42   :  { %v4189_v50 = vadd.f32 %v5075_v39, %v4401_v48 }
0x1c43   :  { %v4183_v47 = vpop.f32.mrf.mxu1 }
0x1c44   :  { %4204 = vst.msk [vmem:[%s6505_s26 + $0x8] sm:$0xff] %vm4202_vm1, %v4189_v50  ;;  %v4184_v60 = vadd.f32 %v4401_v48, %v4183_v47 }
0x1c45   :  { %v5078_v53 = vpop.f32.mrf.mxu1 }
0x1c46   :  { %4203 = vst.msk [vmem:[%s6505_s26] sm:$0xff] %vm4202_vm1, %v4184_v60  ;;  %v4199_v56 = vadd.f32 %v5078_v53, %v4401_v48 }
0x1c47   :  { %v4193_v54 = vpop.f32.mrf.mxu1 }
0x1c48   :  { %4206 = vst.msk [vmem:[%s6505_s26 + $0x18] sm:$0xff] %vm4202_vm1, %v4199_v56  ;;  %v4194_v57 = vadd.f32 %v4401_v48, %v4193_v54 }
0x1c4a   :  { %4205 = vst.msk [vmem:[%s6505_s26 + $0x10] sm:$0xff] %vm4202_vm1, %v4194_v57 }

</bundles_post_ra>
